<compile_context>
chip_gen: v7x
topology: tpu7x:2x2x1
jax: 0.10.0
libtpu: 0.0.40
codegen_flags: <defaults>
</compile_context>

<pallas_src>
import jax
import jax.numpy as jnp
from jax.experimental import pallas as pl
from jax.experimental.pallas import tpu as pltpu


# ------------------------------ small helpers ------------------------------
def _ceil_to(x, m):
    return (x + m - 1) // m * m


def _vmem_budget_bytes():
    """Per-generation VMEM sizing.

    v5e/v6e have 128 MiB VMEM per TensorCore, v7x only 64 MiB; the scoped
    default is 32 MiB everywhere.  Raise the scoped limit to ~75% of physical
    and size tiles against ~80% of that limit.  Unknown chips fall back to
    the v7x-safe numbers."""
    phys = 64 << 20                                  # conservative (v7x per-TC)
    try:
        kind = jax.devices()[0].device_kind.lower()
        if ("v5 lite" in kind) or ("v5e" in kind) or ("v6" in kind):
            phys = 128 << 20                         # v5e / v6e
    except Exception:
        pass
    limit = (phys * 3) // 4                          # 48 MiB v7x, 96 MiB v5e/v6e
    budget = (limit * 4) // 5
    return int(limit), int(budget)


def _choose_tiles(N, H, W, Hp, Wp, Cin, budget_bytes):
    """Largest (batch tile tn, row chunk hr) whose real VMEM footprint fits.

    Counts the double-buffered, lane/sublane-padded raw-input block, the f32
    conv chunk intermediate plus live bf16 im2col slices, and the output
    blocks — fixing the undercount flagged in the perf review."""
    def est(tn, hr):
        in_blk = tn * Hp * _ceil_to(Wp, 8) * 128 * 2          # bf16, lane-padded
        chunk = tn * hr * W * 128 * (4 + 2 * 2)               # f32 acc + bf16 temps
        outs = 2 * max(tn, 8) * 128 * 4 * 2                   # feats+probs, dbl-buf
        return 2 * in_blk + chunk + outs + (1 << 20)          # + weights / slack

    tns = sorted({d for d in range(1, N + 1)
                  if N % d == 0 and (d % 8 == 0 or d == N)}, reverse=True)
    hrs = sorted({d for d in range(1, H + 1) if H % d == 0}, reverse=True)
    for tn in tns:                      # prefer the biggest DMA block (batch tile)
        for hr in hrs:                  # then the biggest per-chunk matmul M
            if est(tn, hr) <= budget_bytes:
                return tn, hr
    return tns[-1], 1                   # smallest legal tile; always sane


# ----------------------------- Pallas kernel ------------------------------
def _make_kernel(TN, H, W, KH, KW, HR, Cin, Cout, NC):
    HW = H * W
    inv_hw = 1.0 / float(HW)

    def kernel(xp_ref, cw_ref, cb_ref, hw_ref, hb_ref, feat_ref, prob_ref):
        """One batch tile of the fused forward.

        xp_ref  : (TN, H+2, W+2, Cin) bf16  raw padded NHWC input tile
        cw_ref  : (KH*KW, Cin, Cout)  bf16  conv weight, per-offset slices
        cb_ref  : (1, Cout)           f32   conv bias
        hw_ref  : (Cout, NC)          f32   head weight
        hb_ref  : (1, NC)             f32   head bias
        feat_ref: (TN, Cout)          f32   pooled features
        prob_ref: (TN, NC)            f32   softmax probabilities
        """
        x = xp_ref[...]                               # padded tile stays in VMEM
        pooled = jnp.zeros((TN, Cout), jnp.float32)

        # --- extractor: fused-im2col conv + bias + ReLU + global avg pool ---
        # Per (kh, kw) offset, a shifted view of the padded tile feeds an
        # accumulating MXU matmul against the (Cin, Cout) weight slice.  Rows
        # are processed in HR-row chunks so the f32 intermediate is capped at
        # (TN*HR*W, Cout) and pooling is cheap per-chunk partial sums.
        for r0 in range(0, H, HR):
            acc = jnp.zeros((TN * HR * W, Cout), jnp.float32)
            for kh in range(KH):
                for kw in range(KW):
                    lhs = x[:, r0 + kh:r0 + kh + HR, kw:kw + W, :]
                    lhs = lhs.reshape(TN * HR * W, Cin)
                    acc = acc + jnp.dot(lhs, cw_ref[kh * KW + kw],
                                        preferred_element_type=jnp.float32)
            acc = jnp.maximum(acc + cb_ref[...], 0.0)          # bias + ReLU (f32)
            pooled = pooled + jnp.sum(acc.reshape(TN, HR * W, Cout), axis=1)

        feats = pooled * inv_hw                                # global avg pool
        feat_ref[...] = feats.astype(feat_ref.dtype)

        # --- head: linear + softmax (f32; exact reciprocal keeps sum == 1) ---
        logits = jnp.dot(feats, hw_ref[...],
                         preferred_element_type=jnp.float32) + hb_ref[...]
        m = jnp.max(logits, axis=-1, keepdims=True)
        e = jnp.exp(logits - m)
        probs = e * pl.reciprocal(jnp.sum(e, axis=-1, keepdims=True), approx=False)
        prob_ref[...] = probs.astype(prob_ref.dtype)

    return kernel


# ------------------------------ JAX wrapper -------------------------------
def model_forward(x_nchw, conv_w, conv_b, head_w, head_b, *, tn=None, hr=None):
    N, Cin, H, W = x_nchw.shape
    Cout, _, KH, KW = conv_w.shape
    NC = head_w.shape[1]
    pad = 1
    Hp, Wp = H + 2 * pad, W + 2 * pad

    # Host-side glue is now only 1x input bytes: bf16 NHWC, padded once.
    # (No 9x im2col tensor is ever materialized.)
    x_nhwc = jnp.transpose(x_nchw, (0, 2, 3, 1)).astype(jnp.bfloat16)
    xp = jnp.pad(x_nhwc, ((0, 0), (pad, pad), (pad, pad), (0, 0)))

    # Conv weight OIHW -> (KH*KW, Cin, Cout) bf16: per-offset matmul RHS slices.
    cw_mat = conv_w.transpose(2, 3, 1, 0).reshape(KH * KW, Cin, Cout).astype(jnp.bfloat16)
    cb_mat = conv_b.reshape(1, Cout).astype(jnp.float32)
    hw_mat = head_w.astype(jnp.float32)
    hb_mat = head_b.reshape(1, NC).astype(jnp.float32)

    vmem_limit, budget = _vmem_budget_bytes()
    auto_tn, auto_hr = _choose_tiles(N, H, W, Hp, Wp, Cin, budget)
    tn = auto_tn if tn is None else tn
    hr = auto_hr if hr is None else hr
    assert N % tn == 0 and (tn % 8 == 0 or tn == N), "illegal batch tile"
    assert H % hr == 0, "illegal row chunk"

    kernel = _make_kernel(tn, H, W, KH, KW, hr, Cin, Cout, NC)

    feats, probs = pl.pallas_call(
        kernel,
        out_shape=(
            jax.ShapeDtypeStruct((N, Cout), jnp.float32),
            jax.ShapeDtypeStruct((N, NC), jnp.float32),
        ),
        grid_spec=pltpu.PrefetchScalarGridSpec(
            num_scalar_prefetch=0,
            grid=(N // tn,),
            in_specs=[
                pl.BlockSpec((tn, Hp, Wp, Cin), lambda i: (i, 0, 0, 0)),   # raw input tile
                pl.BlockSpec((KH * KW, Cin, Cout), lambda i: (0, 0, 0)),   # weights resident
                pl.BlockSpec((1, Cout), lambda i: (0, 0)),
                pl.BlockSpec((Cout, NC), lambda i: (0, 0)),
                pl.BlockSpec((1, NC), lambda i: (0, 0)),
            ],
            out_specs=[
                pl.BlockSpec((tn, Cout), lambda i: (i, 0)),
                pl.BlockSpec((tn, NC), lambda i: (i, 0)),
            ],
        ),
        compiler_params=pltpu.CompilerParams(
            # batch tiles are independent -> shard across v7x's 2 TensorCores
            dimension_semantics=("parallel",),
            vmem_limit_bytes=int(vmem_limit)),
    )(xp, cw_mat, cb_mat, hw_mat, hb_mat)
    return feats, probs


# ---------------------------- pure-JAX reference ---------------------------
def reference_forward(x_nchw, conv_w, conv_b, head_w, head_b):
    N, Cin, H, W = x_nchw.shape
    Cout = conv_w.shape[0]
    conv = jax.lax.conv_general_dilated(
        x_nchw, conv_w, window_strides=(1, 1), padding=((1, 1), (1, 1)),
        dimension_numbers=("NCHW", "OIHW", "NCHW"))
    conv = conv + conv_b.reshape(1, Cout, 1, 1)
    conv = jnp.maximum(conv, 0.0)
    feats = jnp.mean(conv, axis=(2, 3))
    logits = feats @ head_w + head_b
    probs = jax.nn.softmax(logits, axis=-1)
    return feats, probs


if __name__ == "__main__":
    Cin, H, W, Cout, NC = 4, 16, 16, 32, 10

    key = jax.random.PRNGKey(0)
    kx, kw1, kb1, kw2, kb2 = jax.random.split(key, 5)

    conv_w = 0.1 * jax.random.normal(kw1, (Cout, Cin, 3, 3), dtype=jnp.float32)
    conv_b = 0.05 * jax.random.normal(kb1, (Cout,), dtype=jnp.float32)
    head_w = 0.1 * jax.random.normal(kw2, (Cout, NC), dtype=jnp.float32)
    head_b = 0.05 * jax.random.normal(kb2, (NC,), dtype=jnp.float32)

    def check(batch, tn=None, hr=None):
        x = jax.random.normal(jax.random.fold_in(kx, batch),
                              (batch, Cin, H, W), dtype=jnp.float32)
        feats, probs = model_forward(x, conv_w, conv_b, head_w, head_b, tn=tn, hr=hr)
        feats = jax.block_until_ready(feats)
        probs = jax.block_until_ready(probs)
        ref_feats, ref_probs = reference_forward(x, conv_w, conv_b, head_w, head_b)
        # Tolerances account for bf16 MXU operands (accumulation stays f32).
        assert jnp.allclose(feats, ref_feats, atol=1e-2, rtol=1e-2), "features mismatch"
        assert jnp.allclose(probs, ref_probs, atol=5e-3, rtol=1e-2), "probs mismatch"
        assert jnp.allclose(jnp.sum(probs, axis=-1), 1.0, atol=1e-5), "probs not normalized"

    check(batch=2)                 # spec-sized toy shape (single block, auto tiles)
    check(batch=16, tn=8, hr=8)    # exercises batch tiling + in-kernel row chunking

    print("KERNEL_OK")
</pallas_src>

<mosaic_0001>
module attributes {stable_mosaic.version = 11 : i64} {
  func.func @kernel(%arg0: i32, %arg1: memref<2x18x18x4xbf16, #tpu.memory_space<vmem>>, %arg2: memref<9x4x32xbf16, #tpu.memory_space<vmem>>, %arg3: memref<1x32xf32, #tpu.memory_space<vmem>>, %arg4: memref<32x10xf32, #tpu.memory_space<vmem>>, %arg5: memref<1x10xf32, #tpu.memory_space<vmem>>, %arg6: memref<2x32xf32, #tpu.memory_space<vmem>>, %arg7: memref<2x10xf32, #tpu.memory_space<vmem>>) attributes {dimension_semantics = [#tpu.dimension_semantics<parallel>], iteration_bounds = array<i64: 1>, scalar_prefetch = 0 : i64, scratch_operands = 0 : i64, tpu.core_type = #tpu.core_type<tc>, window_params = [{transform_indices = @transform_0, window_bounds = array<i64: 2, 18, 18, 4>}, {pipeline_mode = #tpu.pipeline_mode<synchronous>, transform_indices = @transform_1, window_bounds = array<i64: 9, 4, 32>}, {pipeline_mode = #tpu.pipeline_mode<synchronous>, transform_indices = @transform_2, window_bounds = array<i64: 1, 32>}, {pipeline_mode = #tpu.pipeline_mode<synchronous>, transform_indices = @transform_3, window_bounds = array<i64: 32, 10>}, {pipeline_mode = #tpu.pipeline_mode<synchronous>, transform_indices = @transform_4, window_bounds = array<i64: 1, 10>}, {transform_indices = @transform_5, window_bounds = array<i64: 2, 32>}, {transform_indices = @transform_6, window_bounds = array<i64: 2, 10>}]} {
    %c0 = arith.constant 0 : index
    %c0_0 = arith.constant 0 : index
    %c0_1 = arith.constant 0 : index
    %c0_2 = arith.constant 0 : index
    %0 = vector.load %arg1[%c0, %c0_0, %c0_1, %c0_2] : memref<2x18x18x4xbf16, #tpu.memory_space<vmem>>, vector<2x18x18x4xbf16>
    %cst = arith.constant 0.000000e+00 : f32
    %1 = vector.broadcast %cst : f32 to vector<2x32xf32>
    %cst_3 = arith.constant 0.000000e+00 : f32
    %2 = vector.broadcast %cst_3 : f32 to vector<512x32xf32>
    %3 = vector.extract_strided_slice %0 {offsets = [0, 0, 0, 0], sizes = [2, 16, 16, 4], strides = [1, 1, 1, 1]} : vector<2x18x18x4xbf16> to vector<2x16x16x4xbf16>
    %4 = vector.shape_cast %3 : vector<2x16x16x4xbf16> to vector<512x4xbf16>
    %c0_4 = arith.constant 0 : index
    %c0_5 = arith.constant 0 : index
    %c0_6 = arith.constant 0 : index
    %5 = vector.load %arg2[%c0_4, %c0_5, %c0_6] : memref<9x4x32xbf16, #tpu.memory_space<vmem>>, vector<1x4x32xbf16>
    %6 = vector.shape_cast %5 : vector<1x4x32xbf16> to vector<4x32xbf16>
    %cst_7 = arith.constant dense<0.000000e+00> : vector<512x32xf32>
    %7 = tpu.matmul %4, %6, %cst_7 {dimension_numbers = #tpu.dot_dimension_numbers<[1], [0], [0], [1], [0, 0, 1, 1], [], []>} : vector<512x4xbf16>, vector<4x32xbf16>, vector<512x32xf32> -> vector<512x32xf32>
    %8 = arith.addf %2, %7 : vector<512x32xf32>
    %9 = vector.extract_strided_slice %0 {offsets = [0, 0, 1, 0], sizes = [2, 16, 16, 4], strides = [1, 1, 1, 1]} : vector<2x18x18x4xbf16> to vector<2x16x16x4xbf16>
    %10 = vector.shape_cast %9 : vector<2x16x16x4xbf16> to vector<512x4xbf16>
    %c1 = arith.constant 1 : index
    %c0_8 = arith.constant 0 : index
    %c0_9 = arith.constant 0 : index
    %11 = vector.load %arg2[%c1, %c0_8, %c0_9] : memref<9x4x32xbf16, #tpu.memory_space<vmem>>, vector<1x4x32xbf16>
    %12 = vector.shape_cast %11 : vector<1x4x32xbf16> to vector<4x32xbf16>
    %cst_10 = arith.constant dense<0.000000e+00> : vector<512x32xf32>
    %13 = tpu.matmul %10, %12, %cst_10 {dimension_numbers = #tpu.dot_dimension_numbers<[1], [0], [0], [1], [0, 0, 1, 1], [], []>} : vector<512x4xbf16>, vector<4x32xbf16>, vector<512x32xf32> -> vector<512x32xf32>
    %14 = arith.addf %8, %13 : vector<512x32xf32>
    %15 = vector.extract_strided_slice %0 {offsets = [0, 0, 2, 0], sizes = [2, 16, 16, 4], strides = [1, 1, 1, 1]} : vector<2x18x18x4xbf16> to vector<2x16x16x4xbf16>
    %16 = vector.shape_cast %15 : vector<2x16x16x4xbf16> to vector<512x4xbf16>
    %c2 = arith.constant 2 : index
    %c0_11 = arith.constant 0 : index
    %c0_12 = arith.constant 0 : index
    %17 = vector.load %arg2[%c2, %c0_11, %c0_12] : memref<9x4x32xbf16, #tpu.memory_space<vmem>>, vector<1x4x32xbf16>
    %18 = vector.shape_cast %17 : vector<1x4x32xbf16> to vector<4x32xbf16>
    %cst_13 = arith.constant dense<0.000000e+00> : vector<512x32xf32>
    %19 = tpu.matmul %16, %18, %cst_13 {dimension_numbers = #tpu.dot_dimension_numbers<[1], [0], [0], [1], [0, 0, 1, 1], [], []>} : vector<512x4xbf16>, vector<4x32xbf16>, vector<512x32xf32> -> vector<512x32xf32>
    %20 = arith.addf %14, %19 : vector<512x32xf32>
    %21 = vector.extract_strided_slice %0 {offsets = [0, 1, 0, 0], sizes = [2, 16, 16, 4], strides = [1, 1, 1, 1]} : vector<2x18x18x4xbf16> to vector<2x16x16x4xbf16>
    %22 = vector.shape_cast %21 : vector<2x16x16x4xbf16> to vector<512x4xbf16>
    %c3 = arith.constant 3 : index
    %c0_14 = arith.constant 0 : index
    %c0_15 = arith.constant 0 : index
    %23 = vector.load %arg2[%c3, %c0_14, %c0_15] : memref<9x4x32xbf16, #tpu.memory_space<vmem>>, vector<1x4x32xbf16>
    %24 = vector.shape_cast %23 : vector<1x4x32xbf16> to vector<4x32xbf16>
    %cst_16 = arith.constant dense<0.000000e+00> : vector<512x32xf32>
    %25 = tpu.matmul %22, %24, %cst_16 {dimension_numbers = #tpu.dot_dimension_numbers<[1], [0], [0], [1], [0, 0, 1, 1], [], []>} : vector<512x4xbf16>, vector<4x32xbf16>, vector<512x32xf32> -> vector<512x32xf32>
    %26 = arith.addf %20, %25 : vector<512x32xf32>
    %27 = vector.extract_strided_slice %0 {offsets = [0, 1, 1, 0], sizes = [2, 16, 16, 4], strides = [1, 1, 1, 1]} : vector<2x18x18x4xbf16> to vector<2x16x16x4xbf16>
    %28 = vector.shape_cast %27 : vector<2x16x16x4xbf16> to vector<512x4xbf16>
    %c4 = arith.constant 4 : index
    %c0_17 = arith.constant 0 : index
    %c0_18 = arith.constant 0 : index
    %29 = vector.load %arg2[%c4, %c0_17, %c0_18] : memref<9x4x32xbf16, #tpu.memory_space<vmem>>, vector<1x4x32xbf16>
    %30 = vector.shape_cast %29 : vector<1x4x32xbf16> to vector<4x32xbf16>
    %cst_19 = arith.constant dense<0.000000e+00> : vector<512x32xf32>
    %31 = tpu.matmul %28, %30, %cst_19 {dimension_numbers = #tpu.dot_dimension_numbers<[1], [0], [0], [1], [0, 0, 1, 1], [], []>} : vector<512x4xbf16>, vector<4x32xbf16>, vector<512x32xf32> -> vector<512x32xf32>
    %32 = arith.addf %26, %31 : vector<512x32xf32>
    %33 = vector.extract_strided_slice %0 {offsets = [0, 1, 2, 0], sizes = [2, 16, 16, 4], strides = [1, 1, 1, 1]} : vector<2x18x18x4xbf16> to vector<2x16x16x4xbf16>
    %34 = vector.shape_cast %33 : vector<2x16x16x4xbf16> to vector<512x4xbf16>
    %c5 = arith.constant 5 : index
    %c0_20 = arith.constant 0 : index
    %c0_21 = arith.constant 0 : index
    %35 = vector.load %arg2[%c5, %c0_20, %c0_21] : memref<9x4x32xbf16, #tpu.memory_space<vmem>>, vector<1x4x32xbf16>
    %36 = vector.shape_cast %35 : vector<1x4x32xbf16> to vector<4x32xbf16>
    %cst_22 = arith.constant dense<0.000000e+00> : vector<512x32xf32>
    %37 = tpu.matmul %34, %36, %cst_22 {dimension_numbers = #tpu.dot_dimension_numbers<[1], [0], [0], [1], [0, 0, 1, 1], [], []>} : vector<512x4xbf16>, vector<4x32xbf16>, vector<512x32xf32> -> vector<512x32xf32>
    %38 = arith.addf %32, %37 : vector<512x32xf32>
    %39 = vector.extract_strided_slice %0 {offsets = [0, 2, 0, 0], sizes = [2, 16, 16, 4], strides = [1, 1, 1, 1]} : vector<2x18x18x4xbf16> to vector<2x16x16x4xbf16>
    %40 = vector.shape_cast %39 : vector<2x16x16x4xbf16> to vector<512x4xbf16>
    %c6 = arith.constant 6 : index
    %c0_23 = arith.constant 0 : index
    %c0_24 = arith.constant 0 : index
    %41 = vector.load %arg2[%c6, %c0_23, %c0_24] : memref<9x4x32xbf16, #tpu.memory_space<vmem>>, vector<1x4x32xbf16>
    %42 = vector.shape_cast %41 : vector<1x4x32xbf16> to vector<4x32xbf16>
    %cst_25 = arith.constant dense<0.000000e+00> : vector<512x32xf32>
    %43 = tpu.matmul %40, %42, %cst_25 {dimension_numbers = #tpu.dot_dimension_numbers<[1], [0], [0], [1], [0, 0, 1, 1], [], []>} : vector<512x4xbf16>, vector<4x32xbf16>, vector<512x32xf32> -> vector<512x32xf32>
    %44 = arith.addf %38, %43 : vector<512x32xf32>
    %45 = vector.extract_strided_slice %0 {offsets = [0, 2, 1, 0], sizes = [2, 16, 16, 4], strides = [1, 1, 1, 1]} : vector<2x18x18x4xbf16> to vector<2x16x16x4xbf16>
    %46 = vector.shape_cast %45 : vector<2x16x16x4xbf16> to vector<512x4xbf16>
    %c7 = arith.constant 7 : index
    %c0_26 = arith.constant 0 : index
    %c0_27 = arith.constant 0 : index
    %47 = vector.load %arg2[%c7, %c0_26, %c0_27] : memref<9x4x32xbf16, #tpu.memory_space<vmem>>, vector<1x4x32xbf16>
    %48 = vector.shape_cast %47 : vector<1x4x32xbf16> to vector<4x32xbf16>
    %cst_28 = arith.constant dense<0.000000e+00> : vector<512x32xf32>
    %49 = tpu.matmul %46, %48, %cst_28 {dimension_numbers = #tpu.dot_dimension_numbers<[1], [0], [0], [1], [0, 0, 1, 1], [], []>} : vector<512x4xbf16>, vector<4x32xbf16>, vector<512x32xf32> -> vector<512x32xf32>
    %50 = arith.addf %44, %49 : vector<512x32xf32>
    %51 = vector.extract_strided_slice %0 {offsets = [0, 2, 2, 0], sizes = [2, 16, 16, 4], strides = [1, 1, 1, 1]} : vector<2x18x18x4xbf16> to vector<2x16x16x4xbf16>
    %52 = vector.shape_cast %51 : vector<2x16x16x4xbf16> to vector<512x4xbf16>
    %c8 = arith.constant 8 : index
    %c0_29 = arith.constant 0 : index
    %c0_30 = arith.constant 0 : index
    %53 = vector.load %arg2[%c8, %c0_29, %c0_30] : memref<9x4x32xbf16, #tpu.memory_space<vmem>>, vector<1x4x32xbf16>
    %54 = vector.shape_cast %53 : vector<1x4x32xbf16> to vector<4x32xbf16>
    %cst_31 = arith.constant dense<0.000000e+00> : vector<512x32xf32>
    %55 = tpu.matmul %52, %54, %cst_31 {dimension_numbers = #tpu.dot_dimension_numbers<[1], [0], [0], [1], [0, 0, 1, 1], [], []>} : vector<512x4xbf16>, vector<4x32xbf16>, vector<512x32xf32> -> vector<512x32xf32>
    %56 = arith.addf %50, %55 : vector<512x32xf32>
    %c0_32 = arith.constant 0 : index
    %c0_33 = arith.constant 0 : index
    %57 = vector.load %arg3[%c0_32, %c0_33] : memref<1x32xf32, #tpu.memory_space<vmem>>, vector<1x32xf32>
    %58 = vector.broadcast %57 : vector<1x32xf32> to vector<512x32xf32>
    %59 = arith.addf %56, %58 : vector<512x32xf32>
    %cst_34 = arith.constant 0.000000e+00 : f32
    %60 = vector.broadcast %cst_34 : f32 to vector<512x32xf32>
    %61 = arith.maximumf %59, %60 : vector<512x32xf32>
    %62 = vector.shape_cast %61 : vector<512x32xf32> to vector<2x256x32xf32>
    %cst_35 = arith.constant dense<0.000000e+00> : vector<2x32xf32>
    %63 = vector.multi_reduction <add>, %62, %cst_35 [1] : vector<2x256x32xf32> to vector<2x32xf32>
    %64 = arith.addf %1, %63 : vector<2x32xf32>
    %cst_36 = arith.constant 3.906250e-03 : f32
    %65 = vector.broadcast %cst_36 : f32 to vector<2x32xf32>
    %66 = arith.mulf %64, %65 : vector<2x32xf32>
    %c0_37 = arith.constant 0 : index
    %c0_38 = arith.constant 0 : index
    %67 = vector.load %arg6[%c0_37, %c0_38] : memref<2x32xf32, #tpu.memory_space<vmem>>, vector<2x32xf32>
    tpu.vector_store %arg6[%c0_37, %c0_38], %66 {strides = array<i32>} : memref<2x32xf32, #tpu.memory_space<vmem>>, vector<2x32xf32>,
    %c0_39 = arith.constant 0 : index
    %c0_40 = arith.constant 0 : index
    %68 = vector.load %arg4[%c0_39, %c0_40] : memref<32x10xf32, #tpu.memory_space<vmem>>, vector<32x10xf32>
    %cst_41 = arith.constant dense<0.000000e+00> : vector<2x10xf32>
    %69 = tpu.matmul %66, %68, %cst_41 {dimension_numbers = #tpu.dot_dimension_numbers<[1], [0], [0], [1], [0, 0, 1, 1], [], []>} : vector<2x32xf32>, vector<32x10xf32>, vector<2x10xf32> -> vector<2x10xf32>
    %c0_42 = arith.constant 0 : index
    %c0_43 = arith.constant 0 : index
    %70 = vector.load %arg5[%c0_42, %c0_43] : memref<1x10xf32, #tpu.memory_space<vmem>>, vector<1x10xf32>
    %71 = vector.broadcast %70 : vector<1x10xf32> to vector<2x10xf32>
    %72 = arith.addf %69, %71 : vector<2x10xf32>
    %cst_44 = arith.constant dense<0xFF800000> : vector<2xf32>
    %73 = vector.multi_reduction <maximumf>, %72, %cst_44 [1] : vector<2x10xf32> to vector<2xf32>
    %74 = vector.shape_cast %73 : vector<2xf32> to vector<2x1xf32>
    %75 = vector.broadcast %74 : vector<2x1xf32> to vector<2x10xf32>
    %76 = arith.subf %72, %75 : vector<2x10xf32>
    %77 = math.exp %76 : vector<2x10xf32>
    %cst_45 = arith.constant dense<0.000000e+00> : vector<2xf32>
    %78 = vector.multi_reduction <add>, %77, %cst_45 [1] : vector<2x10xf32> to vector<2xf32>
    %79 = vector.shape_cast %78 : vector<2xf32> to vector<2x1xf32>
    %80 = tpu.reciprocal %79 : vector<2x1xf32> -> vector<2x1xf32>
    %81 = vector.broadcast %80 : vector<2x1xf32> to vector<2x10xf32>
    %82 = arith.mulf %77, %81 : vector<2x10xf32>
    %c0_46 = arith.constant 0 : index
    %c0_47 = arith.constant 0 : index
    %83 = vector.load %arg7[%c0_46, %c0_47] : memref<2x10xf32, #tpu.memory_space<vmem>>, vector<2x10xf32>
    tpu.vector_store %arg7[%c0_46, %c0_47], %82 {strides = array<i32>} : memref<2x10xf32, #tpu.memory_space<vmem>>, vector<2x10xf32>,
    return
  }
  func.func @transform_0(%arg0: i32) -> (i32, i32, i32, i32) {
    %c0_i32 = arith.constant 0 : i32
    %c0_i32_0 = arith.constant 0 : i32
    %c0_i32_1 = arith.constant 0 : i32
    %c0_i32_2 = arith.constant 0 : i32
    return %arg0, %c0_i32, %c0_i32_0, %c0_i32_1 : i32, i32, i32, i32
  }
  func.func @transform_1(%arg0: i32) -> (i32, i32, i32) {
    %c0_i32 = arith.constant 0 : i32
    %c0_i32_0 = arith.constant 0 : i32
    %c0_i32_1 = arith.constant 0 : i32
    %c0_i32_2 = arith.constant 0 : i32
    return %c0_i32, %c0_i32_0, %c0_i32_1 : i32, i32, i32
  }
  func.func @transform_2(%arg0: i32) -> (i32, i32) {
    %c0_i32 = arith.constant 0 : i32
    %c0_i32_0 = arith.constant 0 : i32
    %c0_i32_1 = arith.constant 0 : i32
    return %c0_i32, %c0_i32_0 : i32, i32
  }
  func.func @transform_3(%arg0: i32) -> (i32, i32) {
    %c0_i32 = arith.constant 0 : i32
    %c0_i32_0 = arith.constant 0 : i32
    %c0_i32_1 = arith.constant 0 : i32
    return %c0_i32, %c0_i32_0 : i32, i32
  }
  func.func @transform_4(%arg0: i32) -> (i32, i32) {
    %c0_i32 = arith.constant 0 : i32
    %c0_i32_0 = arith.constant 0 : i32
    %c0_i32_1 = arith.constant 0 : i32
    return %c0_i32, %c0_i32_0 : i32, i32
  }
  func.func @transform_5(%arg0: i32) -> (i32, i32) {
    %c0_i32 = arith.constant 0 : i32
    %c0_i32_0 = arith.constant 0 : i32
    return %arg0, %c0_i32 : i32, i32
  }
  func.func @transform_6(%arg0: i32) -> (i32, i32) {
    %c0_i32 = arith.constant 0 : i32
    %c0_i32_0 = arith.constant 0 : i32
    return %arg0, %c0_i32 : i32, i32
  }
}

</mosaic_0001>

<bundles_post_ra>
// kernel: tpu_custom_call.1
= control target key start
LH: loop header
LB: loop body
LE: loop exit
PB: predicated region body
PF: predicated region fallthrough
CT: control target
= control target key end

     0   :  { %12 = vsyncpa [#allocation3], 0  ;;  %vm1100_vm0 = vcmask 1041408   ;;  %vm134_vm1 = vsmask.f32 3328  ;;  %v10110_v29 = vmov 0  ;;  %s9995_s0 = inlined_call_operand.vmem [shape: bf16[2,18,18,4], index: 0, kind: input, shape index: {}]   ;;  %s9996_s1 = inlined_call_operand.vmem [shape: bf16[9,4,32], index: 1, kind: input, shape index: {}]   ;;  %s9997_s2 = inlined_call_operand.vmem [shape: f32[1,32], index: 2, kind: input, shape index: {}]   ;;  %s9998_s3 = inlined_call_operand.vmem [shape: f32[32,10], index: 3, kind: input, shape index: {}]   ;;  %s9999_s4 = inlined_call_operand.vmem [shape: f32[1,10], index: 4, kind: input, shape index: {}]   ;;  %s10000_s5 = inlined_call_operand.hbm [shape: f32[2,32], index: 5, kind: output, shape index: {0}]   ;;  %s10001_s6 = inlined_call_operand.hbm [shape: f32[2,10], index: 6, kind: output, shape index: {1}]  }
   0x1   :  { %v5776_v0 = vld [vmem:[%s9996_s1 + $0x8] sm:$0x3]  ;;  %v5515_v1 = vld [vmem:[%s9996_s1 + $0x2] sm:$0x3]  ;;  %v26_v5 = vld [vmem:[%s9995_s0 + $0x4] sm:$0xf] }
   0x2   :  { %7389 = vmatprep.subr.msk.bf16.mxu0 %vm1100_vm0, %v5776_v0  ;;  %7385 = vmatprep.subr.msk.bf16.mxu1 %vm1100_vm0, %v5515_v1  ;;  %v7590_v2 = vsel %vm1100_vm0, %v5776_v0, 0  ;;  %v1102_v3 = vsel %vm1100_vm0, %v5515_v1, 0  ;;  %v25_v4 = vld [vmem:[%s9995_s0] sm:$0xf]  ;;  %v27_v6 = vld [vmem:[%s9995_s0 + $0x8] sm:$0x1] }
   0x3   :  { %10109 = vst [vmem:[#allocation8_spill] sm:$0xff] %v7590_v2  ;;  %6525 = vmatpush3.bf16.msra.mxu0 %v7590_v2  ;;  %6261 = vmatpush3.bf16.msra.mxu1 %v1102_v3  ;;  %vm135_vm2 = vsmask.f32 7440  ;;  %v138_v7 = vshrl.u32 %v25_v4, 16  ;;  %v141_v8 = vshll.u32 %v25_v4, 16  ;;  %v147_v9 = vshll.u32 %v26_v5, 16 }
   0x4   :  { %v151_v10 = vshrl.u32 %v26_v5, 16  ;;  %v7606_v11 = vld [vmem:[%s9995_s0 + $0xc] sm:$0xf]  ;;  %v157_v12 = vshll.u32 %v27_v6, 16  ;;  %v7611_v13 = vld [vmem:[%s9995_s0 + $0x10] sm:$0xf]  ;;  %vm7634_vm3 = vmor %vm134_vm1, %vm135_vm2 }
   0x5   :  { %v7616_v14 = vld [vmem:[%s9995_s0 + $0x14] sm:$0x1]  ;;  %v140_v15 = vrot.slane %v138_v7, 4  ;;  %v143_v16 = vrot.slane %v141_v8, 5  ;;  %v149_v17 = vrot.slane %v147_v9, 5  ;;  %v162_v21 = vshrl.u32 %v7606_v11, 16 }
   0x6   :  { %v153_v18 = vrot.slane %v151_v10, 4  ;;  %v5813_v19 = vld [vmem:[%s9996_s1 + $0xa] sm:$0x3]  ;;  %v159_v20 = vrot.slane %v157_v12, 5  ;;  %v165_v22 = vshll.u32 %v7606_v11, 16  ;;  %v171_v23 = vshll.u32 %v7611_v13, 16 }
   0x7   :  { %7391 = vmatprep.subr.msk.bf16.mxu0 %vm1100_vm0, %v5813_v19  ;;  %v144_v24 = vor.u32 %v143_v16, %v140_v15  ;;  %v175_v26 = vshrl.u32 %v7611_v13, 16  ;;  %v181_v27 = vshll.u32 %v7616_v14, 16  ;;  %v7630_v28 = vld [vmem:[%s9995_s0 + $0x18] sm:$0xf]  ;;  %v10111_v29 = vsel %vm7634_vm3, 4294967295, %v10110_v29 }
   0x8   :  { %v154_v25 = vor.u32 %v153_v18, %v149_v17  ;;  %10112 = vst [vmem:[#allocation9_spill] sm:$0xff] %v10111_v29  ;;  %vm1003_vm4 = vcmask 31744   ;;  %v164_v30 = vrot.slane %v162_v21, 4  ;;  %v167_v31 = vrot.slane %v165_v22, 5  ;;  %v7641_v33 = vld [vmem:[%s9995_s0 + $0x1c] sm:$0xf] }
   0x9   :  { %v173_v32 = vrot.slane %v171_v23, 5  ;;  %v145_v34 = vrot.slane %v144_v24, 4  ;;  %v177_v36 = vrot.slane %v175_v26, 4  ;;  %v183_v37 = vrot.slane %v181_v27, 5  ;;  %v7647_v40 = vld [vmem:[%s9995_s0 + $0x20] sm:$0x1] }
   0xa   :  { %v155_v35 = vrot.slane %v154_v25, 4  ;;  %v168_v38 = vor.u32 %v167_v31, %v164_v30  ;;  %v186_v41 = vshrl.u32 %v7630_v28, 16  ;;  %v189_v42 = vshll.u32 %v7630_v28, 16  ;;  %v7659_v51 = vld [vmem:[%s9995_s0 + $0x24] sm:$0xf] }
   0xb   :  { %v150_v43 = vsel %vm7634_vm3, %v145_v34, %v149_v17  ;;  %v178_v45 = vor.u32 %v177_v36, %v173_v32  ;;  %v195_v46 = vshll.u32 %v7641_v33, 16  ;;  %v199_v54 = vshrl.u32 %v7641_v33, 16  ;;  %v7666_v56 = vld [vmem:[%s9996_s1] sm:$0x3]  ;;  %v7676_v61 = vld [vmem:[%s9995_s0 + $0x28] sm:$0xf] }
   0xc   :  { %v160_v44 = vsel %vm7634_vm3, %v155_v35, %v159_v20  ;;  %v169_v48 = vrot.slane %v168_v38, 4  ;;  %v188_v49 = vrot.slane %v186_v41, 4  ;;  %v191_v50 = vrot.slane %v189_v42, 5  ;;  %v7681_v62 = vld [vmem:[%s9995_s0 + $0x2c] sm:$0x1]  ;;  %7386 = vmatprep.subr.msk.bf16.mxu1 %vm1100_vm0, %v7666_v56 }
   0xd   :  { %v5516_v47 = vcombine.low %v150_v43, %v160_v44  ;;  %v179_v52 = vrot.slane %v178_v45, 4  ;;  %v197_v53 = vrot.slane %v195_v46, 5  ;;  %v205_v55 = vshll.u32 %v7647_v40, 16  ;;  %v7691_v4 = vld [vmem:[%s9995_s0 + $0x30] sm:$0xf] }
   0xe   :  { %v174_v57 = vsel %vm7634_vm3, %v169_v48, %v173_v32  ;;  %v192_v58 = vor.u32 %v191_v50, %v188_v49  ;;  %v201_v0 = vrot.slane %v199_v54, 4  ;;  %v3573_v3 = vsel %vm1100_vm0, %v5813_v19, 0  ;;  %v7701_v16 = vld [vmem:[%s9995_s0 + $0x34] sm:$0xf]  ;;  %v7710_v20 = vld [vmem:[%s9995_s0 + $0x38] sm:$0x1] }
   0xf   :  { %6262 = vmatprep.mubr.msk.bf16.mxu1 %vm1003_vm4, %v5516_v47  ;;  %v184_v63 = vsel %vm7634_vm3, %v179_v52, %v183_v37  ;;  %v207_v1 = vrot.slane %v205_v55, 5  ;;  %v210_v7 = vshrl.u32 %v7659_v51, 16  ;;  %v213_v8 = vshll.u32 %v7659_v51, 16  ;;  %v7718_v32 = vld [vmem:[%s9995_s0 + $0x3c] sm:$0xf] }
  0x10   :  { %v5517_v5 = vcombine.low %v174_v57, %v184_v63  ;;  %v193_v6 = vrot.slane %v192_v58, 4  ;;  %v202_v9 = vor.u32 %v201_v0, %v197_v53  ;;  %v219_v10 = vshll.u32 %v7676_v61, 16  ;;  %v7727_v38 = vld [vmem:[%s9995_s0 + $0x40] sm:$0xf]  ;;  %v7741_v52 = vld [vmem:[%s9995_s0 + $0x44] sm:$0x1] }
  0x11   :  { %v223_v12 = vshrl.u32 %v7676_v61, 16  ;;  %v229_v15 = vshll.u32 %v7681_v62, 16  ;;  %v212_v18 = vrot.slane %v210_v7, 4  ;;  %v215_v19 = vrot.slane %v213_v8, 5  ;;  %v7751_v0 = vld [vmem:[%s9995_s0 + $0x48] sm:$0xf] }
  0x12   :  { %6526 = vmatprep.mubr.msk.bf16.mxu0 %vm1003_vm4, %v5517_v5  ;;  %6263 = vmatmul.mubr.msk.bf16.vlgmr.msra.gmra.mrb[0].mxu1 %vm1003_vm4, %v5517_v5  ;;  %v198_v17 = vsel %vm7634_vm3, %v193_v6, %v197_v53  ;;  %v234_v21 = vshrl.u32 %v7691_v4, 16  ;;  %v203_v22 = vrot.slane %v202_v9, 4  ;;  %v221_v23 = vrot.slane %v219_v10, 5 }
  0x13   :  { %v225_v24 = vrot.slane %v223_v12, 4  ;;  %v231_v25 = vrot.slane %v229_v15, 5  ;;  %v216_v26 = vor.u32 %v215_v19, %v212_v18  ;;  %v237_v30 = vshll.u32 %v7691_v4, 16  ;;  %v7772_v18 = vld [vmem:[%s9995_s0 + $0x50] sm:$0x1] }
  0x14   :  { %v236_v27 = vrot.slane %v234_v21, 4  ;;  %v243_v31 = vshll.u32 %v7701_v16, 16  ;;  %v208_v34 = vsel %vm7634_vm3, %v203_v22, %v207_v1  ;;  %v247_v36 = vshrl.u32 %v7701_v16, 16 }
  0x15   :  { %v226_v35 = vor.u32 %v225_v24, %v221_v23  ;;  %v253_v37 = vshll.u32 %v7710_v20, 16  ;;  %v7729_v41 = vcombine.low %v198_v17, %v208_v34  ;;  %v217_v42 = vrot.slane %v216_v26, 4  ;;  %v7789_v34 = vld [vmem:[%s9995_s0 + $0x58] sm:$0xf] }
  0x16   :  { %v239_v43 = vrot.slane %v237_v30, 5  ;;  %v245_v44 = vrot.slane %v243_v31, 5  ;;  %v249_v46 = vrot.slane %v247_v36, 4  ;;  %v258_v48 = vshrl.u32 %v7718_v32, 16 }
  0x17   :  { %10113 = vst [vmem:[#allocation10_spill] sm:$0xff] %v7729_v41  ;;  %v227_v45 = vrot.slane %v226_v35, 4  ;;  %v255_v47 = vrot.slane %v253_v37, 5  ;;  %6527 = vmatmul.mubr.msk.bf16.vlgmr.msra.gmra.mrb[0].mxu0 %vm1003_vm4, %v7729_v41  ;;  %6266 = vmatprep.mubr.msk.bf16.mxu1 %vm1003_vm4, %v7729_v41  ;;  %v222_v49 = vsel %vm7634_vm3, %v217_v42, %v221_v23  ;;  %v261_v53 = vshll.u32 %v7718_v32, 16 }
  0x18   :  { %v240_v50 = vor.u32 %v239_v43, %v236_v27  ;;  %v267_v54 = vshll.u32 %v7727_v38, 16  ;;  %6591 = vmatpush3.bf16.msra.mxu0 %v3573_v3  ;;  %v250_v57 = vor.u32 %v249_v46, %v245_v44  ;;  %v260_v58 = vrot.slane %v258_v48, 4  ;;  %v7758_v3 = vld [vmem:[%s9995_s0 + $0x4c] sm:$0xf] }
  0x19   :  { %v232_v55 = vsel %vm7634_vm3, %v227_v45, %v231_v25  ;;  %v271_v63 = vshrl.u32 %v7727_v38, 16  ;;  %v263_v6 = vrot.slane %v261_v53, 5  ;;  %v277_v10 = vshll.u32 %v7741_v52, 16  ;;  %v7782_v25 = vld [vmem:[%s9995_s0 + $0x54] sm:$0xf] }
  0x1a   :  { %v7753_v1 = vcombine.low %v222_v49, %v232_v55  ;;  %v241_v5 = vrot.slane %v240_v50, 4  ;;  %v269_v7 = vrot.slane %v267_v54, 5  ;;  %v251_v8 = vrot.slane %v250_v57, 4  ;;  %v7802_v45 = vld [vmem:[%s9995_s0 + $0x5c] sm:$0x1] }
  0x1b   :  { %v273_v9 = vrot.slane %v271_v63, 4  ;;  %v1650_v12 = vsel %vm1100_vm0, %v7666_v56, 0  ;;  %v264_v17 = vor.u32 %v263_v6, %v260_v58  ;;  %v282_v19 = vshrl.u32 %v7751_v0, 16  ;;  %v7812_v54 = vld [vmem:[%s9995_s0 + $0x60] sm:$0xf] }
  0x1c   :  { %10114 = vst [vmem:[#allocation11_spill] sm:$0xff] %v7753_v1  ;;  %6530 = vmatprep.mubr.msk.bf16.mxu0 %vm1003_vm4, %v7753_v1  ;;  %6267 = vmatmul.mubr.msk.bf16.gmra.mrb[4].mxu1 %vm1003_vm4, %v7753_v1  ;;  %v246_v15 = vsel %vm7634_vm3, %v241_v5, %v245_v44  ;;  %v285_v21 = vshll.u32 %v7751_v0, 16  ;;  %v256_v56 = vsel %vm7634_vm3, %v251_v8, %v255_v47  ;;  %v279_v23 = vrot.slane %v277_v10, 5  ;;  %v7819_v5 = vld [vmem:[%s9995_s0 + $0x64] sm:$0xf] }
  0x1d   :  { %v274_v22 = vor.u32 %v273_v9, %v269_v7  ;;  %6327 = vmatpush3.bf16.msra.mxu1 %v1650_v12  ;;  %v291_v24 = vshll.u32 %v7758_v3, 16  ;;  %v7784_v26 = vcombine.low %v246_v15, %v256_v56  ;;  %v265_v27 = vrot.slane %v264_v17, 4  ;;  %v7832_v15 = vld [vmem:[%s9995_s0 + $0x68] sm:$0x1] }
  0x1e   :  { %v284_v30 = vrot.slane %v282_v19, 4  ;;  %v287_v31 = vrot.slane %v285_v21, 5  ;;  %v295_v37 = vshrl.u32 %v7758_v3, 16  ;;  %v301_v42 = vshll.u32 %v7772_v18, 16 }
  0x1f   :  { %10115 = vst [vmem:[#allocation12_spill] sm:$0xff] %v7784_v26  ;;  %v275_v35 = vrot.slane %v274_v22, 4  ;;  %v293_v36 = vrot.slane %v291_v24, 5  ;;  %6531 = vmatmul.mubr.msk.bf16.gmra.mrb[4].mxu0 %vm1003_vm4, %v7784_v26  ;;  %6270 = vmatprep.mubr.msk.bf16.mxu1 %vm1003_vm4, %v7784_v26  ;;  %v270_v43 = vsel %vm7634_vm3, %v265_v27, %v269_v7  ;;  %v306_v46 = vshrl.u32 %v7782_v25, 16 }
  0x20   :  { %v288_v44 = vor.u32 %v287_v31, %v284_v30  ;;  %v309_v47 = vshll.u32 %v7782_v25, 16  ;;  %v297_v49 = vrot.slane %v295_v37, 4  ;;  %v303_v50 = vrot.slane %v301_v42, 5 }
  0x21   :  { %v280_v48 = vsel %vm7634_vm3, %v275_v35, %v279_v23  ;;  %v315_v53 = vshll.u32 %v7789_v34, 16  ;;  %v308_v58 = vrot.slane %v306_v46, 4  ;;  %v319_v8 = vshrl.u32 %v7789_v34, 16  ;;  %v7841_v35 = vld [vmem:[%s9995_s0 + $0x6c] sm:$0xf] }
  0x22   :  { %v7814_v55 = vcombine.low %v270_v43, %v280_v48  ;;  %v289_v57 = vrot.slane %v288_v44, 4  ;;  %v311_v63 = vrot.slane %v309_v47, 5  ;;  %v298_v6 = vor.u32 %v297_v49, %v293_v36  ;;  %v7849_v44 = vld [vmem:[%s9995_s0 + $0x70] sm:$0xf] }
  0x23   :  { %v317_v7 = vrot.slane %v315_v53, 5  ;;  %v325_v9 = vshll.u32 %v7802_v45, 16  ;;  %v330_v17 = vshrl.u32 %v7812_v54, 16  ;;  %v333_v19 = vshll.u32 %v7812_v54, 16 }
  0x24   :  { %10116 = vst [vmem:[#allocation13_spill] sm:$0xff] %v7814_v55  ;;  %6534 = vmatprep.mubr.msk.bf16.mxu0 %vm1003_vm4, %v7814_v55  ;;  %6271 = vmatmul.mubr.msk.bf16.gmra.mrb[8].mxu1 %vm1003_vm4, %v7814_v55  ;;  %v294_v10 = vsel %vm7634_vm3, %v289_v57, %v293_v36  ;;  %v312_v12 = vor.u32 %v311_v63, %v308_v58  ;;  %v299_v21 = vrot.slane %v298_v6, 4  ;;  %v321_v56 = vrot.slane %v319_v8, 4 }
  0x25   :  { %v327_v22 = vrot.slane %v325_v9, 5  ;;  %v339_v23 = vshll.u32 %v7819_v5, 16  ;;  %v332_v27 = vrot.slane %v330_v17, 4  ;;  %v335_v30 = vrot.slane %v333_v19, 5 }
  0x26   :  { %v313_v24 = vrot.slane %v312_v12, 4  ;;  %v343_v31 = vshrl.u32 %v7819_v5, 16  ;;  %v304_v36 = vsel %vm7634_vm3, %v299_v21, %v303_v50  ;;  %v322_v37 = vor.u32 %v321_v56, %v317_v7  ;;  %v7858_v50 = vld [vmem:[%s9995_s0 + $0x74] sm:$0x1]  ;;  %v7879_v56 = vld [vmem:[%s9995_s0 + $0x7c] sm:$0xf] }
  0x27   :  { %v341_v42 = vrot.slane %v339_v23, 5  ;;  %v349_v43 = vshll.u32 %v7832_v15, 16  ;;  %v7851_v46 = vcombine.low %v294_v10, %v304_v36  ;;  %v336_v48 = vor.u32 %v335_v30, %v332_v27  ;;  %v7871_v10 = vld [vmem:[%s9995_s0 + $0x78] sm:$0xf] }
  0x28   :  { %v318_v47 = vsel %vm7634_vm3, %v313_v24, %v317_v7  ;;  %v345_v49 = vrot.slane %v343_v31, 4  ;;  %v323_v53 = vrot.slane %v322_v37, 4  ;;  %v354_v58 = vshrl.u32 %v7841_v35, 16 }
  0x29   :  { %10117 = vst [vmem:[#allocation14_spill] sm:$0xff] %v7851_v46  ;;  %v351_v57 = vrot.slane %v349_v43, 5  ;;  %v357_v63 = vshll.u32 %v7841_v35, 16  ;;  %6535 = vmatmul.mubr.msk.bf16.gmra.mrb[8].mxu0 %vm1003_vm4, %v7851_v46  ;;  %6274 = vmatprep.mubr.msk.bf16.mxu1 %vm1003_vm4, %v7851_v46  ;;  %v337_v6 = vrot.slane %v336_v48, 4  ;;  %v363_v8 = vshll.u32 %v7849_v44, 16 }
  0x2a   :  { %v346_v7 = vor.u32 %v345_v49, %v341_v42  ;;  %v367_v9 = vshrl.u32 %v7849_v44, 16  ;;  %v328_v12 = vsel %vm7634_vm3, %v323_v53, %v327_v22  ;;  %v356_v17 = vrot.slane %v354_v58, 4  ;;  %v7888_v22 = vld [vmem:[%s9995_s0 + $0x80] sm:$0x1]  ;;  %v7903_v53 = vld [vmem:[%s9995_s0 + $0x84] sm:$0xf] }
  0x2b   :  { %v359_v19 = vrot.slane %v357_v63, 5  ;;  %v373_v21 = vshll.u32 %v7858_v50, 16  ;;  %v7881_v23 = vcombine.low %v318_v47, %v328_v12  ;;  %v342_v24 = vsel %vm7634_vm3, %v337_v6, %v341_v42 }
  0x2c   :  { %v347_v27 = vrot.slane %v346_v7, 4  ;;  %v365_v30 = vrot.slane %v363_v8, 5  ;;  %v369_v36 = vrot.slane %v367_v9, 4  ;;  %v378_v43 = vshrl.u32 %v7871_v10, 16  ;;  %v7915_v8 = vld [vmem:[%s9996_s1 + $0xc] sm:$0x3] }
  0x2d   :  { %10118 = vst [vmem:[#allocation15_spill] sm:$0xff] %v7881_v23  ;;  %v360_v31 = vor.u32 %v359_v19, %v356_v17  ;;  %v375_v37 = vrot.slane %v373_v21, 5  ;;  %6538 = vmatprep.mubr.msk.bf16.mxu0 %vm1003_vm4, %v7881_v23  ;;  %6275 = vmatmul.mubr.msk.bf16.gmra.mrb[12].mxu1 %vm1003_vm4, %v7881_v23  ;;  %v381_v47 = vshll.u32 %v7871_v10, 16  ;;  %v387_v48 = vshll.u32 %v7879_v56, 16 }
  0x2e   :  { %v352_v42 = vsel %vm7634_vm3, %v347_v27, %v351_v57  ;;  %v391_v49 = vshrl.u32 %v7879_v56, 16  ;;  %v370_v6 = vor.u32 %v369_v36, %v365_v30  ;;  %v380_v7 = vrot.slane %v378_v43, 4  ;;  %v7910_v57 = vld [vmem:[%s9995_s0 + $0x88] sm:$0xf]  ;;  %7392 = vmatprep.subr.msk.bf16.mxu0 %vm1100_vm0, %v7915_v8 }
  0x2f   :  { %v7905_v58 = vcombine.low %v342_v24, %v352_v42  ;;  %v361_v63 = vrot.slane %v360_v31, 4  ;;  %v383_v9 = vrot.slane %v381_v47, 5  ;;  %v389_v12 = vrot.slane %v387_v48, 5  ;;  %v7931_v47 = vld [vmem:[%s9995_s0 + $0x8c] sm:$0x1] }
  0x30   :  { %v393_v17 = vrot.slane %v391_v49, 4  ;;  %v397_v19 = vshll.u32 %v7888_v22, 16  ;;  %v371_v24 = vrot.slane %v370_v6, 4  ;;  %v402_v27 = vshrl.u32 %v7903_v53, 16 }
  0x31   :  { %10119 = vst [vmem:[#allocation16_spill] sm:$0xff] %v7905_v58  ;;  %6278 = vmatprep.mubr.msk.bf16.mxu1 %vm1003_vm4, %v7905_v58  ;;  %v366_v21 = vsel %vm7634_vm3, %v361_v63, %v365_v30  ;;  %v405_v31 = vshll.u32 %v7903_v53, 16  ;;  %6539 = vmatmul.mubr.msk.bf16.gmra.mrb[12].mxu0 %vm1003_vm4, %v7905_v58  ;;  %v384_v36 = vor.u32 %v383_v9, %v380_v7  ;;  %v411_v48 = vshll.u32 %v7910_v57, 16  ;;  %v61_v30 = vld [vmem:[%s9995_s0 + $0x90] sm:$0xf] }
  0x32   :  { %v394_v43 = vor.u32 %v393_v17, %v389_v12  ;;  %v399_v42 = vrot.slane %v397_v19, 5  ;;  %v376_v49 = vsel %vm7634_vm3, %v371_v24, %v375_v37  ;;  %v404_v63 = vrot.slane %v402_v27, 4  ;;  %v62_v9 = vld [vmem:[%s9995_s0 + $0x94] sm:$0xf]  ;;  %v7957_v24 = vld [vmem:[%s9995_s0 + $0x98] sm:$0x1] }
  0x33   :  { %v407_v6 = vrot.slane %v405_v31, 5  ;;  %v415_v7 = vshrl.u32 %v7910_v57, 16  ;;  %v7943_v17 = vcombine.low %v366_v21, %v376_v49  ;;  %v385_v19 = vrot.slane %v384_v36, 4  ;;  %v64_v36 = vld [vmem:[%s9995_s0 + $0x9c] sm:$0xf] }
  0x34   :  { %v395_v60 = vrot.slane %v394_v43, 4  ;;  %v413_v59 = vrot.slane %v411_v48, 5  ;;  %v421_v58 = vshll.u32 %v7931_v47, 16  ;;  %v426_v23 = vshrl.u32 %v61_v30, 16 }
  0x35   :  { %10120 = vst [vmem:[#allocation17_spill] sm:$0xff] %v7943_v17  ;;  %v408_v39 = vor.u32 %v407_v6, %v404_v63  ;;  %v417_v2 = vrot.slane %v415_v7, 4  ;;  %6542 = vmatprep.mubr.msk.bf16.mxu0 %vm1003_vm4, %v7943_v17  ;;  %6279 = vmatmul.mubr.msk.bf16.gmra.mrb[16].mxu1 %vm1003_vm4, %v7943_v17  ;;  %v390_v37 = vsel %vm7634_vm3, %v385_v19, %v389_v12  ;;  %v429_v27 = vshll.u32 %v61_v30, 16 }
  0x36   :  { %v400_v21 = vsel %vm7634_vm3, %v395_v60, %v399_v42  ;;  %v435_v31 = vshll.u32 %v62_v9, 16  ;;  %v423_v63 = vrot.slane %v421_v58, 5  ;;  %v65_v60 = vld [vmem:[%s9995_s0 + $0xa0] sm:$0xf]  ;;  %v428_v12 = vrot.slane %v426_v23, 4 }
  0x37   :  { %v7962_v43 = vcombine.low %v390_v37, %v400_v21  ;;  %v409_v48 = vrot.slane %v408_v39, 4  ;;  %v418_v49 = vor.u32 %v417_v2, %v413_v59  ;;  %v431_v42 = vrot.slane %v429_v27, 5  ;;  %v66_v2 = vld [vmem:[%s9995_s0 + $0xa4] sm:$0x1]  ;;  %v67_v27 = vld [vmem:[%s9995_s0 + $0xa8] sm:$0xf] }
  0x38   :  { %v437_v6 = vrot.slane %v435_v31, 5  ;;  %v439_v7 = vshrl.u32 %v62_v9, 16  ;;  %v445_v37 = vshll.u32 %v7957_v24, 16  ;;  %v450_v39 = vshrl.u32 %v64_v36, 16 }
  0x39   :  { %10121 = vst [vmem:[#allocation18_spill] sm:$0xff] %v7962_v43  ;;  %6282 = vmatprep.mubr.msk.bf16.mxu1 %vm1003_vm4, %v7962_v43  ;;  %v414_v30 = vsel %vm7634_vm3, %v409_v48, %v413_v59  ;;  %v419_v19 = vrot.slane %v418_v49, 4  ;;  %6543 = vmatmul.mubr.msk.bf16.gmra.mrb[16].mxu0 %vm1003_vm4, %v7962_v43  ;;  %v432_v23 = vor.u32 %v431_v42, %v428_v12  ;;  %v453_v9 = vshll.u32 %v64_v36, 16  ;;  %v68_v36 = vld [vmem:[%s9995_s0 + $0xac] sm:$0xf] }
  0x3a   :  { %v441_v58 = vrot.slane %v439_v7, 4  ;;  %v459_v21 = vshll.u32 %v65_v60, 16  ;;  %v447_v31 = vrot.slane %v445_v37, 5  ;;  %v452_v48 = vrot.slane %v450_v39, 4 }
  0x3b   :  { %v424_v59 = vsel %vm7634_vm3, %v419_v19, %v423_v63  ;;  %v463_v49 = vshrl.u32 %v65_v60, 16  ;;  %v433_v46 = vrot.slane %v432_v23, 4  ;;  %v455_v26 = vrot.slane %v453_v9, 5  ;;  %v69_v19 = vld [vmem:[%s9995_s0 + $0xb0] sm:$0x1] }
  0x3c   :  { %v7982_v17 = vcombine.low %v414_v30, %v424_v59  ;;  %v442_v55 = vor.u32 %v441_v58, %v437_v6  ;;  %v461_v12 = vrot.slane %v459_v21, 5  ;;  %v469_v7 = vshll.u32 %v66_v2, 16  ;;  %v70_v9 = vld [vmem:[%s9995_s0 + $0xb4] sm:$0xf] }
  0x3d   :  { %v465_v42 = vrot.slane %v463_v49, 4  ;;  %v474_v43 = vshrl.u32 %v67_v27, 16  ;;  %v438_v63 = vsel %vm7634_vm3, %v433_v46, %v437_v6  ;;  %v456_v30 = vor.u32 %v455_v26, %v452_v48  ;;  %v71_v26 = vld [vmem:[%s9995_s0 + $0xb8] sm:$0xf] }
  0x3e   :  { %10122 = vst [vmem:[#allocation19_spill] sm:$0xff] %v7982_v17  ;;  %6546 = vmatprep.mubr.msk.bf16.mxu0 %vm1003_vm4, %v7982_v17  ;;  %6283 = vmatmul.mubr.msk.bf16.gmra.mrb[20].mxu1 %vm1003_vm4, %v7982_v17  ;;  %v443_v60 = vrot.slane %v442_v55, 4  ;;  %v477_v37 = vshll.u32 %v67_v27, 16  ;;  %v471_v23 = vrot.slane %v469_v7, 5  ;;  %v483_v58 = vshll.u32 %v68_v36, 16 }
  0x3f   :  { %v466_v39 = vor.u32 %v465_v42, %v461_v12  ;;  %v476_v2 = vrot.slane %v474_v43, 4  ;;  %v457_v59 = vrot.slane %v456_v30, 4  ;;  %v487_v55 = vshrl.u32 %v68_v36, 16 }
  0x40   :  { %v448_v21 = vsel %vm7634_vm3, %v443_v60, %v447_v31  ;;  %v479_v46 = vrot.slane %v477_v37, 5  ;;  %v485_v48 = vrot.slane %v483_v58, 5  ;;  %v493_v43 = vshll.u32 %v69_v19, 16  ;;  %v8011_v31 = vld [vmem:[%s9995_s0 + $0xbc] sm:$0x1] }
  0x41   :  { %v8004_v6 = vcombine.low %v438_v63, %v448_v21  ;;  %v467_v27 = vrot.slane %v466_v39, 4  ;;  %v462_v49 = vsel %vm7634_vm3, %v457_v59, %v461_v12  ;;  %v489_v7 = vrot.slane %v487_v55, 4  ;;  %v8022_v19 = vld [vmem:[%s9995_s0 + $0xc0] sm:$0xf]  ;;  %v8029_v21 = vld [vmem:[%s9995_s0 + $0xc4] sm:$0xf] }
  0x42   :  { %v480_v42 = vor.u32 %v479_v46, %v476_v2  ;;  %v498_v36 = vshrl.u32 %v70_v9, 16  ;;  %v495_v60 = vrot.slane %v493_v43, 5  ;;  %v501_v30 = vshll.u32 %v70_v9, 16  ;;  %v8041_v43 = vld [vmem:[%s9995_s0 + $0xc8] sm:$0x1] }
  0x43   :  { %10123 = vst [vmem:[#allocation20_spill] sm:$0xff] %v8004_v6  ;;  %6547 = vmatmul.mubr.msk.bf16.gmra.mrb[20].mxu0 %vm1003_vm4, %v8004_v6  ;;  %6286 = vmatprep.mubr.msk.bf16.mxu1 %vm1003_vm4, %v8004_v6  ;;  %v472_v63 = vsel %vm7634_vm3, %v467_v27, %v471_v23  ;;  %v507_v12 = vshll.u32 %v71_v26, 16  ;;  %v490_v2 = vor.u32 %v489_v7, %v485_v48  ;;  %v511_v46 = vshrl.u32 %v71_v26, 16 }
  0x44   :  { %v8024_v37 = vcombine.low %v462_v49, %v472_v63  ;;  %v481_v39 = vrot.slane %v480_v42, 4  ;;  %v500_v58 = vrot.slane %v498_v36, 4  ;;  %v503_v59 = vrot.slane %v501_v30, 5  ;;  %v79_v30 = vld [vmem:[%s9995_s0 + $0xd8] sm:$0xf] }
  0x45   :  { %v509_v23 = vrot.slane %v507_v12, 5  ;;  %v517_v9 = vshll.u32 %v8011_v31, 16  ;;  %v491_v27 = vrot.slane %v490_v2, 4  ;;  %v3125_v49 = vshrl.u32 %v8022_v19, 16 }
  0x46   :  { %10124 = vst [vmem:[#allocation21_spill] sm:$0xff] %v8024_v37  ;;  %6550 = vmatprep.mubr.msk.bf16.mxu0 %vm1003_vm4, %v8024_v37  ;;  %6287 = vmatmul.mubr.msk.bf16.gmra.mrb[24].mxu1 %vm1003_vm4, %v8024_v37  ;;  %v486_v55 = vsel %vm7634_vm3, %v481_v39, %v485_v48  ;;  %v3128_v26 = vshll.u32 %v8022_v19, 16  ;;  %v504_v42 = vor.u32 %v503_v59, %v500_v58  ;;  %v513_v7 = vrot.slane %v511_v46, 4  ;;  %v80_v37 = vld [vmem:[%s9995_s0 + $0xdc] sm:$0xf] }
  0x47   :  { %v519_v36 = vrot.slane %v517_v9, 5  ;;  %v3134_v63 = vshll.u32 %v8029_v21, 16  ;;  %v496_v48 = vsel %vm7634_vm3, %v491_v27, %v495_v60  ;;  %v3127_v12 = vrot.slane %v3125_v49, 4 }
  0x48   :  { %v3130_v39 = vrot.slane %v3128_v26, 5  ;;  %v3138_v2 = vshrl.u32 %v8029_v21, 16  ;;  %v8055_v58 = vcombine.low %v486_v55, %v496_v48  ;;  %v505_v59 = vrot.slane %v504_v42, 4  ;;  %v81_v55 = vld [vmem:[%s9995_s0 + $0xe0] sm:$0x1] }
  0x49   :  { %v514_v46 = vor.u32 %v513_v7, %v509_v23  ;;  %v3136_v9 = vrot.slane %v3134_v63, 5  ;;  %v3144_v1 = vshll.u32 %v8041_v43, 16  ;;  %v522_v41 = vshrl.u32 %v79_v30, 16 }
  0x4a   :  { %10125 = vst [vmem:[#allocation22_spill] sm:$0xff] %v8055_v58  ;;  %v3131_v6 = vor.u32 %v3130_v39, %v3127_v12  ;;  %v3140_v17 = vrot.slane %v3138_v2, 4  ;;  %6290 = vmatprep.mubr.msk.bf16.mxu1 %vm1003_vm4, %v8055_v58  ;;  %v510_v60 = vsel %vm7634_vm3, %v505_v59, %v509_v23  ;;  %v525_v49 = vshll.u32 %v79_v30, 16  ;;  %v8070_v12 = vld [vmem:[%s9995_s0 + $0xe4] sm:$0xf] }
  0x4b   :  { %6551 = vmatmul.mubr.msk.bf16.gmra.mrb[24].mxu0 %vm1003_vm4, %v8055_v58  ;;  %v515_v27 = vrot.slane %v514_v46, 4  ;;  %v531_v26 = vshll.u32 %v80_v37, 16  ;;  %v3146_v63 = vrot.slane %v3144_v1, 5  ;;  %v524_v48 = vrot.slane %v522_v41, 4  ;;  %10126 = vst [vmem:[#allocation23_spill] sm:$0xff] %v8070_v12 }
  0x4c   :  { %v3132_v42 = vrot.slane %v3131_v6, 4  ;;  %v3141_v7 = vor.u32 %v3140_v17, %v3136_v9  ;;  %v527_v23 = vrot.slane %v525_v49, 5  ;;  %v535_v59 = vshrl.u32 %v80_v37, 16  ;;  %v8077_v30 = vld [vmem:[%s9995_s0 + $0xe8] sm:$0xf] }
  0x4d   :  { %v520_v39 = vsel %vm7634_vm3, %v515_v27, %v519_v36  ;;  %v533_v2 = vrot.slane %v531_v26, 5  ;;  %10127 = vst [vmem:[#allocation24_spill] sm:$0xff] %v8077_v30  ;;  %v541_v17 = vshll.u32 %v81_v55, 16  ;;  %v8086_v46 = vld [vmem:[%s9995_s0 + $0xec] sm:$0x1]  ;;  %v549_v49 = vshll.u32 %v8070_v12, 16 }
  0x4e   :  { %v8079_v6 = vcombine.low %v510_v60, %v520_v39  ;;  %v3137_v41 = vsel %vm7634_vm3, %v3132_v42, %v3136_v9  ;;  %v3142_v1 = vrot.slane %v3141_v7, 4  ;;  %10129 = vst [vmem:[#allocation26_spill] sm:$0xff] %v8086_v46  ;;  %v8091_v37 = vld [vmem:[%s9996_s1 + $0x4] sm:$0x3]  ;;  %v528_v36 = vor.u32 %v527_v23, %v524_v48 }
  0x4f   :  { %10130 = vst [vmem:[#allocation27_spill] sm:$0xff] %v8091_v37  ;;  %v537_v27 = vrot.slane %v535_v59, 4  ;;  %v546_v60 = vshrl.u32 %v8070_v12, 16  ;;  %7387 = vmatprep.subr.msk.bf16.mxu1 %vm1100_vm0, %v8091_v37 }
  0x50   :  { %10128 = vst [vmem:[#allocation25_spill] sm:$0xff] %v8079_v6 }
  0x51   :  { %13 = vsyncpa [#allocation5], 0  ;;  %6554 = vmatprep.mubr.msk.bf16.mxu0 %vm1003_vm4, %v8079_v6  ;;  %6291 = vmatmul.mubr.msk.bf16.gmra.mrb[28].mxu1 %vm1003_vm4, %v8079_v6  ;;  %v3147_v9 = vsel %vm7634_vm3, %v3142_v1, %v3146_v63  ;;  %v543_v55 = vrot.slane %v541_v17, 5  ;;  %v555_v26 = vshll.u32 %v8077_v30, 16  ;;  %v559_v42 = vshrl.u32 %v8077_v30, 16  ;;  %s7544_s9 = smov [#allocation2]  }
  0x52   :  { %v8108_v7 = vld [vmem:[%s9995_s0 + $0xf0] sm:$0xf]  ;;  %v8110_v48 = vcombine.low %v3137_v41, %v3147_v9  ;;  %v529_v39 = vrot.slane %v528_v36, 4  ;;  %v538_v23 = vor.u32 %v537_v27, %v533_v2  ;;  %v548_v59 = vrot.slane %v546_v60, 4  ;;  %v8115_v6 = vld [vmem:[%s9995_s0 + $0xf4] sm:$0xf] }
  0x53   :  { %10131 = vst [vmem:[#allocation28_spill] sm:$0xff] %v8108_v7  ;;  %v551_v63 = vrot.slane %v549_v49, 5  ;;  %v557_v1 = vrot.slane %v555_v26, 5  ;;  %v561_v17 = vrot.slane %v559_v42, 4  ;;  %v565_v58 = vshll.u32 %v8086_v46, 16  ;;  %s5493_s10 = sshll.u32 %s7544_s9, 4  ;;  %s5494_s10 = int_to_ptr.vmem [resolvable:$true] %s5493_s10 }
  0x54   :  { %10132 = vst [vmem:[#allocation29_spill] sm:$0xff] %v8110_v48  ;;  %6555 = vmatmul.mubr.msk.bf16.gmra.mrb[28].mxu0 %vm1003_vm4, %v8110_v48  ;;  %v534_v41 = vsel %vm7634_vm3, %v529_v39, %v533_v2  ;;  %v539_v9 = vrot.slane %v538_v23, 4  ;;  %v570_v36 = vshrl.u32 %v8108_v7, 16  ;;  %v573_v27 = vshll.u32 %v8108_v7, 16  ;;  %v8127_v49 = vld [vmem:[%s9995_s0 + $0xf8] sm:$0x1]  ;;  %p7498_p1 = scmp.lt.s32.totalorder %s5494_s10, %s5494_s10 }
  0x55   :  { %v552_v60 = vor.u32 %v551_v63, %v548_v59  ;;  %v562_v37 = vor.u32 %v561_v17, %v557_v1  ;;  %v567_v30 = vrot.slane %v565_v58, 5  ;;  %v579_v26 = vshll.u32 %v8115_v6, 16  ;;  %v8136_v58 = vld [vmem:[%s9995_s0 + $0xfc] sm:$0xf]  ;;  %s7493_s11 = scalar_lea.vmem %s5494_s10, 32 }
  0x56   :  { %v544_v42 = vsel %vm7634_vm3, %v539_v9, %v543_v55  ;;  %v572_v48 = vrot.slane %v570_v36, 4  ;;  %v575_v2 = vrot.slane %v573_v27, 5  ;;  %v583_v39 = vshrl.u32 %v8115_v6, 16  ;;  %10133 = vst [vmem:[#allocation30_spill] sm:$0xff] %v8136_v58  ;;  %v8142_v55 = vld [vmem:[%s9995_s0 + $0x100] sm:$0xf]  ;;  %p7494_p0 = scmp.ne.s32.totalorder %s5494_s10, %s7493_s11  ;;  %p7499_p2 = scmp.lt.s32.totalorder %s7493_s11, %s7493_s11 }
  0x57   :  { %v5532_v23 = vcombine.low %v534_v41, %v544_v42  ;;  %v553_v46 = vrot.slane %v552_v60, 4  ;;  %v563_v7 = vrot.slane %v562_v37, 4  ;;  %v581_v59 = vrot.slane %v579_v26, 5  ;;  %v8153_v9 = vld [vmem:[%s9995_s0 + $0x104] sm:$0x1] }
  0x58   :  { %v576_v63 = vor.u32 %v575_v2, %v572_v48  ;;  %v585_v17 = vrot.slane %v583_v39, 4  ;;  %v589_v12 = vshll.u32 %v8127_v49, 16  ;;  %vm1973_vm5 = vcmask 1042432   ;;  %p7500_p3 = por %p7499_p2, %p7498_p1 }
  0x59   :  { %6294 = vmatprep.mubr.msk.bf16.mxu1 %vm1003_vm4, %v5532_v23  ;;  %v558_v37 = vsel %vm7634_vm3, %v553_v46, %v557_v1  ;;  %v568_v41 = vsel %vm7634_vm3, %v563_v7, %v567_v30  ;;  %vm1974_vm6 = vcmask 1046532   ;;  %v5645_v48 = vrot.slane %v7606_v11, 9 }
  0x5a   :  { %v5533_v36 = vcombine.low %v558_v37, %v568_v41  ;;  %v577_v27 = vrot.slane %v576_v63, 4  ;;  %v586_v60 = vor.u32 %v585_v17, %v581_v59  ;;  %v591_v26 = vrot.slane %v589_v12, 5  ;;  %vm8155_vm7 = vmor %vm1973_vm5, %vm1974_vm6  ;;  %p7501_p4 = pnand %p7500_p3, %p7494_p0 }
  0x5b   :  { %v1985_v46 = vrot.slane %v7611_v13, 5  ;;  %v594_v30 = vshrl.u32 %v8136_v58, 16  ;;  %v597_v7 = vshll.u32 %v8136_v58, 16  ;;  %v603_v11 = vshll.u32 %v8142_v55, 16 }
  0x5c   :  { %6558 = vmatprep.mubr.msk.bf16.mxu0 %vm1003_vm4, %v5533_v36  ;;  %6295 = vmatmul.mubr.msk.bf16.gmra.mrb[32].mxu1 %vm1003_vm4, %v5533_v36  ;;  %v582_v1 = vsel %vm7634_vm3, %v577_v27, %v581_v59  ;;  %v587_v12 = vrot.slane %v586_v60, 4  ;;  %v607_v2 = vshrl.u32 %v8142_v55, 16  ;;  %v613_v39 = vshll.u32 %v8153_v9, 16  ;;  %v8176_v59 = vld [vmem:[%s9995_s0 + $0x108] sm:$0xf] }
  0x5d   :  { %v1986_v13 = vsel %vm8155_vm7, %v5645_v48, %v1985_v46  ;;  %v1987_v23 = vrot.slane %v1985_v46, 4  ;;  %v596_v63 = vrot.slane %v594_v30, 4  ;;  %v599_v17 = vrot.slane %v597_v7, 5 }
  0x5e   :  { %v592_v37 = vsel %vm7634_vm3, %v587_v12, %v591_v26  ;;  %v605_v41 = vrot.slane %v603_v11, 5  ;;  %v609_v58 = vrot.slane %v607_v2, 4  ;;  %v615_v36 = vrot.slane %v613_v39, 5  ;;  %v8188_v26 = vld [vmem:[%s9995_s0 + $0x10c] sm:$0xf] }
  0x5f   :  { %v8178_v27 = vcombine.low %v582_v1, %v592_v37  ;;  %v10137_v60 = vrot.slane %v7616_v14, 5  ;;  %v600_v46 = vor.u32 %v599_v17, %v596_v63  ;;  %v5646_v30 = vrot.slane %v7630_v28, 9 }
  0x60   :  { %v610_v11 = vor.u32 %v609_v58, %v605_v41  ;;  %v10139_v12 = vrot.slane %v7641_v33, 5  ;;  %v3947_v14 = vsel %vm1100_vm0, %v7915_v8, 0  ;;  %v8207_v58 = vld [vmem:[%s9995_s0 + $0x110] sm:$0x1]  ;;  %v621_v8 = vshll.u32 %v8176_v59, 16 }
  0x61   :  { %10136 = vst [vmem:[#allocation31_spill] sm:$0xff] %v8178_v27  ;;  %v1989_v48 = vsel %vm8155_vm7, %v1987_v23, %v10137_v60  ;;  %6559 = vmatmul.mubr.msk.bf16.gmra.mrb[32].mxu0 %vm1003_vm4, %v8178_v27  ;;  %6298 = vmatprep.mubr.msk.bf16.mxu1 %vm1003_vm4, %v8178_v27  ;;  %v601_v28 = vrot.slane %v600_v46, 4  ;;  %v10141_v63 = vrot.slane %v7647_v40, 5  ;;  %v627_v17 = vshll.u32 %v8188_v26, 16 }
  0x62   :  { %v8190_v7 = vcombine.low %v1986_v13, %v1989_v48  ;;  %v1994_v1 = vrot.slane %v10139_v12, 4  ;;  %v10140_v2 = vmov %v10139_v12  ;;  %v618_v13 = vshrl.u32 %v8176_v59, 16 }
  0x63   :  { %v1993_v39 = vsel %vm8155_vm7, %v5646_v30, %v10140_v2  ;;  %v611_v23 = vrot.slane %v610_v11, 4  ;;  %v631_v37 = vshrl.u32 %v8188_v26, 16  ;;  %v606_v60 = vsel %vm7634_vm3, %v601_v28, %v605_v41  ;;  %v8226_v11 = vld [vmem:[%s9995_s0 + $0x114] sm:$0xf] }
  0x64   :  { %10138 = vst [vmem:[#allocation32_spill] sm:$0xff] %v8190_v7  ;;  %6592 = vmatprep.mubr.msk.bf16.mxu0 %vm1003_vm4, %v8190_v7  ;;  %v1996_v33 = vsel %vm8155_vm7, %v1994_v1, %v10141_v63  ;;  %v620_v46 = vrot.slane %v618_v13, 4  ;;  %v623_v30 = vrot.slane %v621_v8, 5  ;;  %v629_v12 = vrot.slane %v627_v17, 5 }
  0x65   :  { %v8221_v48 = vcombine.low %v1993_v39, %v1996_v33  ;;  %v616_v40 = vsel %vm7634_vm3, %v611_v23, %v615_v36  ;;  %v633_v1 = vrot.slane %v631_v37, 4  ;;  %v637_v2 = vshll.u32 %v8207_v58, 16  ;;  %v8238_v39 = vld [vmem:[%s9995_s0 + $0x118] sm:$0xf]  ;;  %v8244_v23 = vld [vmem:[%s9995_s0 + $0x11c] sm:$0x1] }
  0x66   :  { %v8231_v63 = vcombine.low %v606_v60, %v616_v40  ;;  %v624_v27 = vor.u32 %v623_v30, %v620_v46  ;;  %v5647_v41 = vrot.slane %v7659_v51, 9  ;;  %v1999_v28 = vrot.slane %v7676_v61, 5 }
  0x67   :  { %10142 = vst [vmem:[#allocation33_spill] sm:$0xff] %v8221_v48  ;;  %v634_v13 = vor.u32 %v633_v1, %v629_v12  ;;  %v639_v8 = vrot.slane %v637_v2, 5  ;;  %v2002_v36 = vrot.slane %v7681_v62, 5  ;;  %v642_v33 = vshrl.u32 %v8226_v11, 16 }
  0x68   :  { %10143 = vst [vmem:[#allocation34_spill] sm:$0xff] %v8231_v63  ;;  %6299 = vmatmul.mubr.msk.bf16.gmra.mrb[36].mxu1 %vm1003_vm4, %v8231_v63  ;;  %v625_v51 = vrot.slane %v624_v27, 4  ;;  %v2000_v61 = vsel %vm8155_vm7, %v5647_v41, %v1999_v28  ;;  %v2001_v17 = vrot.slane %v1999_v28, 4  ;;  %v645_v37 = vshll.u32 %v8226_v11, 16  ;;  %v8264_v41 = vld [vmem:[%s9995_s0 + $0x120] sm:$0xf] }
  0x69   :  { %v635_v60 = vrot.slane %v634_v13, 4  ;;  %v644_v46 = vrot.slane %v642_v33, 4  ;;  %v651_v62 = vshll.u32 %v8238_v39, 16  ;;  %v655_v30 = vshrl.u32 %v8238_v39, 16  ;;  %6593 = vmatmul.mubr.msk.bf16.vlgmr.msra.gmra.mrb[0].mxu0 %vm1003_vm4, %v8221_v48 }
  0x6a   :  { %v630_v40 = vsel %vm7634_vm3, %v625_v51, %v629_v12  ;;  %v2003_v27 = vsel %vm8155_vm7, %v2001_v17, %v2002_v36  ;;  %v647_v1 = vrot.slane %v645_v37, 5  ;;  %v661_v2 = vshll.u32 %v8244_v23, 16  ;;  %6657 = vmatpush3.bf16.msra.mxu0 %v3947_v14  ;;  %v8273_v12 = vld [vmem:[%s9995_s0 + $0x124] sm:$0xf] }
  0x6b   :  { %v640_v28 = vsel %vm7634_vm3, %v635_v60, %v639_v8  ;;  %v8268_v13 = vcombine.low %v2000_v61, %v2003_v27  ;;  %v653_v33 = vrot.slane %v651_v62, 5  ;;  %v657_v63 = vrot.slane %v655_v30, 4 }
  0x6c   :  { %v8275_v36 = vcombine.low %v630_v40, %v640_v28  ;;  %v648_v51 = vor.u32 %v647_v1, %v644_v46  ;;  %v663_v17 = vrot.slane %v661_v2, 5  ;;  %v5648_v37 = vrot.slane %v7691_v4, 9  ;;  %v8288_v46 = vld [vmem:[%s9995_s0 + $0x128] sm:$0x1] }
  0x6d   :  { %10144 = vst [vmem:[#allocation35_spill] sm:$0xff] %v8268_v13  ;;  %6596 = vmatprep.mubr.msk.bf16.mxu0 %vm1003_vm4, %v8268_v13  ;;  %v658_v14 = vor.u32 %v657_v63, %v653_v33  ;;  %v2006_v8 = vrot.slane %v7701_v16, 5  ;;  %v2009_v61 = vrot.slane %v7710_v20, 5  ;;  %v666_v60 = vshrl.u32 %v8264_v41, 16 }
  0x6e   :  { %10145 = vst [vmem:[#allocation36_spill] sm:$0xff] %v8275_v36  ;;  %6302 = vmatprep.mubr.msk.bf16.mxu1 %vm1003_vm4, %v8275_v36  ;;  %v649_v62 = vrot.slane %v648_v51, 4  ;;  %v669_v4 = vshll.u32 %v8264_v41, 16  ;;  %v675_v30 = vshll.u32 %v8273_v12, 16  ;;  %v679_v63 = vshrl.u32 %v8273_v12, 16 }
  0x6f   :  { %v659_v16 = vrot.slane %v658_v14, 4  ;;  %v2007_v20 = vsel %vm8155_vm7, %v5648_v37, %v2006_v8  ;;  %v2008_v40 = vrot.slane %v2006_v8, 4  ;;  %v668_v27 = vrot.slane %v666_v60, 4  ;;  %v8300_v36 = vld [vmem:[%s9995_s0 + $0x12c] sm:$0xf] }
  0x70   :  { %v654_v1 = vsel %vm7634_vm3, %v649_v62, %v653_v33  ;;  %v671_v2 = vrot.slane %v669_v4, 5  ;;  %v677_v28 = vrot.slane %v675_v30, 5  ;;  %v681_v51 = vrot.slane %v679_v63, 4  ;;  %v8311_v33 = vld [vmem:[%s9995_s0 + $0x130] sm:$0xf] }
  0x71   :  { %v664_v13 = vsel %vm7634_vm3, %v659_v16, %v663_v17  ;;  %v2010_v14 = vsel %vm8155_vm7, %v2008_v40, %v2009_v61  ;;  %v685_v37 = vshll.u32 %v8288_v46, 16  ;;  %v5649_v8 = vrot.slane %v7718_v32, 9 }
  0x72   :  { %v8313_v60 = vcombine.low %v654_v1, %v664_v13  ;;  %v8315_v62 = vcombine.low %v2007_v20, %v2010_v14  ;;  %v672_v4 = vor.u32 %v671_v2, %v668_v27  ;;  %v682_v30 = vor.u32 %v681_v51, %v677_v28  ;;  %v8327_v20 = vld [vmem:[%s9995_s0 + $0x134] sm:$0x1] }
  0x73   :  { %v687_v63 = vrot.slane %v685_v37, 5  ;;  %v2013_v17 = vrot.slane %v7727_v38, 5  ;;  %v2016_v61 = vrot.slane %v7741_v52, 5  ;;  %v690_v16 = vshrl.u32 %v8300_v36, 16 }
  0x74   :  { %10146 = vst [vmem:[#allocation37_spill] sm:$0xff] %v8313_v60  ;;  %10147 = vst [vmem:[#allocation38_spill] sm:$0xff] %v8315_v62  ;;  %6303 = vmatmul.mubr.msk.bf16.gmra.mrb[40].mxu1 %vm1003_vm4, %v8313_v60  ;;  %6597 = vmatmul.mubr.msk.bf16.gmra.mrb[4].mxu0 %vm1003_vm4, %v8315_v62  ;;  %v673_v32 = vrot.slane %v672_v4, 4  ;;  %v683_v13 = vrot.slane %v682_v30, 4  ;;  %v693_v40 = vshll.u32 %v8300_v36, 16  ;;  %v699_v38 = vshll.u32 %v8311_v33, 16 }
  0x75   :  { %v2014_v52 = vsel %vm8155_vm7, %v5649_v8, %v2013_v17  ;;  %v2015_v27 = vrot.slane %v2013_v17, 4  ;;  %v692_v1 = vrot.slane %v690_v16, 4  ;;  %v703_v2 = vshrl.u32 %v8311_v33, 16  ;;  %v8341_v30 = vld [vmem:[%s9995_s0 + $0x138] sm:$0xf] }
  0x76   :  { %v678_v51 = vsel %vm7634_vm3, %v673_v32, %v677_v28  ;;  %v688_v14 = vsel %vm7634_vm3, %v683_v13, %v687_v63  ;;  %v695_v37 = vrot.slane %v693_v40, 5  ;;  %v701_v4 = vrot.slane %v699_v38, 5  ;;  %v8355_v13 = vld [vmem:[%s9995_s0 + $0x13c] sm:$0xf]  ;;  %v8360_v40 = vld [vmem:[%s9995_s0 + $0x140] sm:$0x1] }
  0x77   :  { %v8343_v60 = vcombine.low %v678_v51, %v688_v14  ;;  %v2017_v8 = vsel %vm8155_vm7, %v2015_v27, %v2016_v61  ;;  %v705_v17 = vrot.slane %v703_v2, 4  ;;  %v709_v16 = vshll.u32 %v8327_v20, 16 }
  0x78   :  { %v8348_v62 = vcombine.low %v2014_v52, %v2017_v8  ;;  %v696_v28 = vor.u32 %v695_v37, %v692_v1  ;;  %v5650_v63 = vrot.slane %v7751_v0, 9  ;;  %v2020_v32 = vrot.slane %v7758_v3, 5  ;;  %v8369_v3 = vld [vmem:[%s9996_s1 + $0xe] sm:$0x3] }
  0x79   :  { %10148 = vst [vmem:[#allocation39_spill] sm:$0xff] %v8343_v60  ;;  %6306 = vmatprep.mubr.msk.bf16.mxu1 %vm1003_vm4, %v8343_v60  ;;  %v706_v61 = vor.u32 %v705_v17, %v701_v4  ;;  %v711_v38 = vrot.slane %v709_v16, 5  ;;  %v2023_v52 = vrot.slane %v7772_v18, 5  ;;  %v714_v0 = vshrl.u32 %v8341_v30, 16  ;;  %10150 = vst [vmem:[#allocation41_spill] sm:$0xff] %v8369_v3  ;;  %7393 = vmatprep.subr.msk.bf16.mxu0 %vm1100_vm0, %v8369_v3 }
  0x7a   :  { %10149 = vst [vmem:[#allocation40_spill] sm:$0xff] %v8348_v62  ;;  %6600 = vmatprep.mubr.msk.bf16.mxu0 %vm1003_vm4, %v8348_v62  ;;  %v697_v27 = vrot.slane %v696_v28, 4  ;;  %v2021_v1 = vsel %vm8155_vm7, %v5650_v63, %v2020_v32  ;;  %v2022_v2 = vrot.slane %v2020_v32, 4  ;;  %v717_v51 = vshll.u32 %v8341_v30, 16  ;;  %v8388_v32 = vld [vmem:[%s9995_s0 + $0x144] sm:$0xf] }
  0x7b   :  { %v707_v18 = vrot.slane %v706_v61, 4  ;;  %v716_v14 = vrot.slane %v714_v0, 4  ;;  %v723_v37 = vshll.u32 %v8355_v13, 16  ;;  %v727_v8 = vshrl.u32 %v8355_v13, 16 }
  0x7c   :  { %v702_v17 = vsel %vm7634_vm3, %v697_v27, %v701_v4  ;;  %v2024_v16 = vsel %vm8155_vm7, %v2022_v2, %v2023_v52  ;;  %v719_v28 = vrot.slane %v717_v51, 5  ;;  %v733_v63 = vshll.u32 %v8360_v40, 16  ;;  %v8397_v4 = vld [vmem:[%s9995_s0 + $0x148] sm:$0xf] }
  0x7d   :  { %v712_v61 = vsel %vm7634_vm3, %v707_v18, %v711_v38  ;;  %v8392_v0 = vcombine.low %v2021_v1, %v2024_v16  ;;  %v725_v60 = vrot.slane %v723_v37, 5  ;;  %v729_v62 = vrot.slane %v727_v8, 4 }
  0x7e   :  { %v8399_v52 = vcombine.low %v702_v17, %v712_v61  ;;  %v720_v27 = vor.u32 %v719_v28, %v716_v14  ;;  %v735_v2 = vrot.slane %v733_v63, 5  ;;  %v5651_v51 = vrot.slane %v7782_v25, 9  ;;  %v8412_v14 = vld [vmem:[%s9995_s0 + $0x14c] sm:$0x1] }
  0x7f   :  { %10151 = vst [vmem:[#allocation42_spill] sm:$0xff] %v8392_v0  ;;  %6601 = vmatmul.mubr.msk.bf16.gmra.mrb[8].mxu0 %vm1003_vm4, %v8392_v0  ;;  %v730_v48 = vor.u32 %v729_v62, %v725_v60  ;;  %v2027_v38 = vrot.slane %v7789_v34, 5  ;;  %v2030_v1 = vrot.slane %v7802_v45, 5  ;;  %v738_v18 = vshrl.u32 %v8388_v32, 16 }
  0x80   :  { %10152 = vst [vmem:[#allocation43_spill] sm:$0xff] %v8399_v52  ;;  %6307 = vmatmul.mubr.msk.bf16.gmra.mrb[44].mxu1 %vm1003_vm4, %v8399_v52  ;;  %v721_v37 = vrot.slane %v720_v27, 4  ;;  %v741_v25 = vshll.u32 %v8388_v32, 16  ;;  %v747_v8 = vshll.u32 %v8397_v4, 16  ;;  %v751_v62 = vshrl.u32 %v8397_v4, 16 }
  0x81   :  { %v731_v34 = vrot.slane %v730_v48, 4  ;;  %v2028_v45 = vsel %vm8155_vm7, %v5651_v51, %v2027_v38  ;;  %v2029_v17 = vrot.slane %v2027_v38, 4  ;;  %v740_v16 = vrot.slane %v738_v18, 4  ;;  %v8424_v52 = vld [vmem:[%s9995_s0 + $0x150] sm:$0xf] }
  0x82   :  { %v726_v28 = vsel %vm7634_vm3, %v721_v37, %v725_v60  ;;  %v743_v63 = vrot.slane %v741_v25, 5  ;;  %v749_v61 = vrot.slane %v747_v8, 5  ;;  %v753_v27 = vrot.slane %v751_v62, 4  ;;  %v8435_v60 = vld [vmem:[%s9995_s0 + $0x154] sm:$0xf] }
  0x83   :  { %v736_v0 = vsel %vm7634_vm3, %v731_v34, %v735_v2  ;;  %v2031_v48 = vsel %vm8155_vm7, %v2029_v17, %v2030_v1  ;;  %v757_v51 = vshll.u32 %v8412_v14, 16  ;;  %v5652_v38 = vrot.slane %v7812_v54, 9 }
  0x84   :  { %v8437_v18 = vcombine.low %v726_v28, %v736_v0  ;;  %v8439_v37 = vcombine.low %v2028_v45, %v2031_v48  ;;  %v744_v25 = vor.u32 %v743_v63, %v740_v16  ;;  %v754_v8 = vor.u32 %v753_v27, %v749_v61  ;;  %v8451_v45 = vld [vmem:[%s9995_s0 + $0x158] sm:$0x1] }
  0x85   :  { %v759_v62 = vrot.slane %v757_v51, 5  ;;  %v2034_v2 = vrot.slane %v7819_v5, 5  ;;  %v2037_v1 = vrot.slane %v7832_v15, 5  ;;  %v762_v34 = vshrl.u32 %v8424_v52, 16 }
  0x86   :  { %10153 = vst [vmem:[#allocation44_spill] sm:$0xff] %v8437_v18  ;;  %10154 = vst [vmem:[#allocation45_spill] sm:$0xff] %v8439_v37  ;;  %6310 = vmatprep.mubr.msk.bf16.mxu1 %vm1003_vm4, %v8437_v18  ;;  %6604 = vmatprep.mubr.msk.bf16.mxu0 %vm1003_vm4, %v8439_v37  ;;  %v745_v54 = vrot.slane %v744_v25, 4  ;;  %v755_v0 = vrot.slane %v754_v8, 4  ;;  %v765_v17 = vshll.u32 %v8424_v52, 16  ;;  %v771_v5 = vshll.u32 %v8435_v60, 16 }
  0x87   :  { %v2035_v15 = vsel %vm8155_vm7, %v5652_v38, %v2034_v2  ;;  %v2036_v16 = vrot.slane %v2034_v2, 4  ;;  %v764_v28 = vrot.slane %v762_v34, 4  ;;  %v775_v63 = vshrl.u32 %v8435_v60, 16  ;;  %v8465_v8 = vld [vmem:[%s9995_s0 + $0x15c] sm:$0xf] }
  0x88   :  { %v750_v27 = vsel %vm7634_vm3, %v745_v54, %v749_v61  ;;  %v760_v48 = vsel %vm7634_vm3, %v755_v0, %v759_v62  ;;  %v767_v51 = vrot.slane %v765_v17, 5  ;;  %v773_v25 = vrot.slane %v771_v5, 5  ;;  %v8479_v0 = vld [vmem:[%s9995_s0 + $0x160] sm:$0xf] }
  0x89   :  { %v8467_v18 = vcombine.low %v750_v27, %v760_v48  ;;  %v2038_v38 = vsel %vm8155_vm7, %v2036_v16, %v2037_v1  ;;  %v777_v2 = vrot.slane %v775_v63, 4  ;;  %v781_v34 = vshll.u32 %v8451_v45, 16 }
  0x8a   :  { %v8472_v37 = vcombine.low %v2035_v15, %v2038_v38  ;;  %v768_v61 = vor.u32 %v767_v51, %v764_v28  ;;  %v5653_v62 = vrot.slane %v7841_v35, 9  ;;  %v2041_v54 = vrot.slane %v7849_v44, 5  ;;  %v8487_v15 = vld [vmem:[%s9995_s0 + $0x164] sm:$0x1] }
  0x8b   :  { %10155 = vst [vmem:[#allocation46_spill] sm:$0xff] %v8467_v18  ;;  %6311 = vmatmul.mubr.msk.bf16.gmra.mrb[48].mxu1 %vm1003_vm4, %v8467_v18  ;;  %v778_v17 = vor.u32 %v777_v2, %v773_v25  ;;  %v783_v1 = vrot.slane %v781_v34, 5  ;;  %v2044_v5 = vrot.slane %v7858_v50, 5  ;;  %10157 = vst [vmem:[#allocation48_spill] sm:$0xff] %v8487_v15  ;;  %v786_v35 = vshrl.u32 %v8465_v8, 16 }
  0x8c   :  { %10156 = vst [vmem:[#allocation47_spill] sm:$0xff] %v8472_v37  ;;  %6605 = vmatmul.mubr.msk.bf16.gmra.mrb[12].mxu0 %vm1003_vm4, %v8472_v37  ;;  %v769_v44 = vrot.slane %v768_v61, 4  ;;  %v2042_v16 = vsel %vm8155_vm7, %v5653_v62, %v2041_v54  ;;  %v2043_v28 = vrot.slane %v2041_v54, 4  ;;  %v789_v63 = vshll.u32 %v8465_v8, 16  ;;  %v8505_v62 = vld [vmem:[%s9995_s0 + $0x168] sm:$0xf] }
  0x8d   :  { %v779_v27 = vrot.slane %v778_v17, 4  ;;  %v788_v48 = vrot.slane %v786_v35, 4  ;;  %v795_v50 = vshll.u32 %v8479_v0, 16  ;;  %v799_v51 = vshrl.u32 %v8479_v0, 16  ;;  %10158 = vst [vmem:[#allocation49_spill] sm:$0xff] %v8505_v62 }
  0x8e   :  { %v774_v38 = vsel %vm7634_vm3, %v769_v44, %v773_v25  ;;  %v2045_v2 = vsel %vm8155_vm7, %v2043_v28, %v2044_v5  ;;  %v791_v34 = vrot.slane %v789_v63, 5  ;;  %v805_v61 = vshll.u32 %v8487_v15, 16  ;;  %v8514_v25 = vld [vmem:[%s9995_s0 + $0x16c] sm:$0xf] }
  0x8f   :  { %v784_v54 = vsel %vm7634_vm3, %v779_v27, %v783_v1  ;;  %v8509_v17 = vcombine.low %v2042_v16, %v2045_v2  ;;  %v797_v35 = vrot.slane %v795_v50, 5  ;;  %v801_v18 = vrot.slane %v799_v51, 4  ;;  %10160 = vst [vmem:[#allocation51_spill] sm:$0xff] %v8514_v25 }
  0x90   :  { %v8516_v5 = vcombine.low %v774_v38, %v784_v54  ;;  %v792_v44 = vor.u32 %v791_v34, %v788_v48  ;;  %v807_v28 = vrot.slane %v805_v61, 5  ;;  %v5654_v63 = vrot.slane %v7871_v10, 9  ;;  %v8529_v48 = vld [vmem:[%s9995_s0 + $0x170] sm:$0x1] }
  0x91   :  { %10159 = vst [vmem:[#allocation50_spill] sm:$0xff] %v8509_v17  ;;  %6608 = vmatprep.mubr.msk.bf16.mxu0 %vm1003_vm4, %v8509_v17  ;;  %v802_v37 = vor.u32 %v801_v18, %v797_v35  ;;  %v2048_v1 = vrot.slane %v7879_v56, 5  ;;  %v2051_v16 = vrot.slane %v7888_v22, 5  ;;  %v810_v27 = vshrl.u32 %v8505_v62, 16  ;;  %10162 = vst [vmem:[#allocation53_spill] sm:$0xff] %v8529_v48 }
  0x92   :  { %10161 = vst [vmem:[#allocation52_spill] sm:$0xff] %v8516_v5  ;;  %6314 = vmatprep.mubr.msk.bf16.mxu1 %vm1003_vm4, %v8516_v5  ;;  %v793_v50 = vrot.slane %v792_v44, 4  ;;  %v813_v10 = vshll.u32 %v8505_v62, 16  ;;  %v819_v51 = vshll.u32 %v8514_v25, 16  ;;  %v823_v18 = vshrl.u32 %v8514_v25, 16 }
  0x93   :  { %v803_v56 = vrot.slane %v802_v37, 4  ;;  %v2049_v22 = vsel %vm8155_vm7, %v5654_v63, %v2048_v1  ;;  %v2050_v38 = vrot.slane %v2048_v1, 4  ;;  %v812_v2 = vrot.slane %v810_v27, 4  ;;  %v8541_v5 = vld [vmem:[%s9995_s0 + $0x174] sm:$0xf] }
  0x94   :  { %v798_v34 = vsel %vm7634_vm3, %v793_v50, %v797_v35  ;;  %v815_v61 = vrot.slane %v813_v10, 5  ;;  %v821_v54 = vrot.slane %v819_v51, 5  ;;  %v825_v44 = vrot.slane %v823_v18, 4  ;;  %v8552_v35 = vld [vmem:[%s9995_s0 + $0x178] sm:$0xf] }
  0x95   :  { %v808_v17 = vsel %vm7634_vm3, %v803_v56, %v807_v28  ;;  %v2052_v37 = vsel %vm8155_vm7, %v2050_v38, %v2051_v16  ;;  %v829_v63 = vshll.u32 %v8529_v48, 16  ;;  %v5655_v1 = vrot.slane %v7903_v53, 9 }
  0x96   :  { %v8554_v27 = vcombine.low %v798_v34, %v808_v17  ;;  %v8556_v50 = vcombine.low %v2049_v22, %v2052_v37  ;;  %v816_v10 = vor.u32 %v815_v61, %v812_v2  ;;  %v826_v51 = vor.u32 %v825_v44, %v821_v54  ;;  %v8568_v22 = vld [vmem:[%s9995_s0 + $0x17c] sm:$0x1] }
  0x97   :  { %v831_v18 = vrot.slane %v829_v63, 5  ;;  %v2055_v28 = vrot.slane %v7910_v57, 5  ;;  %v2058_v16 = vrot.slane %v7931_v47, 5  ;;  %v834_v56 = vshrl.u32 %v8541_v5, 16 }
  0x98   :  { %10163 = vst [vmem:[#allocation54_spill] sm:$0xff] %v8554_v27  ;;  %10164 = vst [vmem:[#allocation55_spill] sm:$0xff] %v8556_v50  ;;  %6315 = vmatmul.mubr.msk.bf16.gmra.mrb[52].mxu1 %vm1003_vm4, %v8554_v27  ;;  %6609 = vmatmul.mubr.msk.bf16.gmra.mrb[16].mxu0 %vm1003_vm4, %v8556_v50  ;;  %v817_v53 = vrot.slane %v816_v10, 4  ;;  %v827_v17 = vrot.slane %v826_v51, 4  ;;  %v837_v38 = vshll.u32 %v8541_v5, 16  ;;  %v843_v57 = vshll.u32 %v8552_v35, 16 }
  0x99   :  { %v2056_v47 = vsel %vm8155_vm7, %v5655_v1, %v2055_v28  ;;  %v2057_v2 = vrot.slane %v2055_v28, 4  ;;  %v836_v34 = vrot.slane %v834_v56, 4  ;;  %v847_v61 = vshrl.u32 %v8552_v35, 16  ;;  %v8582_v51 = vld [vmem:[%s9995_s0 + $0x180] sm:$0xf] }
  0x9a   :  { %v822_v44 = vsel %vm7634_vm3, %v817_v53, %v821_v54  ;;  %v832_v37 = vsel %vm7634_vm3, %v827_v17, %v831_v18  ;;  %v839_v63 = vrot.slane %v837_v38, 5  ;;  %v845_v10 = vrot.slane %v843_v57, 5  ;;  %v8594_v18 = vld [vmem:[%s9995_s0 + $0x90] sm:$0xf]  ;;  %v8600_v17 = vld [vmem:[%s9995_s0 + $0x94] sm:$0xf] }
  0x9b   :  { %v8584_v27 = vcombine.low %v822_v44, %v832_v37  ;;  %v2059_v1 = vsel %vm8155_vm7, %v2057_v2, %v2058_v16  ;;  %v849_v28 = vrot.slane %v847_v61, 4  ;;  %v853_v56 = vshll.u32 %v8568_v22, 16  ;;  %10167 = vst [vmem:[#allocation58_spill] sm:$0xff] %v8594_v18  ;;  %10168 = vst [vmem:[#allocation59_spill] sm:$0xff] %v8600_v17  ;;  %v8606_v38 = vld [vmem:[%s9995_s0 + $0x184] sm:$0xf] }
  0x9c   :  { %v8589_v50 = vcombine.low %v2056_v47, %v2059_v1  ;;  %v840_v54 = vor.u32 %v839_v63, %v836_v34  ;;  %v5656_v53 = vrot.slane %v8594_v18, 9  ;;  %v2062_v16 = vrot.slane %v8600_v17, 5  ;;  %v8614_v34 = vld [vmem:[%s9995_s0 + $0x188] sm:$0x1] }
  0x9d   :  { %10165 = vst [vmem:[#allocation56_spill] sm:$0xff] %v8584_v27  ;;  %6318 = vmatprep.mubr.msk.bf16.mxu1 %vm1003_vm4, %v8584_v27  ;;  %v850_v57 = vor.u32 %v849_v28, %v845_v10  ;;  %v855_v47 = vrot.slane %v853_v56, 5  ;;  %v2065_v2 = vrot.slane %v7957_v24, 5  ;;  %v858_v61 = vshrl.u32 %v8582_v51, 16 }
  0x9e   :  { %10166 = vst [vmem:[#allocation57_spill] sm:$0xff] %v8589_v50  ;;  %6612 = vmatprep.mubr.msk.bf16.mxu0 %vm1003_vm4, %v8589_v50  ;;  %v841_v44 = vrot.slane %v840_v54, 4  ;;  %v2063_v37 = vsel %vm8155_vm7, %v5656_v53, %v2062_v16  ;;  %v2064_v63 = vrot.slane %v2062_v16, 4  ;;  %v861_v1 = vshll.u32 %v8582_v51, 16  ;;  %v8632_v53 = vld [vmem:[%s9995_s0 + $0x18c] sm:$0xf] }
  0x9f   :  { %v851_v28 = vrot.slane %v850_v57, 4  ;;  %v860_v56 = vrot.slane %v858_v61, 4  ;;  %v867_v24 = vshll.u32 %v8606_v38, 16  ;;  %v871_v27 = vshrl.u32 %v8606_v38, 16 }
  0xa0   :  { %v846_v7 = vsel %vm7634_vm3, %v841_v44, %v845_v10  ;;  %v2066_v3 = vsel %vm8155_vm7, %v2064_v63, %v2065_v2  ;;  %v863_v50 = vrot.slane %v861_v1, 5  ;;  %v877_v54 = vshll.u32 %v8614_v34, 16  ;;  %v8641_v10 = vld [vmem:[%s9995_s0 + $0x190] sm:$0xf]  ;;  %v8648_v1 = vld [vmem:[%s9995_s0 + $0x9c] sm:$0xf] }
  0xa1   :  { %v856_v16 = vsel %vm7634_vm3, %v851_v28, %v855_v47  ;;  %v8636_v57 = vcombine.low %v2063_v37, %v2066_v3  ;;  %v869_v61 = vrot.slane %v867_v24, 5  ;;  %v873_v48 = vrot.slane %v871_v27, 4  ;;  %10171 = vst [vmem:[#allocation62_spill] sm:$0xff] %v8648_v1  ;;  %v8656_v27 = vld [vmem:[%s9995_s0 + $0xa0] sm:$0xf] }
  0xa2   :  { %v8643_v2 = vcombine.low %v846_v7, %v856_v16  ;;  %v864_v44 = vor.u32 %v863_v50, %v860_v56  ;;  %v879_v63 = vrot.slane %v877_v54, 5  ;;  %v5657_v47 = vrot.slane %v8648_v1, 9  ;;  %10172 = vst [vmem:[#allocation63_spill] sm:$0xff] %v8656_v27  ;;  %v7444_v50 = vld [vmem:[%s9995_s0 + $0xa4] sm:$0x1] }
  0xa3   :  { %10169 = vst [vmem:[#allocation60_spill] sm:$0xff] %v8636_v57  ;;  %6613 = vmatmul.mubr.msk.bf16.gmra.mrb[20].mxu0 %vm1003_vm4, %v8636_v57  ;;  %v874_v3 = vor.u32 %v873_v48, %v869_v61  ;;  %v2069_v7 = vrot.slane %v8656_v27, 5  ;;  %v2072_v37 = vrot.slane %v7444_v50, 5  ;;  %v882_v28 = vshrl.u32 %v8632_v53, 16  ;;  %v8668_v48 = vld [vmem:[%s9995_s0 + $0x194] sm:$0x1] }
  0xa4   :  { %10170 = vst [vmem:[#allocation61_spill] sm:$0xff] %v8643_v2  ;;  %6319 = vmatmul.mubr.msk.bf16.gmra.mrb[56].mxu1 %vm1003_vm4, %v8643_v2  ;;  %v865_v56 = vrot.slane %v864_v44, 4  ;;  %v885_v24 = vshll.u32 %v8632_v53, 16  ;;  %v891_v54 = vshll.u32 %v8641_v10, 16  ;;  %v895_v16 = vshrl.u32 %v8641_v10, 16 }
  0xa5   :  { %v875_v57 = vrot.slane %v874_v3, 4  ;;  %v2070_v50 = vsel %vm8155_vm7, %v5657_v47, %v2069_v7  ;;  %v2071_v1 = vrot.slane %v2069_v7, 4  ;;  %v884_v27 = vrot.slane %v882_v28, 4  ;;  %v8685_v47 = vld [vmem:[%s9995_s0 + $0xa8] sm:$0xf] }
  0xa6   :  { %v870_v44 = vsel %vm7634_vm3, %v865_v56, %v869_v61  ;;  %v887_v2 = vrot.slane %v885_v24, 5  ;;  %v893_v62 = vrot.slane %v891_v54, 5  ;;  %v897_v18 = vrot.slane %v895_v16, 4  ;;  %v8726_v16 = vld [vmem:[%s9995_s0 + $0xb8] sm:$0xf] }
  0xa7   :  { %v880_v17 = vsel %vm7634_vm3, %v875_v57, %v879_v63  ;;  %v2073_v25 = vsel %vm8155_vm7, %v2071_v1, %v2072_v37  ;;  %v901_v15 = vshll.u32 %v8668_v48, 16  ;;  %v5658_v3 = vrot.slane %v8685_v47, 9  ;;  %v8695_v57 = vld [vmem:[%s9995_s0 + $0xac] sm:$0xf]  ;;  %v7447_v1 = vld [vmem:[%s9995_s0 + $0xb0] sm:$0x1] }
  0xa8   :  { %v8688_v7 = vcombine.low %v870_v44, %v880_v17  ;;  %v8690_v61 = vcombine.low %v2070_v50, %v2073_v25  ;;  %v888_v28 = vor.u32 %v887_v2, %v884_v27  ;;  %v898_v56 = vor.u32 %v897_v18, %v893_v62  ;;  %v8704_v25 = vld [vmem:[%s9995_s0] sm:$0xf]  ;;  %v8720_v27 = vld [vmem:[%s9995_s0 + $0xb4] sm:$0xf] }
  0xa9   :  { %v903_v24 = vrot.slane %v901_v15, 5  ;;  %v2076_v63 = vrot.slane %v8695_v57, 5  ;;  %v2079_v37 = vrot.slane %v7447_v1, 5  ;;  %10175 = vst [vmem:[#allocation66_spill] sm:$0xff] %v8704_v25  ;;  %v8709_v15 = vld [vmem:[%s9995_s0 + $0x4] sm:$0xf] }
  0xaa   :  { %10173 = vst [vmem:[#allocation64_spill] sm:$0xff] %v8688_v7  ;;  %10174 = vst [vmem:[#allocation65_spill] sm:$0xff] %v8690_v61  ;;  %v5580_v18 = vcombine.low %v8704_v25, %v8709_v15  ;;  %6322 = vmatprep.mubr.msk.bf16.mxu1 %vm1003_vm4, %v8688_v7  ;;  %6616 = vmatprep.mubr.msk.bf16.mxu0 %vm1003_vm4, %v8690_v61  ;;  %v889_v17 = vrot.slane %v888_v28, 4  ;;  %v899_v2 = vrot.slane %v898_v56, 4  ;;  %v5659_v54 = vrot.slane %v8720_v27, 9 }
  0xab   :  { %10176 = vst [vmem:[#allocation67_spill] sm:$0xff] %v8709_v15  ;;  %10177 = vst [vmem:[#allocation68_spill] sm:$0xff] %v8720_v27  ;;  %v2083_v50 = vrot.slane %v8726_v16, 5  ;;  %v2077_v44 = vsel %vm8155_vm7, %v5658_v3, %v2076_v63  ;;  %v2078_v1 = vrot.slane %v2076_v63, 4  ;;  %v2086_v28 = vrot.slane %v8011_v31, 5 }
  0xac   :  { %v5811_v56 = vrot.slane %v8022_v19, 9  ;;  %v894_v7 = vsel %vm7634_vm3, %v889_v17, %v893_v62  ;;  %v904_v61 = vsel %vm7634_vm3, %v899_v2, %v903_v24  ;;  %v3546_v63 = vrot.slane %v8029_v21, 5  ;;  %v10179_v17 = vld [vmem:[#allocation23_spill] sm:$0xff]  ;;  %v10181_v21 = vld [vmem:[#allocation26_spill] sm:$0xff] }
  0xad   :  { %v2084_v25 = vsel %vm8155_vm7, %v5659_v54, %v2083_v50  ;;  %v2085_v15 = vrot.slane %v2083_v50, 4  ;;  %v8739_v27 = vcombine.low %v894_v7, %v904_v61  ;;  %v2080_v3 = vsel %vm8155_vm7, %v2078_v1, %v2079_v37  ;;  %v10180_v61 = vld [vmem:[#allocation24_spill] sm:$0xff]  ;;  %v7453_v1 = vld [vmem:[%s9995_s0 + $0x10] sm:$0xf] }
  0xae   :  { %v3549_v31 = vrot.slane %v8041_v43, 5  ;;  %v8745_v19 = vcombine.low %v2077_v44, %v2080_v3  ;;  %v5661_v24 = vrot.slane %v10179_v17, 9  ;;  %v3548_v7 = vrot.slane %v3546_v63, 4 }
  0xaf   :  { %10178 = vst [vmem:[#allocation69_spill] sm:$0xff] %v8739_v27  ;;  %v2087_v62 = vsel %vm8155_vm7, %v2085_v15, %v2086_v28  ;;  %6323 = vmatmul.mubr.msk.bf16.gmra.mrb[60].mxu1 %vm1003_vm4, %v8739_v27  ;;  %v2097_v54 = vrot.slane %v10180_v61, 5  ;;  %v2100_v43 = vrot.slane %v10181_v21, 5  ;;  %v3547_v37 = vsel %vm8155_vm7, %v5811_v56, %v3546_v63 }
  0xb0   :  { %v8752_v2 = vcombine.low %v2084_v25, %v2087_v62  ;;  %6617 = vmatmul.mubr.msk.bf16.gmra.mrb[24].mxu0 %vm1003_vm4, %v8745_v19  ;;  %6328 = vmatprep.mubr.msk.bf16.mxu1 %vm1003_vm4, %v5580_v18  ;;  %v3550_v25 = vsel %vm8155_vm7, %v3548_v7, %v3549_v31  ;;  %v2104_v50 = vrot.slane %v8115_v6, 5  ;;  %v7452_v18 = vld [vmem:[%s9995_s0 + $0xc] sm:$0xf]  ;;  %v2111_v3 = vrot.slane %v8142_v55, 5  ;;  %v7454_v6 = vld [vmem:[%s9995_s0 + $0x18] sm:$0xf] }
  0xb1   :  { %v2099_v15 = vrot.slane %v2097_v54, 4  ;;  %v2098_v44 = vsel %vm8155_vm7, %v5661_v24, %v2097_v54  ;;  %v8774_v28 = vcombine.low %v7452_v18, %v7453_v1  ;;  %v8779_v63 = vcombine.low %v3547_v37, %v3550_v25  ;;  %v7455_v31 = vld [vmem:[%s9995_s0 + $0x1c] sm:$0xf]  ;;  %v10183_v24 = vld [vmem:[#allocation28_spill] sm:$0xff]  ;;  %v10184_v55 = vld [vmem:[#allocation30_spill] sm:$0xff] }
  0xb2   :  { %6620 = vmatprep.mubr.msk.bf16.mxu0 %vm1003_vm4, %v8752_v2  ;;  %v8787_v62 = vcombine.low %v7454_v6, %v7455_v31  ;;  %v5662_v7 = vrot.slane %v10183_v24, 9  ;;  %v2106_v61 = vrot.slane %v2104_v50, 4  ;;  %v2107_v54 = vrot.slane %v8127_v49, 5  ;;  %v10185_v25 = vld [vmem:[#allocation27_spill] sm:$0xff]  ;;  %v7456_v6 = vld [vmem:[%s9995_s0 + $0x24] sm:$0xf] }
  0xb3   :  { %v2101_v56 = vsel %vm8155_vm7, %v2099_v15, %v2100_v43  ;;  %10182 = vst [vmem:[#allocation23_spill] sm:$0xff] %v8779_v63  ;;  %v5663_v21 = vrot.slane %v10184_v55, 9  ;;  %v2113_v43 = vrot.slane %v2111_v3, 4  ;;  %v2114_v37 = vrot.slane %v8153_v9, 5 }
  0xb4   :  { %v8789_v17 = vcombine.low %v2098_v44, %v2101_v56  ;;  %v2395_v15 = vsel %vm1100_vm0, %v10185_v25, 0  ;;  %v2105_v49 = vsel %vm8155_vm7, %v5662_v7, %v2104_v50  ;;  %v2108_v9 = vsel %vm8155_vm7, %v2106_v61, %v2107_v54  ;;  %v7457_v50 = vld [vmem:[%s9995_s0 + $0x28] sm:$0xf] }
  0xb5   :  { %v2118_v44 = vrot.slane %v8188_v26, 5  ;;  %v2112_v18 = vsel %vm8155_vm7, %v5663_v21, %v2111_v3  ;;  %v2115_v1 = vsel %vm8155_vm7, %v2113_v43, %v2114_v37  ;;  %v2125_v56 = vrot.slane %v8238_v39, 5  ;;  %v7458_v26 = vld [vmem:[%s9995_s0 + $0x30] sm:$0xf]  ;;  %v7459_v39 = vld [vmem:[%s9995_s0 + $0x34] sm:$0xf] }
  0xb6   :  { %v8821_v31 = vcombine.low %v7456_v6, %v7457_v50  ;;  %v8823_v24 = vcombine.low %v2105_v49, %v2108_v9  ;;  %v8831_v3 = vcombine.low %v7458_v26, %v7459_v39  ;;  %v8833_v7 = vcombine.low %v2112_v18, %v2115_v1  ;;  %v7460_v49 = vld [vmem:[%s9995_s0 + $0x3c] sm:$0xf]  ;;  %v7461_v9 = vld [vmem:[%s9995_s0 + $0x40] sm:$0xf]  ;;  %v7463_v50 = vld [vmem:[%s9995_s0 + $0x4c] sm:$0xf] }
  0xb7   :  { %6329 = vmatmul.mubr.msk.bf16.vlgmr.msra.gmra.mrb[0].mxu1 %vm1003_vm4, %v8774_v28  ;;  %v5664_v61 = vrot.slane %v8176_v59, 9  ;;  %v2120_v54 = vrot.slane %v2118_v44, 4  ;;  %v2121_v55 = vrot.slane %v8207_v58, 5  ;;  %v5665_v21 = vrot.slane %v8226_v11, 9  ;;  %v8849_v59 = vld [vmem:[%s9996_s1 + $0x6] sm:$0x3] }
  0xb8   :  { %6621 = vmatmul.mubr.msk.bf16.gmra.mrb[28].mxu0 %vm1003_vm4, %v8779_v63  ;;  %6332 = vmatprep.mubr.msk.bf16.mxu1 %vm1003_vm4, %v8787_v62  ;;  %v2127_v43 = vrot.slane %v2125_v56, 4  ;;  %v2128_v37 = vrot.slane %v8244_v23, 5  ;;  %v2132_v25 = vrot.slane %v8273_v12, 5  ;;  %v2139_v23 = vrot.slane %v8311_v33, 5 }
  0xb9   :  { %6624 = vmatprep.mubr.msk.bf16.mxu0 %vm1003_vm4, %v8789_v17  ;;  %6393 = vmatpush3.bf16.msra.mxu1 %v2395_v15  ;;  %v2119_v58 = vsel %vm8155_vm7, %v5664_v61, %v2118_v44  ;;  %v2122_v11 = vsel %vm8155_vm7, %v2120_v54, %v2121_v55  ;;  %v2126_v12 = vsel %vm8155_vm7, %v5665_v21, %v2125_v56  ;;  %v5666_v18 = vrot.slane %v8264_v41, 9  ;;  %v7462_v56 = vld [vmem:[%s9995_s0 + $0x48] sm:$0xf]  ;;  %v7464_v21 = vld [vmem:[%s9995_s0 + $0x54] sm:$0xf] }
  0xba   :  { %7388 = vmatprep.subr.msk.bf16.mxu1 %vm1100_vm0, %v8849_v59  ;;  %v2129_v15 = vsel %vm8155_vm7, %v2127_v43, %v2128_v37  ;;  %v8870_v44 = vcombine.low %v7460_v49, %v7461_v9  ;;  %v5667_v1 = vrot.slane %v8300_v36, 9  ;;  %v8874_v6 = vcombine.low %v2119_v58, %v2122_v11  ;;  %v7465_v43 = vld [vmem:[%s9995_s0 + $0x58] sm:$0xf]  ;;  %v7466_v58 = vld [vmem:[%s9995_s0 + $0x60] sm:$0xf] }
  0xbb   :  { %v8882_v26 = vcombine.low %v7462_v56, %v7463_v50  ;;  %v2134_v39 = vrot.slane %v2132_v25, 4  ;;  %v2135_v61 = vrot.slane %v8288_v46, 5  ;;  %v8885_v54 = vcombine.low %v2126_v12, %v2129_v15  ;;  %v7467_v46 = vld [vmem:[%s9995_s0 + $0x64] sm:$0xf] }
  0xbc   :  { %v2141_v41 = vrot.slane %v2139_v23, 4  ;;  %v2142_v55 = vrot.slane %v8327_v20, 5  ;;  %v8894_v37 = vcombine.low %v7464_v21, %v7465_v43  ;;  %v8902_v11 = vcombine.low %v7466_v58, %v7467_v46 }
  0xbd   :  { %v2133_v20 = vsel %vm8155_vm7, %v5666_v18, %v2132_v25  ;;  %v2140_v12 = vsel %vm8155_vm7, %v5667_v1, %v2139_v23  ;;  %v5673_v15 = vrot.slane %v8541_v5, 9  ;;  %v2181_v49 = vrot.slane %v8552_v35, 5 }
  0xbe   :  { %v2136_v9 = vsel %vm8155_vm7, %v2134_v39, %v2135_v61  ;;  %v5668_v56 = vrot.slane %v8341_v30, 9  ;;  %v2146_v25 = vrot.slane %v8355_v13, 5  ;;  %v2184_v18 = vrot.slane %v8568_v22, 5 }
  0xbf   :  { %6333 = vmatmul.mubr.msk.bf16.gmra.mrb[4].mxu1 %vm1003_vm4, %v8821_v31  ;;  %v2143_v23 = vsel %vm8155_vm7, %v2141_v41, %v2142_v55  ;;  %v2182_v1 = vsel %vm8155_vm7, %v5673_v15, %v2181_v49  ;;  %v2183_v50 = vrot.slane %v2181_v49, 4  ;;  %v5674_v21 = vrot.slane %v8582_v51, 9 }
  0xc0   :  { %6625 = vmatmul.mubr.msk.bf16.gmra.mrb[32].mxu0 %vm1003_vm4, %v8823_v24  ;;  %6336 = vmatprep.mubr.msk.bf16.mxu1 %vm1003_vm4, %v8831_v3  ;;  %v2153_v39 = vrot.slane %v8397_v4, 5  ;;  %v2188_v61 = vrot.slane %v8606_v38, 5  ;;  %v2191_v43 = vrot.slane %v8614_v34, 5  ;;  %v5675_v22 = vrot.slane %v8632_v53, 9 }
  0xc1   :  { %6628 = vmatprep.mubr.msk.bf16.mxu0 %vm1003_vm4, %v8833_v7  ;;  %v8932_v58 = vcombine.low %v2133_v20, %v2136_v9  ;;  %v2185_v46 = vsel %vm8155_vm7, %v2183_v50, %v2184_v18  ;;  %v2195_v41 = vrot.slane %v8641_v10, 5  ;;  %v2198_v55 = vrot.slane %v8668_v48, 5 }
  0xc2   :  { %v2149_v15 = vrot.slane %v8360_v40, 5  ;;  %v8939_v49 = vcombine.low %v2182_v1, %v2185_v46  ;;  %v2189_v63 = vsel %vm8155_vm7, %v5674_v21, %v2188_v61  ;;  %v2190_v27 = vrot.slane %v2188_v61, 4 }
  0xc3   :  { %v8943_v34 = vcombine.low %v2140_v12, %v2143_v23  ;;  %v2148_v29 = vrot.slane %v2146_v25, 4  ;;  %v2196_v20 = vsel %vm8155_vm7, %v5675_v22, %v2195_v41  ;;  %v2197_v9 = vrot.slane %v2195_v41, 4  ;;  %v7468_v22 = vld [vmem:[%s9995_s0 + $0x6c] sm:$0xf] }
  0xc4   :  { %10186 = vst [vmem:[#allocation24_spill] sm:$0xff] %v8939_v49  ;;  %v5669_v18 = vrot.slane %v8388_v32, 9  ;;  %v2155_v50 = vrot.slane %v2153_v39, 4  ;;  %v2156_v48 = vrot.slane %v8412_v14, 5  ;;  %v2192_v40 = vsel %vm8155_vm7, %v2190_v27, %v2191_v43 }
  0xc5   :  { %10187 = vst [vmem:[#allocation26_spill] sm:$0xff] %v8943_v34  ;;  %v8953_v1 = vcombine.low %v2189_v63, %v2192_v40  ;;  %v2199_v12 = vsel %vm8155_vm7, %v2197_v9, %v2198_v55  ;;  %v2147_v14 = vsel %vm8155_vm7, %v5668_v56, %v2146_v25  ;;  %v2150_v27 = vsel %vm8155_vm7, %v2148_v29, %v2149_v15  ;;  %v7469_v56 = vld [vmem:[%s9995_s0 + $0x70] sm:$0xf]  ;;  %v7470_v55 = vld [vmem:[%s9995_s0 + $0x78] sm:$0xf]  ;;  %v10192_v9 = vld [vmem:[#allocation48_spill] sm:$0xff] }
  0xc6   :  { %v8961_v23 = vcombine.low %v2196_v20, %v2199_v12  ;;  %v2160_v63 = vrot.slane %v8435_v60, 5  ;;  %v2154_v21 = vsel %vm8155_vm7, %v5669_v18, %v2153_v39  ;;  %v2157_v61 = vsel %vm8155_vm7, %v2155_v50, %v2156_v48  ;;  %v7471_v15 = vld [vmem:[%s9995_s0 + $0x7c] sm:$0xf] }
  0xc7   :  { %6337 = vmatmul.mubr.msk.bf16.gmra.mrb[8].mxu1 %vm1003_vm4, %v8870_v44  ;;  %10188 = vst [vmem:[#allocation28_spill] sm:$0xff] %v8953_v1  ;;  %v2167_v43 = vrot.slane %v8479_v0, 5  ;;  %v8981_v25 = vcombine.low %v7468_v22, %v7469_v56  ;;  %v8985_v29 = vcombine.low %v8541_v5, %v8552_v35  ;;  %v8989_v39 = vcombine.low %v8582_v51, %v8606_v38  ;;  %v10193_v48 = vld [vmem:[#allocation51_spill] sm:$0xff]  ;;  %v10196_v56 = vld [vmem:[#allocation58_spill] sm:$0xff] }
  0xc8   :  { %6629 = vmatmul.mubr.msk.bf16.gmra.mrb[36].mxu0 %vm1003_vm4, %v8874_v6  ;;  %6340 = vmatprep.mubr.msk.bf16.mxu1 %vm1003_vm4, %v8882_v26  ;;  %10189 = vst [vmem:[#allocation30_spill] sm:$0xff] %v8961_v23  ;;  %v8993_v46 = vcombine.low %v8632_v53, %v8641_v10  ;;  %v8995_v41 = vcombine.low %v2147_v14, %v2150_v27  ;;  %v5670_v51 = vrot.slane %v8424_v52, 9  ;;  %v2162_v38 = vrot.slane %v2160_v63, 4  ;;  %v7472_v27 = vld [vmem:[%s9995_s0 + $0x84] sm:$0xf]  ;;  %v10195_v22 = vld [vmem:[#allocation59_spill] sm:$0xff] }
  0xc9   :  { %6632 = vmatprep.mubr.msk.bf16.mxu0 %vm1003_vm4, %v8885_v54  ;;  %v9003_v5 = vcombine.low %v7470_v55, %v7471_v15  ;;  %v9005_v35 = vcombine.low %v2154_v21, %v2157_v61  ;;  %v2163_v53 = vrot.slane %v8451_v45, 5  ;;  %v5671_v10 = vrot.slane %v8465_v8, 9  ;;  %v7473_v21 = vld [vmem:[%s9995_s0 + $0x88] sm:$0xf]  ;;  %v10198_v15 = vld [vmem:[#allocation49_spill] sm:$0xff] }
  0xca   :  { %10190 = vst [vmem:[#allocation27_spill] sm:$0xff] %v8995_v41  ;;  %v2169_v20 = vrot.slane %v2167_v43, 4  ;;  %v2170_v18 = vrot.slane %v10192_v9, 5  ;;  %v2161_v45 = vsel %vm8155_vm7, %v5670_v51, %v2160_v63  ;;  %v2174_v40 = vrot.slane %v10193_v48, 5 }
  0xcb   :  { %10191 = vst [vmem:[#allocation70_spill] sm:$0xff] %v9005_v35  ;;  %v2164_v50 = vsel %vm8155_vm7, %v2162_v38, %v2163_v53  ;;  %v2168_v12 = vsel %vm8155_vm7, %v5671_v10, %v2167_v43  ;;  %v9034_v63 = vcombine.low %v7472_v27, %v7473_v21  ;;  %v9040_v55 = vcombine.low %v10196_v56, %v10195_v22  ;;  %v10199_v53 = vld [vmem:[#allocation53_spill] sm:$0xff]  ;;  %v9071_v27 = vld [vmem:[%s9995_s0 + $0x19c] sm:$0xf]  ;;  %v10204_v21 = vld [vmem:[#allocation68_spill] sm:$0xff] }
  0xcc   :  { %v2171_v14 = vsel %vm8155_vm7, %v2169_v20, %v2170_v18  ;;  %v9036_v61 = vcombine.low %v2161_v45, %v2164_v50  ;;  %v5672_v51 = vrot.slane %v10198_v15, 9  ;;  %v2176_v38 = vrot.slane %v2174_v40, 4  ;;  %v10200_v18 = vld [vmem:[#allocation63_spill] sm:$0xff]  ;;  %v10201_v45 = vld [vmem:[#allocation62_spill] sm:$0xff] }
  0xcd   :  { %v9042_v43 = vcombine.low %v2168_v12, %v2171_v14  ;;  %v2177_v10 = vrot.slane %v10199_v53, 5  ;;  %v9060_v50 = vcombine.low %v10201_v45, %v10200_v18  ;;  %v9066_v14 = vcombine.low %v8685_v47, %v8695_v57  ;;  %v9085_v57 = vld [vmem:[%s9995_s0 + $0x198] sm:$0xf]  ;;  %v7476_v18 = vld [vmem:[%s9995_s0 + $0xe4] sm:$0xf] }
  0xce   :  { %10194 = vst [vmem:[#allocation48_spill] sm:$0xff] %v9036_v61  ;;  %v2175_v20 = vsel %vm8155_vm7, %v5672_v51, %v2174_v40  ;;  %v3553_v47 = vrot.slane %v9071_v27, 5  ;;  %v9090_v40 = vld [vmem:[%s9995_s0 + $0x1a0] sm:$0x1]  ;;  %v9094_v22 = vcombine.low %v10204_v21, %v8726_v16  ;;  %v9099_v56 = vld [vmem:[%s9995_s0 + $0xd8] sm:$0xf] }
  0xcf   :  { %6341 = vmatmul.mubr.msk.bf16.gmra.mrb[12].mxu1 %vm1003_vm4, %v8894_v37  ;;  %10197 = vst [vmem:[#allocation51_spill] sm:$0xff] %v9042_v43  ;;  %v2178_v9 = vsel %vm8155_vm7, %v2176_v38, %v2177_v10  ;;  %10203 = vst [vmem:[#allocation58_spill] sm:$0xff] %v9090_v40  ;;  %v9104_v51 = vld [vmem:[%s9995_s0 + $0xdc] sm:$0xf]  ;;  %v5812_v53 = vrot.slane %v9085_v57, 9  ;;  %vm5241_vm8 = vcmask 261120  }
  0xd0   :  { %6633 = vmatmul.mubr.msk.bf16.gmra.mrb[40].mxu0 %vm1003_vm4, %v8932_v58  ;;  %6344 = vmatprep.mubr.msk.bf16.mxu1 %vm1003_vm4, %v8902_v11  ;;  %v9062_v12 = vcombine.low %v2175_v20, %v2178_v9  ;;  %v5596_v38 = vcombine.low %v9099_v56, %v9104_v51  ;;  %v3555_v10 = vrot.slane %v3553_v47, 4  ;;  %v3556_v20 = vrot.slane %v9090_v40, 5  ;;  %v7477_v45 = vld [vmem:[%s9995_s0 + $0xe8] sm:$0xf]  ;;  %v7478_v40 = vld [vmem:[%s9995_s0 + $0xf0] sm:$0xf] }
  0xd1   :  { %6636 = vmatprep.mubr.msk.bf16.mxu0 %vm1003_vm4, %v8943_v34  ;;  %v3554_v16 = vsel %vm8155_vm7, %v5812_v53, %v3553_v47  ;;  %v9127_v21 = vcombine.low %v7476_v18, %v7477_v45  ;;  %v7479_v47 = vld [vmem:[%s9995_s0 + $0xf4] sm:$0xf]  ;;  %v10206_v45 = vld [vmem:[#allocation41_spill] sm:$0xff]  ;;  %vm7542_vm9 = vmmov 0   ;;  %vm5386_vm10 = vcmask 1041409  }
  0xd2   :  { %10202 = vst [vmem:[#allocation59_spill] sm:$0xff] %v9062_v12  ;;  %v3557_v9 = vsel %vm8155_vm7, %v3555_v10, %v3556_v20  ;;  %v9137_v53 = vcombine.low %v7478_v40, %v7479_v47  ;;  %v7480_v10 = vld [vmem:[%s9995_s0 + $0xfc] sm:$0xf]  ;;  %v7481_v40 = vld [vmem:[%s9995_s0 + $0x100] sm:$0xf]  ;;  %v4365_v47 = vsel %vm1100_vm0, %v10206_v45, 0 }
  0xd3   :  { %v9153_v20 = vcombine.low %v7480_v10, %v7481_v40  ;;  %v9170_v10 = vld [vmem:[%s9996_s1 + $0x10] sm:$0x3]  ;;  %v7484_v40 = vld [vmem:[%s9995_s0 + $0x114] sm:$0xf]  ;;  %v7486_v45 = vld [vmem:[%s9995_s0 + $0x120] sm:$0xf] }
  0xd4   :  { %vm5389_vm11 = vcmask 254976   ;;  %vm5474_vm12 = vcmask 74752  }
  0xd7   :  { %6345 = vmatmul.mubr.msk.bf16.gmra.mrb[16].mxu1 %vm1003_vm4, %v8981_v25 }
  0xd8   :  { %6637 = vmatmul.mubr.msk.bf16.gmra.mrb[44].mxu0 %vm1003_vm4, %v8995_v41  ;;  %6348 = vmatprep.mubr.msk.bf16.mxu1 %vm1003_vm4, %v9003_v5 }
  0xd9   :  { %6640 = vmatprep.mubr.msk.bf16.mxu0 %vm1003_vm4, %v9005_v35 }
  0xdf   :  { %6349 = vmatmul.mubr.msk.bf16.gmra.mrb[20].mxu1 %vm1003_vm4, %v9034_v63 }
  0xe0   :  { %6641 = vmatmul.mubr.msk.bf16.gmra.mrb[48].mxu0 %vm1003_vm4, %v9036_v61  ;;  %6352 = vmatprep.mubr.msk.bf16.mxu1 %vm1003_vm4, %v9040_v55 }
  0xe1   :  { %6644 = vmatprep.mubr.msk.bf16.mxu0 %vm1003_vm4, %v9042_v43 }
  0xe7   :  { %6353 = vmatmul.mubr.msk.bf16.gmra.mrb[24].mxu1 %vm1003_vm4, %v9060_v50 }
  0xe8   :  { %6645 = vmatmul.mubr.msk.bf16.gmra.mrb[52].mxu0 %vm1003_vm4, %v9062_v12  ;;  %6356 = vmatprep.mubr.msk.bf16.mxu1 %vm1003_vm4, %v9066_v14 }
  0xe9   :  { %6648 = vmatprep.mubr.msk.bf16.mxu0 %vm1003_vm4, %v8939_v49 }
  0xef   :  { %6357 = vmatmul.mubr.msk.bf16.gmra.mrb[28].mxu1 %vm1003_vm4, %v9094_v22 }
  0xf0   :  { %6649 = vmatmul.mubr.msk.bf16.gmra.mrb[56].mxu0 %vm1003_vm4, %v8953_v1  ;;  %6360 = vmatprep.mubr.msk.bf16.mxu1 %vm1003_vm4, %v5596_v38  ;;  %v9129_v38 = vcombine.low %v3554_v16, %v3557_v9  ;;  %v7482_v16 = vld [vmem:[%s9995_s0 + $0x108] sm:$0xf]  ;;  %v7483_v9 = vld [vmem:[%s9995_s0 + $0x10c] sm:$0xf] }
  0xf1   :  { %6652 = vmatprep.mubr.msk.bf16.mxu0 %vm1003_vm4, %v8961_v23  ;;  %v9161_v18 = vcombine.low %v7482_v16, %v7483_v9  ;;  %v7485_v16 = vld [vmem:[%s9995_s0 + $0x118] sm:$0xf] }
  0xf2   :  { %10205 = vst [vmem:[#allocation49_spill] sm:$0xff] %v9129_v38  ;;  %v9186_v9 = vcombine.low %v7484_v40, %v7485_v16  ;;  %v9206_v40 = vcombine.low %v8300_v36, %v8311_v33  ;;  %v9210_v16 = vcombine.low %v8341_v30, %v8355_v13  ;;  %v9222_v36 = vcombine.low %v8388_v32, %v8397_v4  ;;  %v10210_v32 = vld [vmem:[#allocation67_spill] sm:$0xff] }
  0xf3   :  { %v9226_v33 = vcombine.low %v8424_v52, %v8435_v60  ;;  %v9238_v30 = vcombine.low %v8465_v8, %v8479_v0  ;;  %v9242_v13 = vcombine.low %v10198_v15, %v10193_v48  ;;  %v1978_v4 = vrot.slane %v10210_v32, 5  ;;  %v7488_v52 = vld [vmem:[%s9995_s0 + $0x8] sm:$0x1]  ;;  %v10211_v8 = vld [vmem:[#allocation66_spill] sm:$0xff]  ;;  %v7489_v32 = vld [vmem:[%s9995_s0 + $0xc0] sm:$0xf] }
  0xf4   :  { %10207 = vst [vmem:[#allocation53_spill] sm:$0xff] %v9210_v16  ;;  %10208 = vst [vmem:[#allocation63_spill] sm:$0xff] %v9222_v36  ;;  %v1981_v60 = vrot.slane %v7488_v52, 5  ;;  %v5644_v0 = vrot.slane %v10211_v8, 9  ;;  %v7490_v52 = vld [vmem:[%s9995_s0 + $0xc4] sm:$0xf] }
  0xf5   :  { %10209 = vst [vmem:[#allocation62_spill] sm:$0xff] %v9226_v33  ;;  %v1980_v48 = vrot.slane %v1978_v4, 4  ;;  %v9275_v8 = vcombine.low %v7489_v32, %v7490_v52  ;;  %v10214_v32 = vld [vmem:[#allocation35_spill] sm:$0xff]  ;;  %v10216_v52 = vld [vmem:[#allocation40_spill] sm:$0xff] }
  0xf6   :  { %v1979_v15 = vsel %vm8155_vm7, %v5644_v0, %v1978_v4  ;;  %v9287_v4 = vld [vmem:[%s9995_s0 + $0xcc] sm:$0xf] }
  0xf7   :  { %6361 = vmatmul.mubr.msk.bf16.gmra.mrb[32].mxu1 %vm1003_vm4, %v9127_v21 }
  0xf8   :  { %6653 = vmatmul.mubr.msk.bf16.gmra.mrb[60].mxu0 %vm1003_vm4, %v9129_v38  ;;  %6364 = vmatprep.mubr.msk.bf16.mxu1 %vm1003_vm4, %v9137_v53 }
  0xf9   :  { %6658 = vmatprep.mubr.msk.bf16.mxu0 %vm1003_vm4, %v8787_v62 }
  0xff   :  { %6365 = vmatmul.mubr.msk.bf16.gmra.mrb[36].mxu1 %vm1003_vm4, %v9153_v20 }
 0x100   :  { %6659 = vmatmul.mubr.msk.bf16.vlgmr.msra.gmra.mrb[0].mxu0 %vm1003_vm4, %v8821_v31  ;;  %6368 = vmatprep.mubr.msk.bf16.mxu1 %vm1003_vm4, %v9161_v18 }
 0x101   :  { %6723 = vmatpush3.bf16.msra.mxu0 %v4365_v47  ;;  %6662 = vmatprep.mubr.msk.bf16.mxu0 %vm1003_vm4, %v8831_v3  ;;  %v7487_v47 = vld [vmem:[%s9995_s0 + $0x124] sm:$0xf] }
 0x102   :  { %7394 = vmatprep.subr.msk.bf16.mxu0 %vm1100_vm0, %v9170_v10  ;;  %v9194_v38 = vcombine.low %v7486_v45, %v7487_v47  ;;  %v1982_v45 = vsel %vm8155_vm7, %v1980_v48, %v1981_v60  ;;  %v9292_v60 = vld [vmem:[%s9995_s0 + $0xd0] sm:$0xf]  ;;  %v2769_v48 = vsel %vm1100_vm0, %v8849_v59, 0  ;;  %v10215_v59 = vld [vmem:[#allocation38_spill] sm:$0xff] }
 0x103   :  { %v5677_v47 = vcombine.low %v1979_v15, %v1982_v45  ;;  %v5849_v0 = vcombine.low %v9287_v4, %v9292_v60  ;;  %v10212_v15 = vld [vmem:[#allocation32_spill] sm:$0xff]  ;;  %v10213_v45 = vld [vmem:[#allocation33_spill] sm:$0xff] }
 0x107   :  { %6369 = vmatmul.mubr.msk.bf16.gmra.mrb[40].mxu1 %vm1003_vm4, %v9186_v9 }
 0x108   :  { %6663 = vmatmul.mubr.msk.bf16.gmra.mrb[4].mxu0 %vm1003_vm4, %v8870_v44  ;;  %6372 = vmatprep.mubr.msk.bf16.mxu1 %vm1003_vm4, %v9194_v38 }
 0x109   :  { %6666 = vmatprep.mubr.msk.bf16.mxu0 %vm1003_vm4, %v8882_v26 }
 0x10f   :  { %6373 = vmatmul.mubr.msk.bf16.gmra.mrb[44].mxu1 %vm1003_vm4, %v9206_v40 }
 0x110   :  { %6667 = vmatmul.mubr.msk.bf16.gmra.mrb[8].mxu0 %vm1003_vm4, %v8894_v37  ;;  %6376 = vmatprep.mubr.msk.bf16.mxu1 %vm1003_vm4, %v9210_v16 }
 0x111   :  { %6670 = vmatprep.mubr.msk.bf16.mxu0 %vm1003_vm4, %v8902_v11 }
 0x117   :  { %6377 = vmatmul.mubr.msk.bf16.gmra.mrb[48].mxu1 %vm1003_vm4, %v9222_v36 }
 0x118   :  { %6671 = vmatmul.mubr.msk.bf16.gmra.mrb[12].mxu0 %vm1003_vm4, %v8981_v25  ;;  %6380 = vmatprep.mubr.msk.bf16.mxu1 %vm1003_vm4, %v9226_v33 }
 0x119   :  { %6674 = vmatprep.mubr.msk.bf16.mxu0 %vm1003_vm4, %v9003_v5 }
 0x11f   :  { %6381 = vmatmul.mubr.msk.bf16.gmra.mrb[52].mxu1 %vm1003_vm4, %v9238_v30 }
 0x120   :  { %6675 = vmatmul.mubr.msk.bf16.gmra.mrb[16].mxu0 %vm1003_vm4, %v9034_v63  ;;  %6384 = vmatprep.mubr.msk.bf16.mxu1 %vm1003_vm4, %v9242_v13 }
 0x121   :  { %6678 = vmatprep.mubr.msk.bf16.mxu0 %vm1003_vm4, %v9040_v55 }
 0x127   :  { %6385 = vmatmul.mubr.msk.bf16.gmra.mrb[56].mxu1 %vm1003_vm4, %v8985_v29 }
 0x128   :  { %6679 = vmatmul.mubr.msk.bf16.gmra.mrb[20].mxu0 %vm1003_vm4, %v9060_v50  ;;  %6388 = vmatprep.mubr.msk.bf16.mxu1 %vm1003_vm4, %v8989_v39 }
 0x129   :  { %6682 = vmatprep.mubr.msk.bf16.mxu0 %vm1003_vm4, %v9066_v14 }
 0x12f   :  { %6389 = vmatmul.mubr.msk.bf16.gmra.mrb[60].mxu1 %vm1003_vm4, %v8993_v46 }
 0x130   :  { %6683 = vmatmul.mubr.msk.bf16.gmra.mrb[24].mxu0 %vm1003_vm4, %v9094_v22  ;;  %6394 = vmatprep.mubr.msk.bf16.mxu1 %vm1003_vm4, %v5677_v47  ;;  %v7491_v47 = vld [vmem:[%s9996_s1 + $0x8] sm:$0x3] }
 0x131   :  { %6686 = vmatprep.mubr.msk.bf16.mxu0 %vm1003_vm4, %v9275_v8 }
 0x137   :  { %6395 = vmatmul.mubr.msk.bf16.vlgmr.msra.gmra.mrb[0].mxu1 %vm1003_vm4, %v10212_v15  ;;  %v10219_v15 = vld [vmem:[#allocation47_spill] sm:$0xff] }
 0x138   :  { %6687 = vmatmul.mubr.msk.bf16.gmra.mrb[28].mxu0 %vm1003_vm4, %v5849_v0  ;;  %6398 = vmatprep.mubr.msk.bf16.mxu1 %vm1003_vm4, %v10213_v45  ;;  %v10217_v0 = vld [vmem:[#allocation42_spill] sm:$0xff] }
 0x139   :  { %6690 = vmatprep.mubr.msk.bf16.mxu0 %vm1003_vm4, %v9137_v53  ;;  %6459 = vmatpush3.bf16.msra.mxu1 %v2769_v48  ;;  %v10218_v48 = vld [vmem:[#allocation45_spill] sm:$0xff] }
 0x13a   :  { %7390 = vmatprep.subr.msk.bf16.mxu1 %vm1100_vm0, %v7491_v47  ;;  %v10220_v47 = vld [vmem:[#allocation50_spill] sm:$0xff] }
 0x13f   :  { %6399 = vmatmul.mubr.msk.bf16.gmra.mrb[4].mxu1 %vm1003_vm4, %v10214_v32 }
 0x140   :  { %6691 = vmatmul.mubr.msk.bf16.gmra.mrb[32].mxu0 %vm1003_vm4, %v9153_v20  ;;  %6402 = vmatprep.mubr.msk.bf16.mxu1 %vm1003_vm4, %v10215_v59 }
 0x141   :  { %6694 = vmatprep.mubr.msk.bf16.mxu0 %vm1003_vm4, %v9161_v18 }
 0x147   :  { %6403 = vmatmul.mubr.msk.bf16.gmra.mrb[8].mxu1 %vm1003_vm4, %v10216_v52 }
 0x148   :  { %6695 = vmatmul.mubr.msk.bf16.gmra.mrb[36].mxu0 %vm1003_vm4, %v9186_v9  ;;  %6406 = vmatprep.mubr.msk.bf16.mxu1 %vm1003_vm4, %v10217_v0  ;;  %v10221_v0 = vld [vmem:[#allocation55_spill] sm:$0xff] }
 0x149   :  { %6698 = vmatprep.mubr.msk.bf16.mxu0 %vm1003_vm4, %v9194_v38 }
 0x14f   :  { %6407 = vmatmul.mubr.msk.bf16.gmra.mrb[12].mxu1 %vm1003_vm4, %v10218_v48  ;;  %v10222_v48 = vld [vmem:[#allocation57_spill] sm:$0xff] }
 0x150   :  { %6699 = vmatmul.mubr.msk.bf16.gmra.mrb[40].mxu0 %vm1003_vm4, %v9206_v40  ;;  %6410 = vmatprep.mubr.msk.bf16.mxu1 %vm1003_vm4, %v10219_v15  ;;  %v10223_v15 = vld [vmem:[#allocation60_spill] sm:$0xff] }
 0x151   :  { %6702 = vmatprep.mubr.msk.bf16.mxu0 %vm1003_vm4, %v9210_v16 }
 0x157   :  { %6411 = vmatmul.mubr.msk.bf16.gmra.mrb[16].mxu1 %vm1003_vm4, %v10220_v47  ;;  %v2090_v47 = vrot.slane %v9104_v51, 5 }
 0x158   :  { %6703 = vmatmul.mubr.msk.bf16.gmra.mrb[44].mxu0 %vm1003_vm4, %v9222_v36  ;;  %6414 = vmatprep.mubr.msk.bf16.mxu1 %vm1003_vm4, %v10221_v0  ;;  %v5660_v36 = vrot.slane %v9099_v56, 9 }
 0x159   :  { %6706 = vmatprep.mubr.msk.bf16.mxu0 %vm1003_vm4, %v9226_v33  ;;  %v2092_v0 = vrot.slane %v2090_v47, 4  ;;  %v7492_v33 = vld [vmem:[%s9995_s0 + $0xe0] sm:$0x1] }
 0x15a   :  { %v2093_v16 = vrot.slane %v7492_v33, 5  ;;  %v2091_v56 = vsel %vm8155_vm7, %v5660_v36, %v2090_v47  ;;  %v9368_v33 = vcombine.low %v9085_v57, %v9071_v27  ;;  %v9385_v36 = vld [vmem:[%s9995_s0 + $0x1a8] sm:$0xf]  ;;  %v4751_v47 = vsel %vm1100_vm0, %v9170_v10, 0  ;;  %v10231_v10 = vld [vmem:[#allocation14_spill] sm:$0xff] }
 0x15b   :  { %10226 = vst [vmem:[#allocation41_spill] sm:$0xff] %v9385_v36 }
 0x15c   :  { %v2094_v51 = vsel %vm8155_vm7, %v2092_v0, %v2093_v16  ;;  %v9380_v16 = vld [vmem:[%s9995_s0 + $0x1a4] sm:$0xf] }
 0x15d   :  { %10225 = vst [vmem:[#allocation68_spill] sm:$0xff] %v9380_v16  ;;  %v5850_v0 = vcombine.low %v9380_v16, %v9385_v36 }
 0x15f   :  { %6415 = vmatmul.mubr.msk.bf16.gmra.mrb[20].mxu1 %vm1003_vm4, %v10222_v48  ;;  %v10224_v48 = vld [vmem:[#allocation65_spill] sm:$0xff] }
 0x160   :  { %6707 = vmatmul.mubr.msk.bf16.gmra.mrb[48].mxu0 %vm1003_vm4, %v9238_v30  ;;  %6418 = vmatprep.mubr.msk.bf16.mxu1 %vm1003_vm4, %v10223_v15  ;;  %v5693_v15 = vcombine.low %v2091_v56, %v2094_v51  ;;  %v10228_v56 = vld [vmem:[#allocation11_spill] sm:$0xff]  ;;  %v10230_v51 = vld [vmem:[#allocation13_spill] sm:$0xff] }
 0x161   :  { %6710 = vmatprep.mubr.msk.bf16.mxu0 %vm1003_vm4, %v9242_v13 }
 0x167   :  { %6419 = vmatmul.mubr.msk.bf16.gmra.mrb[24].mxu1 %vm1003_vm4, %v10224_v48 }
 0x168   :  { %6711 = vmatmul.mubr.msk.bf16.gmra.mrb[52].mxu0 %vm1003_vm4, %v8985_v29  ;;  %6422 = vmatprep.mubr.msk.bf16.mxu1 %vm1003_vm4, %v8745_v19 }
 0x169   :  { %6714 = vmatprep.mubr.msk.bf16.mxu0 %vm1003_vm4, %v8989_v39 }
 0x16f   :  { %6423 = vmatmul.mubr.msk.bf16.gmra.mrb[28].mxu1 %vm1003_vm4, %v8752_v2 }
 0x170   :  { %6715 = vmatmul.mubr.msk.bf16.gmra.mrb[56].mxu0 %vm1003_vm4, %v8993_v46  ;;  %6426 = vmatprep.mubr.msk.bf16.mxu1 %vm1003_vm4, %v5693_v15  ;;  %v10227_v15 = vld [vmem:[#allocation10_spill] sm:$0xff] }
 0x171   :  { %6718 = vmatprep.mubr.msk.bf16.mxu0 %vm1003_vm4, %v9368_v33 }
 0x177   :  { %6427 = vmatmul.mubr.msk.bf16.gmra.mrb[32].mxu1 %vm1003_vm4, %v8789_v17  ;;  %v10229_v17 = vld [vmem:[#allocation12_spill] sm:$0xff] }
 0x178   :  { %6719 = vmatmul.mubr.msk.bf16.gmra.mrb[60].mxu0 %vm1003_vm4, %v5850_v0  ;;  %6430 = vmatprep.mubr.msk.bf16.mxu1 %vm1003_vm4, %v8823_v24  ;;  %v10232_v0 = vld [vmem:[#allocation15_spill] sm:$0xff] }
 0x179   :  { %6724 = vmatprep.mubr.msk.bf16.mxu0 %vm1003_vm4, %v10227_v15  ;;  %v10233_v15 = vld [vmem:[#allocation16_spill] sm:$0xff] }
 0x17f   :  { %6431 = vmatmul.mubr.msk.bf16.gmra.mrb[36].mxu1 %vm1003_vm4, %v8833_v7 }
 0x180   :  { %6725 = vmatmul.mubr.msk.bf16.vlgmr.msra.gmra.mrb[0].mxu0 %vm1003_vm4, %v10228_v56  ;;  %6434 = vmatprep.mubr.msk.bf16.mxu1 %vm1003_vm4, %v8874_v6  ;;  %v10235_v56 = vld [vmem:[#allocation18_spill] sm:$0xff] }
 0x181   :  { %6789 = vmatpush3.bf16.msra.mxu0 %v4751_v47  ;;  %6728 = vmatprep.mubr.msk.bf16.mxu0 %vm1003_vm4, %v10229_v17  ;;  %v10234_v47 = vld [vmem:[#allocation17_spill] sm:$0xff]  ;;  %v10236_v17 = vld [vmem:[#allocation19_spill] sm:$0xff] }
 0x187   :  { %6435 = vmatmul.mubr.msk.bf16.gmra.mrb[40].mxu1 %vm1003_vm4, %v8885_v54 }
 0x188   :  { %6729 = vmatmul.mubr.msk.bf16.gmra.mrb[4].mxu0 %vm1003_vm4, %v10230_v51  ;;  %6438 = vmatprep.mubr.msk.bf16.mxu1 %vm1003_vm4, %v8932_v58  ;;  %v4303_v51 = vshrl.u32 %v9287_v4, 16 }
 0x189   :  { %6732 = vmatprep.mubr.msk.bf16.mxu0 %vm1003_vm4, %v10231_v10  ;;  %v4306_v10 = vshll.u32 %v9287_v4, 16 }
 0x18f   :  { %6439 = vmatmul.mubr.msk.bf16.gmra.mrb[44].mxu1 %vm1003_vm4, %v8943_v34 }
 0x190   :  { %6733 = vmatmul.mubr.msk.bf16.gmra.mrb[8].mxu0 %vm1003_vm4, %v10232_v0  ;;  %6442 = vmatprep.mubr.msk.bf16.mxu1 %vm1003_vm4, %v8995_v41  ;;  %v4316_v0 = vshrl.u32 %v9292_v60, 16 }
 0x191   :  { %6736 = vmatprep.mubr.msk.bf16.mxu0 %vm1003_vm4, %v10233_v15  ;;  %v10237_v15 = vld [vmem:[#allocation20_spill] sm:$0xff] }
 0x197   :  { %6443 = vmatmul.mubr.msk.bf16.gmra.mrb[48].mxu1 %vm1003_vm4, %v9005_v35  ;;  %v4318_v35 = vrot.slane %v4316_v0, 4 }
 0x198   :  { %6737 = vmatmul.mubr.msk.bf16.gmra.mrb[12].mxu0 %vm1003_vm4, %v10234_v47  ;;  %6446 = vmatprep.mubr.msk.bf16.mxu1 %vm1003_vm4, %v9036_v61  ;;  %v4312_v47 = vshll.u32 %v9292_v60, 16  ;;  %v4308_v61 = vrot.slane %v4306_v10, 5 }
 0x199   :  { %6740 = vmatprep.mubr.msk.bf16.mxu0 %vm1003_vm4, %v10235_v56  ;;  %v4305_v56 = vrot.slane %v4303_v51, 4 }
 0x19b   :  { %v4309_v51 = vor.u32 %v4308_v61, %v4305_v56 }
 0x19f   :  { %6447 = vmatmul.mubr.msk.bf16.gmra.mrb[52].mxu1 %vm1003_vm4, %v9042_v43  ;;  %v4314_v43 = vrot.slane %v4312_v47, 5  ;;  %v4310_v47 = vrot.slane %v4309_v51, 4  ;;  %v3162_v51 = vshrl.u32 %v9071_v27, 16 }
 0x1a0   :  { %6741 = vmatmul.mubr.msk.bf16.gmra.mrb[16].mxu0 %vm1003_vm4, %v10236_v17  ;;  %6450 = vmatprep.mubr.msk.bf16.mxu1 %vm1003_vm4, %v9062_v12  ;;  %v9445_v17 = vld [vmem:[%s9995_s0 + $0xd4] sm:$0x1]  ;;  %v10238_v12 = vld [vmem:[#allocation21_spill] sm:$0xff] }
 0x1a1   :  { %6744 = vmatprep.mubr.msk.bf16.mxu0 %vm1003_vm4, %v10237_v15  ;;  %v10239_v15 = vld [vmem:[#allocation22_spill] sm:$0xff]  ;;  %v4319_v10 = vor.u32 %v4318_v35, %v4314_v43  ;;  %v4322_v0 = vshll.u32 %v9445_v17, 16  ;;  %v4315_v35 = vsel %vm7634_vm3, %v4310_v47, %v4314_v43  ;;  %v3164_v47 = vrot.slane %v3162_v51, 4 }
 0x1a2   :  { %v10245_v43 = vld [vmem:[#allocation34_spill] sm:$0xff] }
 0x1a3   :  { %v4320_v41 = vrot.slane %v4319_v10, 4  ;;  %v4324_v34 = vrot.slane %v4322_v0, 5 }
 0x1a5   :  { %v4325_v61 = vsel %vm7634_vm3, %v4320_v41, %v4324_v34  ;;  %v10248_v34 = vld [vmem:[#allocation39_spill] sm:$0xff]  ;;  %v3152_v41 = vshll.u32 %v9085_v57, 16 }
 0x1a6   :  { %v5884_v56 = vcombine.low %v4315_v35, %v4325_v61  ;;  %v4340_v35 = vshrl.u32 %v9385_v36, 16  ;;  %v4336_v61 = vshll.u32 %v9385_v36, 16  ;;  %v10256_v36 = vld [vmem:[#allocation61_spill] sm:$0xff] }
 0x1a7   :  { %6451 = vmatmul.mubr.msk.bf16.gmra.mrb[56].mxu1 %vm1003_vm4, %v8939_v49  ;;  %v10240_v49 = vld [vmem:[#allocation25_spill] sm:$0xff]  ;;  %v3154_v0 = vrot.slane %v3152_v41, 5 }
 0x1a8   :  { %6745 = vmatmul.mubr.msk.bf16.gmra.mrb[20].mxu0 %vm1003_vm4, %v10238_v12  ;;  %6454 = vmatprep.mubr.msk.bf16.mxu1 %vm1003_vm4, %v8953_v1  ;;  %v10241_v12 = vld [vmem:[#allocation29_spill] sm:$0xff]  ;;  %v4342_v51 = vrot.slane %v4340_v35, 4 }
 0x1a9   :  { %6748 = vmatprep.mubr.msk.bf16.mxu0 %vm1003_vm4, %v10239_v15 }
 0x1af   :  { %6455 = vmatmul.mubr.msk.bf16.gmra.mrb[60].mxu1 %vm1003_vm4, %v8961_v23 }
 0x1b0   :  { %6749 = vmatmul.mubr.msk.bf16.gmra.mrb[24].mxu0 %vm1003_vm4, %v10240_v49  ;;  %6460 = vmatprep.mubr.msk.bf16.mxu1 %vm1003_vm4, %v8774_v28  ;;  %v10243_v49 = vld [vmem:[#allocation31_spill] sm:$0xff]  ;;  %v10244_v28 = vld [vmem:[#allocation8_spill] sm:$0xff] }
 0x1b1   :  { %6752 = vmatprep.mubr.msk.bf16.mxu0 %vm1003_vm4, %v10241_v12  ;;  %v10253_v12 = vld [vmem:[#allocation54_spill] sm:$0xff] }
 0x1b7   :  { %6461 = vmatmul.mubr.msk.bf16.vlgmr.msra.gmra.mrb[0].mxu1 %vm1003_vm4, %v8787_v62  ;;  %v10246_v62 = vld [vmem:[#allocation36_spill] sm:$0xff] }
 0x1b8   :  { %6753 = vmatmul.mubr.msk.bf16.gmra.mrb[28].mxu0 %vm1003_vm4, %v5884_v56  ;;  %6464 = vmatprep.mubr.msk.bf16.mxu1 %vm1003_vm4, %v8821_v31  ;;  %v10247_v31 = vld [vmem:[#allocation37_spill] sm:$0xff] }
 0x1b9   :  { %6756 = vmatprep.mubr.msk.bf16.mxu0 %vm1003_vm4, %v10243_v49  ;;  %6872 = vmatpush3.bf16.msra.mxu1 %v10244_v28 }
 0x1bf   :  { %6465 = vmatmul.mubr.msk.bf16.gmra.mrb[4].mxu1 %vm1003_vm4, %v8831_v3  ;;  %v10249_v3 = vld [vmem:[#allocation43_spill] sm:$0xff] }
 0x1c0   :  { %6757 = vmatmul.mubr.msk.bf16.gmra.mrb[32].mxu0 %vm1003_vm4, %v10245_v43  ;;  %6468 = vmatprep.mubr.msk.bf16.mxu1 %vm1003_vm4, %v8870_v44  ;;  %v10250_v44 = vld [vmem:[#allocation44_spill] sm:$0xff] }
 0x1c1   :  { %6760 = vmatprep.mubr.msk.bf16.mxu0 %vm1003_vm4, %v10246_v62 }
 0x1c7   :  { %6469 = vmatmul.mubr.msk.bf16.gmra.mrb[8].mxu1 %vm1003_vm4, %v8882_v26  ;;  %v10251_v26 = vld [vmem:[#allocation46_spill] sm:$0xff] }
 0x1c8   :  { %6761 = vmatmul.mubr.msk.bf16.gmra.mrb[36].mxu0 %vm1003_vm4, %v10247_v31  ;;  %6472 = vmatprep.mubr.msk.bf16.mxu1 %vm1003_vm4, %v8894_v37  ;;  %v10252_v37 = vld [vmem:[#allocation52_spill] sm:$0xff] }
 0x1c9   :  { %6764 = vmatprep.mubr.msk.bf16.mxu0 %vm1003_vm4, %v10248_v34 }
 0x1cf   :  { %6473 = vmatmul.mubr.msk.bf16.gmra.mrb[12].mxu1 %vm1003_vm4, %v8902_v11  ;;  %v3149_v11 = vshrl.u32 %v9085_v57, 16  ;;  %v4330_v57 = vshll.u32 %v9380_v16, 16 }
 0x1d0   :  { %6765 = vmatmul.mubr.msk.bf16.gmra.mrb[40].mxu0 %vm1003_vm4, %v10249_v3  ;;  %6476 = vmatprep.mubr.msk.bf16.mxu1 %vm1003_vm4, %v8981_v25  ;;  %v3158_v25 = vshll.u32 %v9071_v27, 16  ;;  %v10254_v27 = vld [vmem:[#allocation56_spill] sm:$0xff] }
 0x1d1   :  { %6768 = vmatprep.mubr.msk.bf16.mxu0 %vm1003_vm4, %v10250_v44  ;;  %v3151_v10 = vrot.slane %v3149_v11, 4  ;;  %v4332_v41 = vrot.slane %v4330_v57, 5 }
 0x1d3   :  { %v3155_v56 = vor.u32 %v3154_v0, %v3151_v10  ;;  %v10257_v10 = vld [vmem:[#allocation64_spill] sm:$0xff] }
 0x1d7   :  { %6477 = vmatmul.mubr.msk.bf16.gmra.mrb[16].mxu1 %vm1003_vm4, %v9003_v5  ;;  %v3160_v5 = vrot.slane %v3158_v25, 5  ;;  %v4338_v25 = vrot.slane %v4336_v61, 5 }
 0x1d8   :  { %6769 = vmatmul.mubr.msk.bf16.gmra.mrb[44].mxu0 %vm1003_vm4, %v10251_v26  ;;  %6480 = vmatprep.mubr.msk.bf16.mxu1 %vm1003_vm4, %v9034_v63  ;;  %v4327_v63 = vshrl.u32 %v9380_v16, 16  ;;  %v9528_v16 = vld [vmem:[%s9995_s0 + $0x1ac] sm:$0x1] }
 0x1d9   :  { %6772 = vmatprep.mubr.msk.bf16.mxu0 %vm1003_vm4, %v10252_v37  ;;  %v3165_v49 = vor.u32 %v3164_v47, %v3160_v5  ;;  %v4343_v47 = vor.u32 %v4342_v51, %v4338_v25 }
 0x1da   :  { %v4329_v11 = vrot.slane %v4327_v63, 4  ;;  %v4346_v63 = vshll.u32 %v9528_v16, 16 }
 0x1db   :  { %v3166_v23 = vrot.slane %v3165_v49, 4 }
 0x1dc   :  { %v4333_v0 = vor.u32 %v4332_v41, %v4329_v11  ;;  %v4348_v49 = vrot.slane %v4346_v63, 5 }
 0x1de   :  { %v4334_v61 = vrot.slane %v4333_v0, 4 }
 0x1df   :  { %6481 = vmatmul.mubr.msk.bf16.gmra.mrb[20].mxu1 %vm1003_vm4, %v9040_v55  ;;  %v10255_v55 = vld [vmem:[#allocation58_spill] sm:$0xff] }
 0x1e0   :  { %6773 = vmatmul.mubr.msk.bf16.gmra.mrb[48].mxu0 %vm1003_vm4, %v10253_v12  ;;  %6484 = vmatprep.mubr.msk.bf16.mxu1 %vm1003_vm4, %v9060_v50  ;;  %v3168_v28 = vshll.u32 %v10255_v55, 16  ;;  %v3156_v50 = vrot.slane %v3155_v56, 4  ;;  %v4344_v56 = vrot.slane %v4343_v47, 4 }
 0x1e1   :  { %6776 = vmatprep.mubr.msk.bf16.mxu0 %vm1003_vm4, %v10254_v27 }
 0x1e2   :  { %v3170_v1 = vrot.slane %v3168_v28, 5  ;;  %v3161_v57 = vsel %vm7634_vm3, %v3156_v50, %v3160_v5 }
 0x1e4   :  { %v3171_v35 = vsel %vm7634_vm3, %v3166_v23, %v3170_v1  ;;  %v4339_v1 = vsel %vm7634_vm3, %v4334_v61, %v4338_v25  ;;  %v4349_v23 = vsel %vm7634_vm3, %v4344_v56, %v4348_v49 }
 0x1e5   :  { %v5885_v5 = vcombine.low %v4339_v1, %v4349_v23  ;;  %v7541_v1 = vmov 0.0|0.0  }
 0x1e6   :  { %6865 = vmatprep.subr.bf16.mxu1 %v7541_v1 }
 0x1e7   :  { %6485 = vmatmul.mubr.msk.bf16.gmra.mrb[24].mxu1 %vm1003_vm4, %v9066_v14  ;;  %v9543_v14 = vcombine.low %v3161_v57, %v3171_v35 }
 0x1e8   :  { %6777 = vmatmul.mubr.msk.bf16.gmra.mrb[52].mxu0 %vm1003_vm4, %v10256_v36  ;;  %6488 = vmatprep.mubr.msk.bf16.mxu1 %vm1003_vm4, %v9094_v22  ;;  %v10258_v22 = vld [vmem:[#allocation69_spill] sm:$0xff] }
 0x1e9   :  { %6780 = vmatprep.mubr.msk.bf16.mxu0 %vm1003_vm4, %v10257_v10 }
 0x1ef   :  { %6489 = vmatmul.mubr.msk.bf16.gmra.mrb[28].mxu1 %vm1003_vm4, %v9275_v8  ;;  %v10265_v8 = vld [vmem:[#allocation50_spill] sm:$0xff] }
 0x1f0   :  { %6781 = vmatmul.mubr.msk.bf16.gmra.mrb[56].mxu0 %vm1003_vm4, %v10258_v22  ;;  %6492 = vmatprep.mubr.msk.bf16.mxu1 %vm1003_vm4, %v9127_v21  ;;  %v10259_v21 = vld [vmem:[#allocation42_spill] sm:$0xff] }
 0x1f1   :  { %6784 = vmatprep.mubr.msk.bf16.mxu0 %vm1003_vm4, %v9543_v14 }
 0x1f7   :  { %6493 = vmatmul.mubr.msk.bf16.gmra.mrb[32].mxu1 %vm1003_vm4, %v9137_v53  ;;  %v10260_v53 = vld [vmem:[#allocation53_spill] sm:$0xff] }
 0x1f8   :  { %6785 = vmatmul.mubr.msk.bf16.gmra.mrb[60].mxu0 %vm1003_vm4, %v5885_v5  ;;  %6496 = vmatprep.mubr.msk.bf16.mxu1 %vm1003_vm4, %v9153_v20  ;;  %v10261_v20 = vld [vmem:[#allocation45_spill] sm:$0xff]  ;;  %v5391_v5 = vld [vmem:[%s9998_s3] sm:$0xff] }
 0x1f9   :  { %6790 = vmatprep.mubr.msk.bf16.mxu0 %vm1003_vm4, %v10213_v45  ;;  %v10267_v45 = vld [vmem:[#allocation57_spill] sm:$0xff] }
 0x1ff   :  { %6497 = vmatmul.mubr.msk.bf16.gmra.mrb[36].mxu1 %vm1003_vm4, %v9161_v18  ;;  %v10262_v18 = vld [vmem:[#allocation63_spill] sm:$0xff] }
 0x200   :  { %6791 = vmatmul.mubr.msk.bf16.vlgmr.msra.gmra.mrb[0].mxu0 %vm1003_vm4, %v10214_v32  ;;  %6500 = vmatprep.mubr.msk.bf16.mxu1 %vm1003_vm4, %v9186_v9  ;;  %v10263_v9 = vld [vmem:[#allocation47_spill] sm:$0xff]  ;;  %v10268_v32 = vld [vmem:[#allocation60_spill] sm:$0xff] }
 0x201   :  { %6794 = vmatprep.mubr.msk.bf16.mxu0 %vm1003_vm4, %v10215_v59  ;;  %v4727_v59 = vrot.slane %v9445_v17, 5 }
 0x207   :  { %6501 = vmatmul.mubr.msk.bf16.gmra.mrb[40].mxu1 %vm1003_vm4, %v9194_v38  ;;  %v10264_v38 = vld [vmem:[#allocation62_spill] sm:$0xff] }
 0x208   :  { %6795 = vmatmul.mubr.msk.bf16.gmra.mrb[4].mxu0 %vm1003_vm4, %v10216_v52  ;;  %6504 = vmatprep.mubr.msk.bf16.mxu1 %vm1003_vm4, %v9206_v40  ;;  %v10266_v40 = vld [vmem:[#allocation55_spill] sm:$0xff]  ;;  %v10277_v52 = vld [vmem:[#allocation28_spill] sm:$0xff] }
 0x209   :  { %6798 = vmatprep.mubr.msk.bf16.mxu0 %vm1003_vm4, %v10259_v21  ;;  %v5392_v21 = vld [vmem:[%s9998_s3 + $0x8] sm:$0xff] }
 0x20f   :  { %6505 = vmatmul.mubr.msk.bf16.gmra.mrb[44].mxu1 %vm1003_vm4, %v10260_v53 }
 0x210   :  { %6799 = vmatmul.mubr.msk.bf16.gmra.mrb[8].mxu0 %vm1003_vm4, %v10261_v20  ;;  %6508 = vmatprep.mubr.msk.bf16.mxu1 %vm1003_vm4, %v10262_v18  ;;  %v6866_v20 = vpack.c.bf16 %v5392_v21, %v5391_v5 }
 0x211   :  { %6802 = vmatprep.mubr.msk.bf16.mxu0 %vm1003_vm4, %v10263_v9 }
 0x217   :  { %6509 = vmatmul.mubr.msk.bf16.gmra.mrb[48].mxu1 %vm1003_vm4, %v10264_v38 }
 0x218   :  { %6803 = vmatmul.mubr.msk.bf16.gmra.mrb[12].mxu0 %vm1003_vm4, %v10265_v8  ;;  %6512 = vmatprep.mubr.msk.bf16.mxu1 %vm1003_vm4, %v9238_v30  ;;  %v4724_v30 = vrot.slane %v9292_v60, 5  ;;  %v10276_v60 = vld [vmem:[#allocation24_spill] sm:$0xff] }
 0x219   :  { %6806 = vmatprep.mubr.msk.bf16.mxu0 %vm1003_vm4, %v10266_v40 }
 0x21f   :  { %6513 = vmatmul.mubr.msk.bf16.gmra.mrb[52].mxu1 %vm1003_vm4, %v9242_v13  ;;  %v5918_v13 = vrot.slane %v9287_v4, 9 }
 0x220   :  { %6807 = vmatmul.mubr.msk.bf16.gmra.mrb[16].mxu0 %vm1003_vm4, %v10267_v45  ;;  %6516 = vmatprep.mubr.msk.bf16.mxu1 %vm1003_vm4, %v8985_v29  ;;  %v4726_v29 = vrot.slane %v4724_v30, 4 }
 0x221   :  { %6810 = vmatprep.mubr.msk.bf16.mxu0 %vm1003_vm4, %v10268_v32 }
 0x227   :  { %6517 = vmatmul.mubr.msk.bf16.gmra.mrb[56].mxu1 %vm1003_vm4, %v8989_v39  ;;  %v10269_v39 = vld [vmem:[#allocation23_spill] sm:$0xff] }
 0x228   :  { %6811 = vmatmul.mubr.msk.bf16.gmra.mrb[20].mxu0 %vm1003_vm4, %v10224_v48  ;;  %6520 = vmatprep.mubr.msk.bf16.mxu1 %vm1003_vm4, %v8993_v46  ;;  %v4728_v46 = vsel %vm8155_vm7, %v4726_v29, %v4727_v59  ;;  %v10278_v48 = vld [vmem:[#allocation41_spill] sm:$0xff] }
 0x229   :  { %6814 = vmatprep.mubr.msk.bf16.mxu0 %vm1003_vm4, %v8745_v19  ;;  %v4725_v19 = vsel %vm8155_vm7, %v5918_v13, %v4724_v30 }
 0x22a   :  { %v5921_v4 = vcombine.low %v4725_v19, %v4728_v46  ;;  %v9761_v19 = vld [vmem:[%s9997_s2] ss:$0 sm:$0xff] }
 0x22f   :  { %6521 = vmatmul.mubr.msk.bf16.gmra.mrb[60].mxu1 %vm1003_vm4, %v9368_v33  ;;  %v4731_v33 = vrot.slane %v10278_v48, 5 }
 0x230   :  { %6815 = vmatmul.mubr.msk.bf16.gmra.mrb[24].mxu0 %vm1003_vm4, %v8752_v2  ;;  %6562 = vmatprep.mubr.msk.bf16.mxu1 %vm1003_vm4, %v10245_v43  ;;  %v10270_v2 = vld [vmem:[#allocation26_spill] sm:$0xff]  ;;  %v4734_v43 = vrot.slane %v9528_v16, 5 }
 0x231   :  { %6818 = vmatprep.mubr.msk.bf16.mxu0 %vm1003_vm4, %v10269_v39  ;;  %v4733_v15 = vrot.slane %v4731_v33, 4 }
 0x237   :  { %6563 = vmatmul.mubr.msk.bf16.vlgmr.msra.gmra.mrb[36].mxu1 %vm1003_vm4, %v10246_v62  ;;  %v10280_v62 = vld [vmem:[#allocation30_spill] sm:$0xff] }
 0x238   :  { %6819 = vmatmul.mubr.msk.bf16.gmra.mrb[28].mxu0 %vm1003_vm4, %v5921_v4  ;;  %6566 = vmatprep.mubr.msk.bf16.mxu1 %vm1003_vm4, %v10247_v31  ;;  %v10281_v31 = vld [vmem:[#allocation49_spill] sm:$0xff] }
 0x239   :  { %6822 = vmatprep.mubr.msk.bf16.mxu0 %vm1003_vm4, %v8823_v24  ;;  %v10271_v24 = vld [vmem:[#allocation27_spill] sm:$0xff]  ;;  %6867 = vmatpush3.bf16.msra.mxu1 %v6866_v20 }
 0x23a   :  { %6868 = vmatprep.subr.bf16.mxu1 %v7541_v1 }
 0x23f   :  { %6567 = vmatmul.mubr.msk.bf16.gmra.mrb[40].mxu1 %vm1003_vm4, %v10248_v34 }
 0x240   :  { %6823 = vmatmul.mubr.msk.bf16.gmra.mrb[32].mxu0 %vm1003_vm4, %v8833_v7  ;;  %6570 = vmatprep.mubr.msk.bf16.mxu1 %vm1003_vm4, %v10249_v3  ;;  %v10272_v7 = vld [vmem:[#allocation70_spill] sm:$0xff]  ;;  %v4735_v3 = vsel %vm8155_vm7, %v4733_v15, %v4734_v43 }
 0x241   :  { %6826 = vmatprep.mubr.msk.bf16.mxu0 %vm1003_vm4, %v8874_v6  ;;  %v10273_v6 = vld [vmem:[#allocation48_spill] sm:$0xff] }
 0x247   :  { %6571 = vmatmul.mubr.msk.bf16.gmra.mrb[44].mxu1 %vm1003_vm4, %v10250_v44 }
 0x248   :  { %6827 = vmatmul.mubr.msk.bf16.gmra.mrb[36].mxu0 %vm1003_vm4, %v8885_v54  ;;  %6574 = vmatprep.mubr.msk.bf16.mxu1 %vm1003_vm4, %v10251_v26  ;;  %v10274_v54 = vld [vmem:[#allocation51_spill] sm:$0xff] }
 0x249   :  { %6830 = vmatprep.mubr.msk.bf16.mxu0 %vm1003_vm4, %v8932_v58  ;;  %v10275_v58 = vld [vmem:[#allocation59_spill] sm:$0xff] }
 0x24f   :  { %6575 = vmatmul.mubr.msk.bf16.gmra.mrb[48].mxu1 %vm1003_vm4, %v10252_v37 }
 0x250   :  { %6831 = vmatmul.mubr.msk.bf16.gmra.mrb[40].mxu0 %vm1003_vm4, %v10270_v2  ;;  %6578 = vmatprep.mubr.msk.bf16.mxu1 %vm1003_vm4, %v10253_v12 }
 0x251   :  { %6834 = vmatprep.mubr.msk.bf16.mxu0 %vm1003_vm4, %v10271_v24 }
 0x257   :  { %6579 = vmatmul.mubr.msk.bf16.gmra.mrb[52].mxu1 %vm1003_vm4, %v10254_v27 }
 0x258   :  { %6835 = vmatmul.mubr.msk.bf16.gmra.mrb[44].mxu0 %vm1003_vm4, %v10272_v7  ;;  %6582 = vmatprep.mubr.msk.bf16.mxu1 %vm1003_vm4, %v10256_v36  ;;  %v10279_v36 = vld [vmem:[#allocation68_spill] sm:$0xff] }
 0x259   :  { %6838 = vmatprep.mubr.msk.bf16.mxu0 %vm1003_vm4, %v10273_v6  ;;  %v5919_v17 = vrot.slane %v10279_v36, 9 }
 0x25b   :  { %v4732_v34 = vsel %vm8155_vm7, %v5919_v17, %v4731_v33 }
 0x25c   :  { %v5922_v44 = vcombine.low %v4732_v34, %v4735_v3 }
 0x25f   :  { %6583 = vmatmul.mubr.msk.bf16.gmra.mrb[56].mxu1 %vm1003_vm4, %v10257_v10 }
 0x260   :  { %6839 = vmatmul.mubr.msk.bf16.gmra.mrb[48].mxu0 %vm1003_vm4, %v10274_v54  ;;  %6586 = vmatprep.mubr.msk.bf16.mxu1 %vm1003_vm4, %v10258_v22 }
 0x261   :  { %6842 = vmatprep.mubr.msk.bf16.mxu0 %vm1003_vm4, %v10275_v58 }
 0x267   :  { %6587 = vmatmul.mubr.msk.bf16.gmra.mrb[60].mxu1 %vm1003_vm4, %v9543_v14 }
 0x268   :  { %6843 = vmatmul.mubr.msk.bf16.gmra.mrb[52].mxu0 %vm1003_vm4, %v10276_v60 }
 0x269   :  { %6846 = vmatprep.mubr.msk.bf16.mxu0 %vm1003_vm4, %v10277_v52 }
 0x270   :  { %6847 = vmatmul.mubr.msk.bf16.gmra.mrb[56].mxu0 %vm1003_vm4, %v10280_v62 }
 0x271   :  { %6850 = vmatprep.mubr.msk.bf16.mxu0 %vm1003_vm4, %v10281_v31 }
 0x278   :  { %6851 = vmatmul.mubr.msk.bf16.gmra.mrb[60].mxu0 %vm1003_vm4, %v5922_v44 }
 0x28a   :  { %v6462_v26 = vpop.f32.mrb[0].mxu1 }
 0x28b   :  { %v2805_v37 = vpop.f32.mrb[1].mxu1 }
 0x28c   :  { %v6463_v12 = vpop.f32.mrb[2].mxu1 }
 0x28d   :  { %v2808_v27 = vpop.f32.mrb[3].mxu1 }
 0x292   :  { %v6466_v16 = vpop.f32.mrb[4].mxu1 }
 0x293   :  { %v2821_v55 = vpop.f32.mrb[5].mxu1 }
 0x294   :  { %v9692_v28 = vpop.f32.mrb[6].mxu1 }
 0x295   :  { %v9694_v11 = vpop.f32.mrb[7].mxu1 }
 0x29a   :  { %v9696_v41 = vpop.f32.mrb[8].mxu1 }
 0x29b   :  { %v9698_v25 = vpop.f32.mrb[9].mxu1 }
 0x29c   :  { %v9700_v51 = vpop.f32.mrb[10].mxu1 }
 0x29d   :  { %v9702_v42 = vpop.f32.mrb[11].mxu1 }
 0x2a2   :  { %v9704_v50 = vpop.f32.mrb[12].mxu1 }
 0x2a3   :  { %v9706_v10 = vpop.f32.mrb[13].mxu1 }
 0x2a4   :  { %v9708_v0 = vpop.f32.mrb[14].mxu1 }
 0x2a5   :  { %v9710_v47 = vpop.f32.mrb[15].mxu1 }
 0x2aa   :  { %v9712_v63 = vpop.f32.mrb[16].mxu1 }
 0x2ab   :  { %v9714_v57 = vpop.f32.mrb[17].mxu1 }
 0x2ac   :  { %v9716_v35 = vpop.f32.mrb[18].mxu1 }
 0x2ad   :  { %v9718_v14 = vpop.f32.mrb[19].mxu1 }
 0x2b2   :  { %v9720_v61 = vpop.f32.mrb[20].mxu1 }
 0x2b3   :  { %v9722_v56 = vpop.f32.mrb[21].mxu1 }
 0x2b4   :  { %v9724_v49 = vpop.f32.mrb[22].mxu1 }
 0x2b5   :  { %v9726_v22 = vpop.f32.mrb[23].mxu1 }
 0x2ba   :  { %v9728_v23 = vpop.f32.mrb[24].mxu1 }
 0x2bb   :  { %v9736_v53 = vpop.f32.mrb[25].mxu1 }
 0x2bc   :  { %v9738_v18 = vpop.f32.mrb[26].mxu1 }
 0x2bd   :  { %v9740_v9 = vpop.f32.mrb[27].mxu1 }
 0x2c2   :  { %v9742_v38 = vpop.f32.mrb[28].mxu1 }
 0x2c3   :  { %v9744_v8 = vpop.f32.mrb[29].mxu1 }
 0x2c4   :  { %v9746_v40 = vpop.f32.mrb[30].mxu1 }
 0x2c5   :  { %v9748_v45 = vpop.f32.mrb[31].mxu1 }
 0x2ca   :  { %v9750_v32 = vpop.f32.mrb[32].mxu1 }
 0x2cb   :  { %v9752_v30 = vpop.f32.mrb[33].mxu1 }
 0x2cc   :  { %v9754_v13 = vpop.f32.mrb[34].mxu1 }
 0x2cd   :  { %v9756_v29 = vpop.f32.mrb[35].mxu1 }
 0x2d3   :  { %v6792_v59 = vpop.f32.mrb[0].mxu0 }
 0x2d4   :  { %v6873_v39 = vadd.f32 %v6792_v59, %v6462_v26  ;;  %v4787_v46 = vpop.f32.mrb[1].mxu0 }
 0x2d5   :  { %v6874_v4 = vadd.f32 %v4787_v46, %v2805_v37  ;;  %v6793_v2 = vpop.f32.mrb[2].mxu0 }
 0x2d6   :  { %v6875_v24 = vadd.f32 %v6793_v2, %v6463_v12  ;;  %v4790_v7 = vpop.f32.mrb[3].mxu0  ;;  %v5115_v6 = vadd.f32 %v6873_v39, %v9761_v19  ;;  %v5394_v2 = vld [vmem:[%s9998_s3 + $0x18] sm:$0xff] }
 0x2d7   :  { %v5113_v54 = vadd.f32 %v6874_v4, %v9761_v19  ;;  %v6876_v58 = vadd.f32 %v4790_v7, %v2808_v27 }
 0x2d8   :  { %v5116_v52 = vadd.f32 %v6875_v24, %v9761_v19  ;;  %v5179_v33 = vmax.f32 %v5115_v6, 0.0 }
 0x2d9   :  { %v5177_v60 = vmax.f32 %v5113_v54, 0.0  ;;  %v5114_v48 = vadd.f32 %v6876_v58, %v9761_v19 }
 0x2da   :  { %v5180_v31 = vmax.f32 %v5116_v52, 0.0  ;;  %v5245_v1 = vsel %vm5241_vm8, %v5179_v33, 0.0  ;;  %v7543_v52 = vmov 0.0  }
 0x2db   :  { %v5178_v36 = vmax.f32 %v5114_v48, 0.0  ;;  %v6796_v17 = vpop.f32.mrb[4].mxu0  ;;  %v5242_v62 = vsel %vm5241_vm8, %v5177_v60, 0.0  ;;  %6862 = vmatprep.mubr.msk.f32.mxu1 %vm7542_vm9, %v7543_v52 }
 0x2dc   :  { %v6877_v15 = vadd.f32 %v6796_v17, %v6466_v16  ;;  %v4803_v43 = vpop.f32.mrb[5].mxu0  ;;  %v5247_v20 = vsel %vm5241_vm8, %v5180_v31, 0.0 }
 0x2dd   :  { %v5243_v34 = vsel %vm5241_vm8, %v5178_v36, 0.0  ;;  %v6878_v3 = vadd.f32 %v4803_v43, %v2821_v55  ;;  %v6797_v44 = vpop.f32.mrb[6].mxu0 }
 0x2de   :  { %v5244_v26 = vadd.f32 %v5243_v34, %v5242_v62  ;;  %v5119_v37 = vadd.f32 %v6877_v15, %v9761_v19  ;;  %v6879_v12 = vadd.f32 %v6797_v44, %v9692_v28  ;;  %v4806_v27 = vpop.f32.mrb[7].mxu0  ;;  %v5393_v28 = vld [vmem:[%s9998_s3 + $0x10] sm:$0xff] }
 0x2df   :  { %v5117_v5 = vadd.f32 %v6878_v3, %v9761_v19  ;;  %v6880_v16 = vadd.f32 %v4806_v27, %v9694_v11  ;;  %v6869_v6 = vpack.c.bf16 %v5394_v2, %v5393_v28 }
 0x2e0   :  { %v5246_v21 = vadd.f32 %v5245_v1, %v5244_v26  ;;  %v5120_v39 = vadd.f32 %v6879_v12, %v9761_v19  ;;  %v5183_v46 = vmax.f32 %v5119_v37, 0.0 }
 0x2e1   :  { %v5181_v59 = vmax.f32 %v5117_v5, 0.0  ;;  %v5118_v55 = vadd.f32 %v6880_v16, %v9761_v19  ;;  %6870 = vmatpush3.bf16.msra.mxu1 %v6869_v6 }
 0x2e2   :  { %v5248_v4 = vadd.f32 %v5247_v20, %v5246_v21  ;;  %v5184_v48 = vmax.f32 %v5120_v39, 0.0  ;;  %v5253_v31 = vsel %vm5241_vm8, %v5183_v46, 0.0 }
 0x2e3   :  { %v5249_v11 = vsel %vm5241_vm8, %v5181_v59, 0.0  ;;  %v5182_v24 = vmax.f32 %v5118_v55, 0.0  ;;  %v6800_v7 = vpop.f32.mrb[8].mxu0 }
 0x2e4   :  { %v5250_v54 = vadd.f32 %v5249_v11, %v5248_v4  ;;  %v6881_v58 = vadd.f32 %v6800_v7, %v9696_v41  ;;  %v4819_v60 = vpop.f32.mrb[9].mxu0  ;;  %v5255_v26 = vsel %vm5241_vm8, %v5184_v48, 0.0 }
 0x2e5   :  { %v5251_v33 = vsel %vm5241_vm8, %v5182_v24, 0.0  ;;  %v6882_v36 = vadd.f32 %v4819_v60, %v9698_v25  ;;  %v6801_v17 = vpop.f32.mrb[10].mxu0 }
 0x2e6   :  { %v5252_v15 = vadd.f32 %v5251_v33, %v5250_v54  ;;  %v6883_v43 = vadd.f32 %v6801_v17, %v9700_v51  ;;  %v4822_v62 = vpop.f32.mrb[11].mxu0  ;;  %v5123_v34 = vadd.f32 %v6881_v58, %v9761_v19 }
 0x2e7   :  { %v5121_v41 = vadd.f32 %v6882_v36, %v9761_v19  ;;  %v6884_v3 = vadd.f32 %v4822_v62, %v9702_v42 }
 0x2e8   :  { %v5254_v44 = vadd.f32 %v5253_v31, %v5252_v15  ;;  %v5124_v25 = vadd.f32 %v6883_v43, %v9761_v19  ;;  %v5187_v1 = vmax.f32 %v5123_v34, 0.0 }
 0x2e9   :  { %v5185_v37 = vmax.f32 %v5121_v41, 0.0  ;;  %v5122_v12 = vadd.f32 %v6884_v3, %v9761_v19 }
 0x2ea   :  { %v5256_v27 = vadd.f32 %v5255_v26, %v5254_v44  ;;  %v5188_v39 = vmax.f32 %v5124_v25, 0.0  ;;  %v5261_v11 = vsel %vm5241_vm8, %v5187_v1, 0.0 }
 0x2eb   :  { %v5257_v51 = vsel %vm5241_vm8, %v5185_v37, 0.0  ;;  %v5186_v5 = vmax.f32 %v5122_v12, 0.0  ;;  %v6804_v16 = vpop.f32.mrb[12].mxu0 }
 0x2ec   :  { %v5258_v21 = vadd.f32 %v5257_v51, %v5256_v27  ;;  %v6885_v20 = vadd.f32 %v6804_v16, %v9704_v50  ;;  %v4835_v59 = vpop.f32.mrb[13].mxu0  ;;  %v5263_v54 = vsel %vm5241_vm8, %v5188_v39, 0.0 }
 0x2ed   :  { %v5259_v42 = vsel %vm5241_vm8, %v5186_v5, 0.0  ;;  %v6886_v55 = vadd.f32 %v4835_v59, %v9706_v10  ;;  %v6805_v46 = vpop.f32.mrb[14].mxu0 }
 0x2ee   :  { %v5260_v4 = vadd.f32 %v5259_v42, %v5258_v21  ;;  %v6887_v28 = vadd.f32 %v6805_v46, %v9708_v0  ;;  %v4838_v2 = vpop.f32.mrb[15].mxu0  ;;  %v5127_v24 = vadd.f32 %v6885_v20, %v9761_v19 }
 0x2ef   :  { %v5125_v7 = vadd.f32 %v6886_v55, %v9761_v19  ;;  %v6888_v6 = vadd.f32 %v4838_v2, %v9710_v47 }
 0x2f0   :  { %v5262_v50 = vadd.f32 %v5261_v11, %v5260_v4  ;;  %v5128_v60 = vadd.f32 %v6887_v28, %v9761_v19  ;;  %v5191_v48 = vmax.f32 %v5127_v24, 0.0 }
 0x2f1   :  { %v5189_v58 = vmax.f32 %v5125_v7, 0.0  ;;  %v5126_v10 = vadd.f32 %v6888_v6, %v9761_v19 }
 0x2f2   :  { %v5264_v52 = vadd.f32 %v5263_v54, %v5262_v50  ;;  %v5192_v62 = vmax.f32 %v5128_v60, 0.0  ;;  %v5269_v26 = vsel %vm5241_vm8, %v5191_v48, 0.0 }
 0x2f3   :  { %v5265_v0 = vsel %vm5241_vm8, %v5189_v58, 0.0  ;;  %v5190_v33 = vmax.f32 %v5126_v10, 0.0  ;;  %v6808_v36 = vpop.f32.mrb[16].mxu0 }
 0x2f4   :  { %v5266_v17 = vadd.f32 %v5265_v0, %v5264_v52  ;;  %v6889_v15 = vadd.f32 %v6808_v36, %v9712_v63  ;;  %v4851_v43 = vpop.f32.mrb[17].mxu0  ;;  %v5271_v27 = vsel %vm5241_vm8, %v5192_v62, 0.0 }
 0x2f5   :  { %v5267_v47 = vsel %vm5241_vm8, %v5190_v33, 0.0  ;;  %v6890_v31 = vadd.f32 %v4851_v43, %v9714_v57  ;;  %v6809_v34 = vpop.f32.mrb[18].mxu0 }
 0x2f6   :  { %v5268_v41 = vadd.f32 %v5267_v47, %v5266_v17  ;;  %v6891_v3 = vadd.f32 %v6809_v34, %v9716_v35  ;;  %v4854_v44 = vpop.f32.mrb[19].mxu0  ;;  %v5131_v37 = vadd.f32 %v6889_v15, %v9761_v19 }
 0x2f7   :  { %v5129_v25 = vadd.f32 %v6890_v31, %v9761_v19  ;;  %v6892_v12 = vadd.f32 %v4854_v44, %v9718_v14 }
 0x2f8   :  { %v5270_v63 = vadd.f32 %v5269_v26, %v5268_v41  ;;  %v5132_v51 = vadd.f32 %v6891_v3, %v9761_v19  ;;  %v5195_v16 = vmax.f32 %v5131_v37, 0.0 }
 0x2f9   :  { %v5193_v1 = vmax.f32 %v5129_v25, 0.0  ;;  %v5130_v57 = vadd.f32 %v6892_v12, %v9761_v19 }
 0x2fa   :  { %v5272_v5 = vadd.f32 %v5271_v27, %v5270_v63  ;;  %v5196_v55 = vmax.f32 %v5132_v51, 0.0  ;;  %v5277_v24 = vsel %vm5241_vm8, %v5195_v16, 0.0 }
 0x2fb   :  { %v5273_v35 = vsel %vm5241_vm8, %v5193_v1, 0.0  ;;  %v5194_v21 = vmax.f32 %v5130_v57, 0.0  ;;  %v6812_v20 = vpop.f32.mrb[20].mxu0 }
 0x2fc   :  { %v5274_v59 = vadd.f32 %v5273_v35, %v5272_v5  ;;  %v6893_v39 = vadd.f32 %v6812_v20, %v9720_v61  ;;  %v4867_v42 = vpop.f32.mrb[21].mxu0  ;;  %v5279_v54 = vsel %vm5241_vm8, %v5196_v55, 0.0 }
 0x2fd   :  { %v5275_v14 = vsel %vm5241_vm8, %v5194_v21, 0.0  ;;  %v6894_v46 = vadd.f32 %v4867_v42, %v9722_v56  ;;  %v6813_v4 = vpop.f32.mrb[22].mxu0 }
 0x2fe   :  { %v5276_v28 = vadd.f32 %v5275_v14, %v5274_v59  ;;  %v6895_v2 = vadd.f32 %v6813_v4, %v9724_v49  ;;  %v4870_v11 = vpop.f32.mrb[23].mxu0  ;;  %v5135_v7 = vadd.f32 %v6893_v39, %v9761_v19 }
 0x2ff   :  { %v5133_v6 = vadd.f32 %v6894_v46, %v9761_v19  ;;  %v6896_v50 = vadd.f32 %v4870_v11, %v9726_v22 }
 0x300   :  { %v5278_v61 = vadd.f32 %v5277_v24, %v5276_v28  ;;  %v5136_v60 = vadd.f32 %v6895_v2, %v9761_v19  ;;  %v5199_v52 = vmax.f32 %v5135_v7, 0.0 }
 0x301   :  { %v5197_v58 = vmax.f32 %v5133_v6, 0.0  ;;  %v5134_v56 = vadd.f32 %v6896_v50, %v9761_v19 }
 0x302   :  { %v5280_v10 = vadd.f32 %v5279_v54, %v5278_v61  ;;  %v5200_v15 = vmax.f32 %v5136_v60, 0.0  ;;  %v5285_v41 = vsel %vm5241_vm8, %v5199_v52, 0.0 }
 0x303   :  { %v5281_v49 = vsel %vm5241_vm8, %v5197_v58, 0.0  ;;  %v5198_v48 = vmax.f32 %v5134_v56, 0.0  ;;  %v6816_v0 = vpop.f32.mrb[24].mxu0 }
 0x304   :  { %v5282_v33 = vadd.f32 %v5281_v49, %v5280_v10  ;;  %v6897_v36 = vadd.f32 %v6816_v0, %v9728_v23  ;;  %v4883_v17 = vpop.f32.mrb[25].mxu0  ;;  %v5287_v37 = vsel %vm5241_vm8, %v5200_v15, 0.0 }
 0x305   :  { %v5283_v22 = vsel %vm5241_vm8, %v5198_v48, 0.0  ;;  %v6898_v43 = vadd.f32 %v4883_v17, %v9736_v53  ;;  %v6817_v62 = vpop.f32.mrb[26].mxu0 }
 0x306   :  { %v5284_v47 = vadd.f32 %v5283_v22, %v5282_v33  ;;  %v6899_v31 = vadd.f32 %v6817_v62, %v9738_v18  ;;  %v4886_v34 = vpop.f32.mrb[27].mxu0  ;;  %v5139_v3 = vadd.f32 %v6897_v36, %v9761_v19 }
 0x307   :  { %v5137_v44 = vadd.f32 %v6898_v43, %v9761_v19  ;;  %v6900_v26 = vadd.f32 %v4886_v34, %v9740_v9 }
 0x308   :  { %v5286_v23 = vadd.f32 %v5285_v41, %v5284_v47  ;;  %v5140_v12 = vadd.f32 %v6899_v31, %v9761_v19  ;;  %v5203_v18 = vmax.f32 %v5139_v3, 0.0 }
 0x309   :  { %v5201_v25 = vmax.f32 %v5137_v44, 0.0  ;;  %v5138_v53 = vadd.f32 %v6900_v26, %v9761_v19 }
 0x30a   :  { %v5288_v63 = vadd.f32 %v5287_v37, %v5286_v23  ;;  %v6564_v27 = vpop.f32.mrb[36].mxu1  ;;  %v5204_v20 = vmax.f32 %v5140_v12, 0.0  ;;  %v5293_v28 = vsel %vm5241_vm8, %v5203_v18, 0.0 }
 0x30b   :  { %v5289_v1 = vsel %vm5241_vm8, %v5201_v25, 0.0  ;;  %v5202_v51 = vmax.f32 %v5138_v53, 0.0  ;;  %v6820_v57 = vpop.f32.mrb[28].mxu0  ;;  %v3367_v5 = vpop.f32.mrb[37].mxu1 }
 0x30c   :  { %v5290_v16 = vadd.f32 %v5289_v1, %v5288_v63  ;;  %v6901_v35 = vadd.f32 %v6820_v57, %v9742_v38  ;;  %v4899_v9 = vpop.f32.mrb[29].mxu0  ;;  %v6565_v21 = vpop.f32.mrb[38].mxu1  ;;  %v5295_v7 = vsel %vm5241_vm8, %v5204_v20, 0.0 }
 0x30d   :  { %v5291_v59 = vsel %vm5241_vm8, %v5202_v51, 0.0  ;;  %v6902_v39 = vadd.f32 %v4899_v9, %v9744_v8  ;;  %v6821_v42 = vpop.f32.mrb[30].mxu0  ;;  %v3370_v55 = vpop.f32.mrb[39].mxu1 }
 0x30e   :  { %v5292_v14 = vadd.f32 %v5291_v59, %v5290_v16  ;;  %v6903_v46 = vadd.f32 %v6821_v42, %v9746_v40  ;;  %v4902_v4 = vpop.f32.mrb[31].mxu0  ;;  %v5143_v2 = vadd.f32 %v6901_v35, %v9761_v19 }
 0x30f   :  { %v5141_v11 = vadd.f32 %v6902_v39, %v9761_v19  ;;  %v6904_v38 = vadd.f32 %v4902_v4, %v9748_v45 }
 0x310   :  { %v5294_v24 = vadd.f32 %v5293_v28, %v5292_v14  ;;  %v5144_v8 = vadd.f32 %v6903_v46, %v9761_v19  ;;  %v5207_v40 = vmax.f32 %v5143_v2, 0.0 }
 0x311   :  { %v5205_v6 = vmax.f32 %v5141_v11, 0.0  ;;  %v5142_v50 = vadd.f32 %v6904_v38, %v9761_v19 }
 0x312   :  { %v5296_v61 = vadd.f32 %v5295_v7, %v5294_v24  ;;  %v6568_v54 = vpop.f32.mrb[40].mxu1  ;;  %v5208_v0 = vmax.f32 %v5144_v8, 0.0  ;;  %v5301_v47 = vsel %vm5241_vm8, %v5207_v40, 0.0 }
 0x313   :  { %v5297_v58 = vsel %vm5241_vm8, %v5205_v6, 0.0  ;;  %v5206_v60 = vmax.f32 %v5142_v50, 0.0  ;;  %v6824_v56 = vpop.f32.mrb[32].mxu0  ;;  %v3383_v10 = vpop.f32.mrb[41].mxu1 }
 0x314   :  { %v5298_v52 = vadd.f32 %v5297_v58, %v5296_v61  ;;  %v6905_v49 = vadd.f32 %v6824_v56, %v9750_v32  ;;  %v4915_v45 = vpop.f32.mrb[33].mxu0  ;;  %v6569_v48 = vpop.f32.mrb[42].mxu1  ;;  %v5303_v3 = vsel %vm5241_vm8, %v5208_v0, 0.0 }
 0x315   :  { %v5299_v33 = vsel %vm5241_vm8, %v5206_v60, 0.0  ;;  %v6906_v36 = vadd.f32 %v4915_v45, %v9752_v30  ;;  %v6825_v17 = vpop.f32.mrb[34].mxu0  ;;  %v3386_v15 = vpop.f32.mrb[43].mxu1 }
 0x316   :  { %v5300_v22 = vadd.f32 %v5299_v33, %v5298_v52  ;;  %v6907_v43 = vadd.f32 %v6825_v17, %v9754_v13  ;;  %v4918_v62 = vpop.f32.mrb[35].mxu0  ;;  %v5147_v31 = vadd.f32 %v6905_v49, %v9761_v19 }
 0x317   :  { %v5145_v34 = vadd.f32 %v6906_v36, %v9761_v19  ;;  %v6908_v32 = vadd.f32 %v4918_v62, %v9756_v29 }
 0x318   :  { %v5302_v41 = vadd.f32 %v5301_v47, %v5300_v22  ;;  %v5148_v30 = vadd.f32 %v6907_v43, %v9761_v19  ;;  %v5211_v37 = vmax.f32 %v5147_v31, 0.0 }
 0x319   :  { %v5209_v44 = vmax.f32 %v5145_v34, 0.0  ;;  %v5146_v26 = vadd.f32 %v6908_v32, %v9761_v19 }
 0x31a   :  { %v9867_v23 = vadd.f32 %v5303_v3, %v5302_v41  ;;  %v6572_v13 = vpop.f32.mrb[44].mxu1  ;;  %v5212_v51 = vmax.f32 %v5148_v30, 0.0  ;;  %v5314_v42 = vsel %vm5241_vm8, %v5211_v37, 0.0 }
 0x31b   :  { %v5210_v25 = vmax.f32 %v5146_v26, 0.0  ;;  %v6828_v12 = vpop.f32.mrb[36].mxu0  ;;  %v9869_v53 = vpop.f32.mrb[45].mxu1  ;;  %v5311_v29 = vsel %vm5241_vm8, %v5209_v44, 0.0 }
 0x31c   :  { %v6909_v63 = vadd.f32 %v6828_v12, %v6564_v27  ;;  %v4931_v18 = vpop.f32.mrb[37].mxu0  ;;  %v9871_v1 = vpop.f32.mrb[46].mxu1  ;;  %v5316_v28 = vsel %vm5241_vm8, %v5212_v51, 0.0 }
 0x31d   :  { %v5312_v57 = vsel %vm5241_vm8, %v5210_v25, 0.0  ;;  %v6910_v16 = vadd.f32 %v4931_v18, %v3367_v5  ;;  %v6829_v35 = vpop.f32.mrb[38].mxu0  ;;  %v9875_v9 = vpop.f32.mrb[47].mxu1 }
 0x31e   :  { %v5313_v20 = vadd.f32 %v5312_v57, %v5311_v29  ;;  %v6911_v59 = vadd.f32 %v6829_v35, %v6565_v21  ;;  %v4934_v39 = vpop.f32.mrb[39].mxu0  ;;  %v5151_v14 = vadd.f32 %v6909_v63, %v9761_v19 }
 0x31f   :  { %v5149_v27 = vadd.f32 %v6910_v16, %v9761_v19  ;;  %v6912_v46 = vadd.f32 %v4934_v39, %v3370_v55 }
 0x320   :  { %v5315_v4 = vadd.f32 %v5314_v42, %v5313_v20  ;;  %v5152_v11 = vadd.f32 %v6911_v59, %v9761_v19  ;;  %v5215_v21 = vmax.f32 %v5151_v14, 0.0 }
 0x321   :  { %v5213_v2 = vmax.f32 %v5149_v27, 0.0  ;;  %v5150_v5 = vadd.f32 %v6912_v46, %v9761_v19 }
 0x322   :  { %v5317_v38 = vadd.f32 %v5316_v28, %v5315_v4  ;;  %v9883_v24 = vpop.f32.mrb[48].mxu1  ;;  %v5216_v60 = vmax.f32 %v5152_v11, 0.0  ;;  %v5322_v17 = vsel %vm5241_vm8, %v5215_v21, 0.0 }
 0x323   :  { %v5318_v7 = vsel %vm5241_vm8, %v5213_v2, 0.0  ;;  %v5214_v6 = vmax.f32 %v5150_v5, 0.0  ;;  %v6832_v8 = vpop.f32.mrb[40].mxu0  ;;  %v9886_v50 = vpop.f32.mrb[49].mxu1 }
 0x324   :  { %v5319_v61 = vadd.f32 %v5318_v7, %v5317_v38  ;;  %v6913_v55 = vadd.f32 %v6832_v8, %v6568_v54  ;;  %v4947_v40 = vpop.f32.mrb[41].mxu0  ;;  %v9888_v58 = vpop.f32.mrb[50].mxu1  ;;  %v5324_v47 = vsel %vm5241_vm8, %v5216_v60, 0.0 }
 0x325   :  { %v5320_v56 = vsel %vm5241_vm8, %v5214_v6, 0.0  ;;  %v6914_v52 = vadd.f32 %v4947_v40, %v3383_v10  ;;  %v6833_v49 = vpop.f32.mrb[42].mxu0  ;;  %v9891_v45 = vpop.f32.mrb[51].mxu1 }
 0x326   :  { %v5321_v0 = vadd.f32 %v5320_v56, %v5319_v61  ;;  %v6915_v33 = vadd.f32 %v6833_v49, %v6569_v48  ;;  %v4950_v36 = vpop.f32.mrb[43].mxu0  ;;  %v5155_v22 = vadd.f32 %v6913_v55, %v9761_v19 }
 0x327   :  { %v5153_v43 = vadd.f32 %v6914_v52, %v9761_v19  ;;  %v6916_v54 = vadd.f32 %v4950_v36, %v3386_v15 }
 0x328   :  { %v5323_v62 = vadd.f32 %v5322_v17, %v5321_v0  ;;  %v5156_v34 = vadd.f32 %v6915_v33, %v9761_v19  ;;  %v5219_v48 = vmax.f32 %v5155_v22, 0.0 }
 0x329   :  { %v5217_v31 = vmax.f32 %v5153_v43, 0.0  ;;  %v5154_v10 = vadd.f32 %v6916_v54, %v9761_v19 }
 0x32a   :  { %v5325_v32 = vadd.f32 %v5324_v47, %v5323_v62  ;;  %v9899_v41 = vpop.f32.mrb[52].mxu1  ;;  %v5220_v63 = vmax.f32 %v5156_v34, 0.0  ;;  %v5330_v59 = vsel %vm5241_vm8, %v5219_v48, 0.0 }
 0x32b   :  { %v5326_v3 = vsel %vm5241_vm8, %v5217_v31, 0.0  ;;  %v5218_v44 = vmax.f32 %v5154_v10, 0.0  ;;  %v6836_v30 = vpop.f32.mrb[44].mxu0  ;;  %v9902_v26 = vpop.f32.mrb[53].mxu1 }
 0x32c   :  { %v5327_v37 = vadd.f32 %v5326_v3, %v5325_v32  ;;  %v6917_v15 = vadd.f32 %v6836_v30, %v6572_v13  ;;  %v4963_v25 = vpop.f32.mrb[45].mxu0  ;;  %v9904_v12 = vpop.f32.mrb[54].mxu1  ;;  %v5332_v27 = vsel %vm5241_vm8, %v5220_v63, 0.0 }
 0x32d   :  { %v5328_v18 = vsel %vm5241_vm8, %v5218_v44, 0.0  ;;  %v6918_v29 = vadd.f32 %v4963_v25, %v9869_v53  ;;  %v6837_v51 = vpop.f32.mrb[46].mxu0  ;;  %v9908_v57 = vpop.f32.mrb[55].mxu1 }
 0x32e   :  { %v5329_v16 = vadd.f32 %v5328_v18, %v5327_v37  ;;  %v6919_v35 = vadd.f32 %v6837_v51, %v9871_v1  ;;  %v4966_v20 = vpop.f32.mrb[47].mxu0  ;;  %v5159_v39 = vadd.f32 %v6917_v15, %v9761_v19 }
 0x32f   :  { %v5157_v13 = vadd.f32 %v6918_v29, %v9761_v19  ;;  %v6920_v42 = vadd.f32 %v4966_v20, %v9875_v9 }
 0x330   :  { %v5331_v14 = vadd.f32 %v5330_v59, %v5329_v16  ;;  %v5160_v53 = vadd.f32 %v6919_v35, %v9761_v19  ;;  %v5223_v1 = vmax.f32 %v5159_v39, 0.0 }
 0x331   :  { %v5221_v46 = vmax.f32 %v5157_v13, 0.0  ;;  %v5158_v4 = vadd.f32 %v6920_v42, %v9761_v19 }
 0x332   :  { %v5333_v28 = vadd.f32 %v5332_v27, %v5331_v14  ;;  %v6584_v2 = vpop.f32.mrb[56].mxu1  ;;  %v5224_v61 = vmax.f32 %v5160_v53, 0.0  ;;  %v5338_v33 = vsel %vm5241_vm8, %v5223_v1, 0.0 }
 0x333   :  { %v5334_v11 = vsel %vm5241_vm8, %v5221_v46, 0.0  ;;  %v5222_v5 = vmax.f32 %v5158_v4, 0.0  ;;  %v6840_v38 = vpop.f32.mrb[48].mxu0  ;;  %v3447_v21 = vpop.f32.mrb[57].mxu1 }
 0x334   :  { %v5335_v7 = vadd.f32 %v5334_v11, %v5333_v28  ;;  %v6921_v6 = vadd.f32 %v6840_v38, %v9883_v24  ;;  %v4979_v9 = vpop.f32.mrb[49].mxu0  ;;  %v6585_v8 = vpop.f32.mrb[58].mxu1  ;;  %v5340_v43 = vsel %vm5241_vm8, %v5224_v61, 0.0 }
 0x335   :  { %v5336_v55 = vsel %vm5241_vm8, %v5222_v5, 0.0  ;;  %v6922_v40 = vadd.f32 %v4979_v9, %v9886_v50  ;;  %v6841_v60 = vpop.f32.mrb[50].mxu0  ;;  %v3450_v56 = vpop.f32.mrb[59].mxu1 }
 0x336   :  { %v5337_v52 = vadd.f32 %v5336_v55, %v5335_v7  ;;  %v6923_v49 = vadd.f32 %v6841_v60, %v9888_v58  ;;  %v4982_v0 = vpop.f32.mrb[51].mxu0  ;;  %v5163_v36 = vadd.f32 %v6921_v6, %v9761_v19 }
 0x337   :  { %v5161_v17 = vadd.f32 %v6922_v40, %v9761_v19  ;;  %v6924_v24 = vadd.f32 %v4982_v0, %v9891_v45 }
 0x338   :  { %v5339_v22 = vadd.f32 %v5338_v33, %v5337_v52  ;;  %v5164_v50 = vadd.f32 %v6923_v49, %v9761_v19  ;;  %v5227_v58 = vmax.f32 %v5163_v36, 0.0 }
 0x339   :  { %v5225_v54 = vmax.f32 %v5161_v17, 0.0  ;;  %v5162_v62 = vadd.f32 %v6924_v24, %v9761_v19 }
 0x33a   :  { %v5341_v47 = vadd.f32 %v5340_v43, %v5339_v22  ;;  %v6588_v31 = vpop.f32.mrb[60].mxu1  ;;  %v5228_v37 = vmax.f32 %v5164_v50, 0.0  ;;  %v5346_v35 = vsel %vm5241_vm8, %v5227_v58, 0.0 }
 0x33b   :  { %v5342_v34 = vsel %vm5241_vm8, %v5225_v54, 0.0  ;;  %v5226_v10 = vmax.f32 %v5162_v62, 0.0  ;;  %v6844_v32 = vpop.f32.mrb[52].mxu0  ;;  %v3463_v48 = vpop.f32.mrb[61].mxu1 }
 0x33c   :  { %v5343_v3 = vadd.f32 %v5342_v34, %v5341_v47  ;;  %v6925_v44 = vadd.f32 %v6844_v32, %v9899_v41  ;;  %v4995_v45 = vpop.f32.mrb[53].mxu0  ;;  %v6589_v30 = vpop.f32.mrb[62].mxu1  ;;  %v5348_v13 = vsel %vm5241_vm8, %v5228_v37, 0.0 }
 0x33d   :  { %v5344_v15 = vsel %vm5241_vm8, %v5226_v10, 0.0  ;;  %v6926_v25 = vadd.f32 %v4995_v45, %v9902_v26  ;;  %v6845_v63 = vpop.f32.mrb[54].mxu0  ;;  %v3466_v18 = vpop.f32.mrb[63].mxu1 }
 0x33e   :  { %v5345_v29 = vadd.f32 %v5344_v15, %v5343_v3  ;;  %v6927_v51 = vadd.f32 %v6845_v63, %v9904_v12  ;;  %v4998_v16 = vpop.f32.mrb[55].mxu0  ;;  %v5167_v20 = vadd.f32 %v6925_v44, %v9761_v19  ;;  %v5305_v15 = vrot.slane %v9867_v23, 4 }
 0x33f   :  { %v5165_v59 = vadd.f32 %v6926_v25, %v9761_v19  ;;  %v6928_v41 = vadd.f32 %v4998_v16, %v9908_v57 }
 0x340   :  { %v5347_v39 = vadd.f32 %v5346_v35, %v5345_v29  ;;  %v5168_v26 = vadd.f32 %v6927_v51, %v9761_v19  ;;  %v5231_v46 = vmax.f32 %v5167_v20, 0.0  ;;  %v5306_v20 = vadd.f32 %v5305_v15, %v9867_v23 }
 0x341   :  { %v5229_v42 = vmax.f32 %v5165_v59, 0.0  ;;  %v5166_v14 = vadd.f32 %v6928_v41, %v9761_v19 }
 0x342   :  { %v5349_v27 = vadd.f32 %v5348_v13, %v5347_v39  ;;  %v5232_v5 = vmax.f32 %v5168_v26, 0.0  ;;  %v5354_v55 = vsel %vm5241_vm8, %v5231_v46, 0.0 }
 0x343   :  { %v5350_v12 = vsel %vm5241_vm8, %v5229_v42, 0.0  ;;  %v5230_v53 = vmax.f32 %v5166_v14, 0.0  ;;  %v6848_v4 = vpop.f32.mrb[56].mxu0  ;;  %v5307_v42 = vrot.slane %v5306_v20, 2 }
 0x344   :  { %v5351_v28 = vadd.f32 %v5350_v12, %v5349_v27  ;;  %v6929_v1 = vadd.f32 %v6848_v4, %v6584_v2  ;;  %v5011_v11 = vpop.f32.mrb[57].mxu0  ;;  %v5356_v0 = vsel %vm5241_vm8, %v5232_v5, 0.0 }
 0x345   :  { %v5352_v57 = vsel %vm5241_vm8, %v5230_v53, 0.0  ;;  %v6930_v38 = vadd.f32 %v5011_v11, %v3447_v21  ;;  %v6849_v7 = vpop.f32.mrb[58].mxu0 }
 0x346   :  { %v5353_v6 = vadd.f32 %v5352_v57, %v5351_v28  ;;  %v6931_v9 = vadd.f32 %v6849_v7, %v6585_v8  ;;  %v5014_v61 = vpop.f32.mrb[59].mxu0  ;;  %v5171_v40 = vadd.f32 %v6929_v1, %v9761_v19  ;;  %v5956_v7 = vld [vmem:[%s9999_s4] ss:$0 sm:$0xff] }
 0x347   :  { %v5169_v60 = vadd.f32 %v6930_v38, %v9761_v19  ;;  %v6932_v52 = vadd.f32 %v5014_v61, %v3450_v56 }
 0x348   :  { %v5355_v49 = vadd.f32 %v5354_v55, %v5353_v6  ;;  %v5172_v33 = vadd.f32 %v6931_v9, %v9761_v19  ;;  %v5235_v17 = vmax.f32 %v5171_v40, 0.0 }
 0x349   :  { %v5233_v2 = vmax.f32 %v5169_v60, 0.0  ;;  %v5170_v36 = vadd.f32 %v6932_v52, %v9761_v19 }
 0x34a   :  { %v5357_v21 = vadd.f32 %v5356_v0, %v5355_v49  ;;  %v5236_v62 = vmax.f32 %v5172_v33, 0.0  ;;  %v5362_v3 = vsel %vm5241_vm8, %v5235_v17, 0.0 }
 0x34b   :  { %v5358_v8 = vsel %vm5241_vm8, %v5233_v2, 0.0  ;;  %v5234_v24 = vmax.f32 %v5170_v36, 0.0  ;;  %v6852_v22 = vpop.f32.mrb[60].mxu0 }
 0x34c   :  { %v5359_v43 = vadd.f32 %v5358_v8, %v5357_v21  ;;  %v6933_v54 = vadd.f32 %v6852_v22, %v6588_v31  ;;  %v5027_v50 = vpop.f32.mrb[61].mxu0  ;;  %v5364_v31 = vsel %vm5241_vm8, %v5236_v62, 0.0 }
 0x34d   :  { %v5360_v56 = vsel %vm5241_vm8, %v5234_v24, 0.0  ;;  %v6934_v47 = vadd.f32 %v5027_v50, %v3463_v48  ;;  %v6853_v58 = vpop.f32.mrb[62].mxu0 }
 0x34e   :  { %v5361_v34 = vadd.f32 %v5360_v56, %v5359_v43  ;;  %v6935_v10 = vadd.f32 %v6853_v58, %v6589_v30  ;;  %v5030_v32 = vpop.f32.mrb[63].mxu0  ;;  %v5175_v44 = vadd.f32 %v6933_v54, %v9761_v19 }
 0x34f   :  { %v5173_v45 = vadd.f32 %v6934_v47, %v9761_v19  ;;  %v6936_v37 = vadd.f32 %v5030_v32, %v3466_v18 }
 0x350   :  { %v5363_v25 = vadd.f32 %v5362_v3, %v5361_v34  ;;  %v5176_v29 = vadd.f32 %v6935_v10, %v9761_v19  ;;  %v5239_v30 = vmax.f32 %v5175_v44, 0.0 }
 0x351   :  { %v5237_v63 = vmax.f32 %v5173_v45, 0.0  ;;  %v5174_v48 = vadd.f32 %v6936_v37, %v9761_v19  ;;  %v5308_v19 = vadd.f32 %v5307_v42, %v5306_v20 }
 0x352   :  { %v5365_v51 = vadd.f32 %v5364_v31, %v5363_v25  ;;  %v5240_v41 = vmax.f32 %v5176_v29, 0.0  ;;  %v5370_v13 = vsel %vm5241_vm8, %v5239_v30, 0.0 }
 0x353   :  { %v5366_v16 = vsel %vm5241_vm8, %v5237_v63, 0.0  ;;  %v5238_v35 = vmax.f32 %v5174_v48, 0.0  ;;  %v5309_v4 = vrot.slane %v5308_v19, 1 }
 0x354   :  { %v5367_v59 = vadd.f32 %v5366_v16, %v5365_v51  ;;  %v5372_v14 = vsel %vm5241_vm8, %v5240_v41, 0.0 }
 0x355   :  { %v5368_v18 = vsel %vm5241_vm8, %v5238_v35, 0.0  ;;  %v5310_v1 = vadd.f32 %v5309_v4, %v5308_v19 }
 0x356   :  { %v5369_v39 = vadd.f32 %v5368_v18, %v5367_v59 }
 0x357   :  { %v5382_v5 = vmul.f32 0.00390625, %v5310_v1 }
 0x358   :  { %v5371_v26 = vadd.f32 %v5370_v13, %v5369_v39 }
 0x35a   :  { %v5373_v27 = vadd.f32 %v5372_v14, %v5371_v26 }
 0x35c   :  { %v5374_v46 = vrot.slane %v5373_v27, 4 }
 0x35e   :  { %v5375_v12 = vadd.f32 %v5374_v46, %v5373_v27 }
 0x360   :  { %v5376_v53 = vrot.slane %v5375_v12, 2 }
 0x362   :  { %v5377_v28 = vadd.f32 %v5376_v53, %v5375_v12 }
 0x364   :  { %v5378_v23 = vrot.slane %v5377_v28, 1 }
 0x366   :  { %v5379_v11 = vadd.f32 %v5378_v23, %v5377_v28 }
 0x368   :  { %v5383_v57 = vmul.f32 0.00390625, %v5379_v11 }
 0x36a   :  { %v5387_v38 = vsel %vm5386_vm10, %v5383_v57, %v5382_v5 }
 0x36b   :  { %6863 = vmatmul.mubr.msk.f32.vlgmr.msra.gmra.mrb[64].mxu1 %vm5241_vm8, %v5387_v38  ;;  %5390 = vst.msk [vmem:[#allocation2] sm:$0x3] %vm5389_vm11, %v5387_v38 }
 0x43e   :  { %v5470_v6 = vpop.f32.mrb[64].mxu1 }
 0x43f   :  { %v5471_v9 = vadd.f32 %v5956_v7, %v5470_v6  ;;  %v6864_v61 = vpop.f32.mrb[65].mxu1 }
 0x441   :  { %v5475_v55 = vsel %vm5474_vm12, %v5471_v9, -inf }
 0x442   :  { %5476 = vmax.xlane.f32.xlu0 %v5475_v55 }
 0x4cf   :  { %v5477_v40 = vpop.xlane.xlu0 %5476 }
 0x4d0   :  { %v5478_v60 = vsub.f32 %v5471_v9, %v5477_v40 }
 0x4d2   :  { %v5479_v52 = vmul.f32 1.442695, %v5478_v60 }
 0x4d4   :  { %7436 = vpow2.f32 %v5479_v52 }
 0x4de   :  { %v7437_v49 = vpop.eup %7436 }
 0x4df   :  { %v5481_v0 = vsel %vm5474_vm12, %v7437_v49, 0.0 }
 0x4e0   :  { %5482 = vadd.xlane.f32.xlu0 %v5481_v0 }
 0x4e1   :  { %7504 = shalt.err (!%p7501_p4)
}
 0x4e2   :  { %s7505_s13 = scalar_lea.hbm %s10000_s5, 32 }
 0x4e3   :  { %p7506_p5 = scmp.ne.s32.totalorder %s10000_s5, %s7505_s13  ;;  %p7509_p6 = scmp.lt.u32.totalorder %s7505_s13, %s10000_s5 }
 0x4e5   :  { %p7511_p7 = pnand %p7509_p6, %p7506_p5 }
 0x4e7   :  { %7514 = shalt.err (!%p7511_p7)
}
 0x4e8   :  { %5496 = dma.vmem_to_hbm [thread:$0]  %s5494_s10, 32, %s10000_s5, [#allocation3]  }
 0x4e9   :  { %s7545_s19 = smov [#allocation4]  }
 0x4ea   :  { %s5503_s20 = sshll.u32 %s7545_s19, 4  ;;  %s5504_s20 = int_to_ptr.vmem [resolvable:$true] %s5503_s20 }
 0x4eb   :  { %s7515_s21 = scalar_lea.vmem %s5504_s20, 32  ;;  %p7520_p9 = scmp.lt.s32.totalorder %s5504_s20, %s5504_s20 }
 0x4ec   :  { %p7516_p8 = scmp.ne.s32.totalorder %s5504_s20, %s7515_s21  ;;  %p7521_p10 = scmp.lt.s32.totalorder %s7515_s21, %s7515_s21 }
 0x4ee   :  { %p7522_p11 = por %p7521_p10, %p7520_p9 }
 0x4f0   :  { %p7523_p12 = pnand %p7522_p11, %p7516_p8 }
 0x56d   :  { %v5483_v2 = vpop.xlane.xlu0 %5482 }
 0x56e   :  { %7438 = vrcp.f32 %v5483_v2 }
 0x578   :  { %v7439_v33 = vpop.eup %7438 }
 0x579   :  { %v5485_v36 = vmul.f32 %v7439_v33, %v7437_v49 }
 0x57b   :  { %5486 = vst.msk [vmem:[#allocation4] sm:$0x3] %vm5474_vm12, %v5485_v36 }
 0x57c   :  { %7526 = shalt.err (!%p7523_p12)
}
 0x57d   :  { %s7527_s5 = scalar_lea.hbm %s10001_s6, 32 }
 0x57e   :  { %p7528_p13 = scmp.ne.s32.totalorder %s10001_s6, %s7527_s5  ;;  %p7531_p0 = scmp.lt.u32.totalorder %s7527_s5, %s10001_s6 }
 0x580   :  { %p7533_p1 = pnand %p7531_p0, %p7528_p13 }
 0x582   :  { %7536 = shalt.err (!%p7533_p1)
}
 0x583   :  { %5506 = dma.vmem_to_hbm [thread:$0]  %s5504_s20, 32, %s10001_s6, [#allocation5]  }
 0x584   :  { %7537 = dma.done.wait [#allocation3], 32  }
 0x585   :  { %7538 = vsyncadd [#allocation3], 4294967264 }
 0x586   :  { %7539 = dma.done.wait [#allocation5], 32  }
 0x587   :  { %7540 = vsyncadd [#allocation5], 4294967264 }
 0x588   :  { %5513 = vsyncpa [#allocation3], 1 }
 0x589   :  { %5514 = vsyncpa [#allocation5], 1 }

</bundles_post_ra>
